<compile_context>
chip_gen: v7x
topology: tpu7x:2x2x1
jax: 0.10.0
libtpu: 0.0.40
codegen_flags: <defaults>
</compile_context>

<pallas_src>
import jax
import jax.numpy as jnp
from jax.experimental import pallas as pl
from jax.experimental.pallas import tpu as pltpu


# ----------------------------------------------------------------------------
# Kernel builder
# ----------------------------------------------------------------------------
def _build_kernel(H, W, Cin, mode, with_stats):
    """mode: 'plain' | 'res' (identity residual) | 'sc' (fused 1x1 shortcut)."""
    Hp, Wp = H + 2, W + 2

    def _conv_acc(x_ref, scale_ref, bias_ref, w_ref, ap_ref):
        # BN + ReLU on the VPU in f32, stored bf16 into the halo interior.
        a = jnp.maximum(
            x_ref[0].astype(jnp.float32) * scale_ref[...] + bias_ref[...], 0.0)
        # Zero only the 1-element halo border; the interior is fully
        # overwritten every grid step (block shape is constant per call).
        zrow = jnp.zeros((1, Wp, Cin), jnp.bfloat16)
        zcol = jnp.zeros((Hp, 1, Cin), jnp.bfloat16)
        ap_ref[0:1, :, :] = zrow
        ap_ref[Hp - 1:Hp, :, :] = zrow
        ap_ref[:, 0:1, :] = zcol
        ap_ref[:, Wp - 1:Wp, :] = zcol
        ap_ref[1:H + 1, 1:W + 1, :] = a.astype(jnp.bfloat16)

        # Three accumulating MXU matmuls grouped by kh (K = 3*Cin each), f32
        # accumulation.  Weight rows are tap-major: row = kh*3*Cin + kw*Cin + c.
        acc = None
        for kh in range(3):
            cols = [
                ap_ref[kh:kh + H, kw:kw + W, :].reshape(H * W, Cin)
                for kw in range(3)
            ]
            col = jnp.concatenate(cols, axis=-1)            # (H*W, 3*Cin) bf16
            part = jnp.dot(col, w_ref[kh * 3 * Cin:(kh + 1) * 3 * Cin, :],
                           preferred_element_type=jnp.float32)
            acc = part if acc is None else acc + part
        return acc                                          # (H*W, ct) f32

    if mode == "plain" and with_stats:

        def kernel(x_ref, scale_ref, bias_ref, w_ref, o_ref, s_ref, q_ref,
                   ap_ref):
            ct = o_ref.shape[-1]
            acc = _conv_acc(x_ref, scale_ref, bias_ref, w_ref, ap_ref)
            o_ref[0] = acc.reshape(H, W, ct).astype(o_ref.dtype)
            # Per-(image, Cout-tile) channel sum / sum-of-squares of the conv
            # output, for the next BatchNorm's batch statistics (saves a full
            # HBM re-read of h1 in JAX).
            s_ref[...] = jnp.sum(acc, axis=0).reshape(1, 1, ct)
            q_ref[...] = jnp.sum(acc * acc, axis=0).reshape(1, 1, ct)

    elif mode == "plain":

        def kernel(x_ref, scale_ref, bias_ref, w_ref, o_ref, ap_ref):
            ct = o_ref.shape[-1]
            acc = _conv_acc(x_ref, scale_ref, bias_ref, w_ref, ap_ref)
            o_ref[0] = acc.reshape(H, W, ct).astype(o_ref.dtype)

    elif mode == "res":

        def kernel(x_ref, scale_ref, bias_ref, w_ref, res_ref, o_ref, ap_ref):
            ct = o_ref.shape[-1]
            acc = _conv_acc(x_ref, scale_ref, bias_ref, w_ref, ap_ref)
            out = acc.reshape(H, W, ct) + res_ref[0].astype(jnp.float32)
            o_ref[0] = out.astype(o_ref.dtype)

    else:  # "sc": fused 1x1-conv shortcut rides on MXU slack.

        def kernel(x_ref, scale_ref, bias_ref, w_ref, xs_ref, wsc_ref, o_ref,
                   ap_ref):
            ct = o_ref.shape[-1]
            csc = xs_ref.shape[-1]
            acc = _conv_acc(x_ref, scale_ref, bias_ref, w_ref, ap_ref)
            xs = xs_ref[0].reshape(H * W, csc).astype(jnp.bfloat16)
            acc = acc + jnp.dot(xs, wsc_ref[...],
                                preferred_element_type=jnp.float32)
            o_ref[0] = acc.reshape(H, W, ct).astype(o_ref.dtype)

    return kernel


# ----------------------------------------------------------------------------
# Tiling / VMEM heuristics
# ----------------------------------------------------------------------------
def _pick_cout_tile(cout):
    # v6e / v7x MXUs are 256 wide; v4 / v5 MXUs are 128 wide.
    wide = 256
    try:
        kind = jax.devices()[0].device_kind.lower()
        if "v5" in kind or "v4" in kind:
            wide = 128
    except Exception:
        pass
    if cout <= wide:
        return cout
    for t in (wide, 128):
        if cout % t == 0:
            return t
    return cout


def _vmem_limit_bytes(H, W, Cin, tco, out_dtype, mode, csc):
    o_bytes = jnp.dtype(out_dtype).itemsize
    est = 0
    est += 2 * H * W * Cin * 4            # x block, double buffered (f32 worst)
    est += 2 * H * W * tco * o_bytes      # out block, double buffered
    est += 2 * 9 * Cin * tco * 2          # bf16 weight block, double buffered
    if mode == "res":
        est += 2 * H * W * tco * 4        # residual block
    if mode == "sc":
        est += 2 * H * W * csc * 4 + 2 * csc * tco * 2
    est += (H + 2) * (W + 2) * Cin * 2    # bf16 halo scratch
    est += H * W * 3 * Cin * 2            # per-kh im2col operand
    est += 2 * H * W * tco * 4            # f32 accumulator + temps
    est = int(1.5 * est) + (4 << 20)
    # floor above the v5e 16 MiB default; cap at v7x's 64 MiB physical VMEM/TC
    return max(32 << 20, min(est, 64 << 20))


# ----------------------------------------------------------------------------
# pallas_call wrapper
# ----------------------------------------------------------------------------
def bn_relu_conv3x3(x, scale, bias, wk, res=None, shortcut=None,
                    out_dtype=None, with_stats=False):
    """Fused BN + ReLU + 3x3 conv (stride 1, pad 1) over NHWC x.

    x  : (N, H, W, Cin);  wk : (9*Cin, Cout) bf16 im2col weights.
    res      : optional (N, H, W, Cout) identity residual added to the output.
    shortcut : optional (xs, wsc) -> adds conv1x1(xs) @ wsc to the output.
    with_stats: also return per-image channel sum / sum-of-squares of the conv
                output (for folding the next BatchNorm's batch statistics).
    """
    N, H, W, Cin = x.shape
    K, Cout = wk.shape
    out_dtype = x.dtype if out_dtype is None else out_dtype

    tco = _pick_cout_tile(Cout)
    n_co = Cout // tco

    scale2 = scale.reshape(1, Cin).astype(jnp.float32)
    bias2 = bias.reshape(1, Cin).astype(jnp.float32)

    # Grid = (Cout tiles, N) with N innermost: the weight block index is
    # constant across consecutive steps, so its DMA is skipped between them.
    in_specs = [
        pl.BlockSpec((1, H, W, Cin), lambda co, n: (n, 0, 0, 0)),
        pl.BlockSpec((1, Cin), lambda co, n: (0, 0)),
        pl.BlockSpec((1, Cin), lambda co, n: (0, 0)),
        pl.BlockSpec((K, tco), lambda co, n: (0, co)),
    ]
    args = [x, scale2, bias2, wk]
    csc = 0

    if shortcut is not None:
        mode = "sc"
        xs, wsc = shortcut
        csc = xs.shape[-1]
        in_specs += [
            pl.BlockSpec((1, H, W, csc), lambda co, n: (n, 0, 0, 0)),
            pl.BlockSpec((csc, tco), lambda co, n: (0, co)),
        ]
        args += [xs, wsc]
    elif res is not None:
        mode = "res"
        in_specs.append(
            pl.BlockSpec((1, H, W, tco), lambda co, n: (n, 0, 0, co)))
        args.append(res)
    else:
        mode = "plain"

    out_spec = pl.BlockSpec((1, H, W, tco), lambda co, n: (n, 0, 0, co))
    emit_stats = with_stats and mode == "plain"
    if emit_stats:
        stat_spec = pl.BlockSpec((1, 1, tco), lambda co, n: (n, 0, co))
        out_shape = (jax.ShapeDtypeStruct((N, H, W, Cout), out_dtype),
                     jax.ShapeDtypeStruct((N, 1, Cout), jnp.float32),
                     jax.ShapeDtypeStruct((N, 1, Cout), jnp.float32))
        out_specs = (out_spec, stat_spec, stat_spec)
    else:
        out_shape = jax.ShapeDtypeStruct((N, H, W, Cout), out_dtype)
        out_specs = out_spec

    kernel = _build_kernel(H, W, Cin, mode, emit_stats)

    return pl.pallas_call(
        kernel,
        out_shape=out_shape,
        grid=(n_co, N),
        in_specs=in_specs,
        out_specs=out_specs,
        scratch_shapes=[pltpu.VMEM((H + 2, W + 2, Cin), jnp.bfloat16)],
        compiler_params=pltpu.CompilerParams(
            dimension_semantics=("parallel", "parallel"),
            vmem_limit_bytes=_vmem_limit_bytes(H, W, Cin, tco, out_dtype,
                                               mode, csc)),
    )(*args)


# ----------------------------------------------------------------------------
# BasicBlock forward (NCHW in / NCHW out, matching the PyTorch module)
# ----------------------------------------------------------------------------
def _fold_bn(mean, var, gamma, beta, eps=1e-5):
    scale = gamma / jnp.sqrt(var + eps)
    return scale, beta - mean * scale


def _im2col_weights(w_oihw):
    # (Cout, Cin, 3, 3) OIHW -> (9*Cin, Cout), tap-major / channel-minor, bf16.
    cout, cin = w_oihw.shape[:2]
    return (jnp.transpose(w_oihw, (2, 3, 1, 0))
            .reshape(9 * cin, cout).astype(jnp.bfloat16))


def basic_block_forward(x_nchw, params, stride):
    eps = 1e-5
    x = jnp.transpose(x_nchw, (0, 2, 3, 1)).astype(jnp.float32)     # NHWC
    N, H, W, Cin = x.shape
    Cout = params["w1"].shape[0]

    # BN1 training-mode batch statistics are needed before kernel 1 runs, so
    # they come from a plain-JAX reduction over x (inference: fold running
    # stats here instead and skip this pass).
    m1 = jnp.mean(x, axis=(0, 1, 2))
    v1 = jnp.var(x, axis=(0, 1, 2))
    s1, b1 = _fold_bn(m1, v1, params["bn1_gamma"], params["bn1_beta"], eps)
    w1k = _im2col_weights(params["w1"])

    # bn1 + relu + conv1; h1 kept in bf16 to halve inter-kernel HBM traffic,
    # BN2 batch statistics emitted by the kernel from the f32 accumulator.
    if stride == 1:
        h1, csum, csq = bn_relu_conv3x3(x, s1, b1, w1k,
                                        out_dtype=jnp.bfloat16,
                                        with_stats=True)
        cnt = N * H * W
        m2 = jnp.sum(csum, axis=(0, 1)) / cnt
        v2 = jnp.sum(csq, axis=(0, 1)) / cnt - m2 * m2
    else:
        # TODO(synk): compute only the strided output rows/cols in-kernel
        # (strided pl.ds patch loads) instead of stride-1 conv + decimation.
        h1 = bn_relu_conv3x3(x, s1, b1, w1k, out_dtype=jnp.bfloat16)
        h1 = h1[:, ::stride, ::stride, :]
        h1f = h1.astype(jnp.float32)
        m2 = jnp.mean(h1f, axis=(0, 1, 2))
        v2 = jnp.var(h1f, axis=(0, 1, 2))

    s2, b2 = _fold_bn(m2, v2, params["bn2_gamma"], params["bn2_beta"], eps)
    w2k = _im2col_weights(params["w2"])

    # bn2 + relu + conv2 + residual (identity or fused 1x1 shortcut), one kernel
    if stride != 1 or Cin != Cout:
        xs = x[:, ::stride, ::stride, :]
        wsc = params["wsc"].reshape(Cout, Cin).T.astype(jnp.bfloat16)  # (Cin,Cout)
        out = bn_relu_conv3x3(h1, s2, b2, w2k, shortcut=(xs, wsc),
                              out_dtype=jnp.float32)
    else:
        out = bn_relu_conv3x3(h1, s2, b2, w2k, res=x, out_dtype=jnp.float32)

    return jnp.transpose(out, (0, 3, 1, 2))                         # NCHW


# ----------------------------------------------------------------------------
# pure-JAX reference (for verification) and deterministic parameter init
# ----------------------------------------------------------------------------
def reference_forward(x, params, stride):
    eps = 1e-5

    def bn(h, g, b):
        m = jnp.mean(h, axis=(0, 2, 3), keepdims=True)
        v = jnp.var(h, axis=(0, 2, 3), keepdims=True)
        return (h - m) / jnp.sqrt(v + eps) * g.reshape(1, -1, 1, 1) + b.reshape(1, -1, 1, 1)

    def conv(h, w, s, pad):
        return jax.lax.conv_general_dilated(
            h, w, (s, s), pad, dimension_numbers=("NCHW", "OIHW", "NCHW"))

    Cin, Cout = x.shape[1], params["w1"].shape[0]
    h = jax.nn.relu(bn(x, params["bn1_gamma"], params["bn1_beta"]))
    h = conv(h, params["w1"], stride, ((1, 1), (1, 1)))
    h = jax.nn.relu(bn(h, params["bn2_gamma"], params["bn2_beta"]))
    h = conv(h, params["w2"], 1, ((1, 1), (1, 1)))
    if stride != 1 or Cin != Cout:
        sc = conv(x, params["wsc"], stride, ((0, 0), (0, 0)))
    else:
        sc = x
    return h + sc


def init_params(key, cin, cout, stride):
    ks = jax.random.split(key, 7)
    p = {
        "bn1_gamma": 1.0 + 0.1 * jax.random.normal(ks[0], (cin,), jnp.float32),
        "bn1_beta": 0.1 * jax.random.normal(ks[1], (cin,), jnp.float32),
        "w1": 0.3 * jax.random.normal(ks[2], (cout, cin, 3, 3), jnp.float32),
        "bn2_gamma": 1.0 + 0.1 * jax.random.normal(ks[3], (cout,), jnp.float32),
        "bn2_beta": 0.1 * jax.random.normal(ks[4], (cout,), jnp.float32),
        "w2": 0.3 * jax.random.normal(ks[5], (cout, cout, 3, 3), jnp.float32),
    }
    if stride != 1 or cin != cout:
        p["wsc"] = 0.3 * jax.random.normal(ks[6], (cout, cin, 1, 1), jnp.float32)
    return p


if __name__ == "__main__":
    N, Cin, H, W = 2, 4, 16, 16
    x = jax.random.normal(jax.random.PRNGKey(0), (N, Cin, H, W), jnp.float32)

    # identity shortcut, 1x1-conv shortcut, and strided variants
    configs = [(4, 4, 1), (4, 8, 1), (4, 8, 2)]
    for cin, cout, stride in configs:
        params = init_params(jax.random.PRNGKey(1), cin, cout, stride)
        out = jax.block_until_ready(basic_block_forward(x, params, stride))
        ref = reference_forward(x, params, stride)
        assert out.shape == ref.shape, (out.shape, ref.shape)
        err = float(jnp.max(jnp.abs(out - ref)))
        # bf16 MXU operands + bf16 inter-kernel h1 (f32 accumulation) -> looser
        # tolerance than pure f32.
        tol = 4e-2 * (1.0 + float(jnp.max(jnp.abs(ref))))
        if err > tol:
            raise AssertionError(
                f"mismatch (cfg={cin},{cout},{stride}) max_err={err} tol={tol}")

    print("KERNEL_OK")
</pallas_src>

<mosaic_0001>
module attributes {stable_mosaic.version = 11 : i64} {
  func.func @kernel(%arg0: i32, %arg1: i32, %arg2: memref<1x16x16x4xf32, #tpu.memory_space<vmem>>, %arg3: memref<1x4xf32, #tpu.memory_space<vmem>>, %arg4: memref<1x4xf32, #tpu.memory_space<vmem>>, %arg5: memref<36x4xbf16, #tpu.memory_space<vmem>>, %arg6: memref<1x16x16x4xbf16, #tpu.memory_space<vmem>>, %arg7: memref<1x1x4xf32, #tpu.memory_space<vmem>>, %arg8: memref<1x1x4xf32, #tpu.memory_space<vmem>>, %arg9: memref<18x18x4xbf16, #tpu.memory_space<vmem>>) attributes {dimension_semantics = [#tpu.dimension_semantics<parallel>, #tpu.dimension_semantics<parallel>], iteration_bounds = array<i64: 1, 2>, scalar_prefetch = 0 : i64, scratch_operands = 1 : i64, tpu.core_type = #tpu.core_type<tc>, window_params = [{transform_indices = @transform_0, window_bounds = array<i64: 1, 16, 16, 4>}, {pipeline_mode = #tpu.pipeline_mode<synchronous>, transform_indices = @transform_1, window_bounds = array<i64: 1, 4>}, {pipeline_mode = #tpu.pipeline_mode<synchronous>, transform_indices = @transform_2, window_bounds = array<i64: 1, 4>}, {transform_indices = @transform_3, window_bounds = array<i64: 36, 4>}, {transform_indices = @transform_4, window_bounds = array<i64: 1, 16, 16, 4>}, {transform_indices = @transform_5, window_bounds = array<i64: 1, 1, 4>}, {transform_indices = @transform_6, window_bounds = array<i64: 1, 1, 4>}]} {
    %c0 = arith.constant 0 : index
    %c0_0 = arith.constant 0 : index
    %c0_1 = arith.constant 0 : index
    %c0_2 = arith.constant 0 : index
    %0 = vector.load %arg2[%c0, %c0_0, %c0_1, %c0_2] : memref<1x16x16x4xf32, #tpu.memory_space<vmem>>, vector<1x16x16x4xf32>
    %1 = vector.shape_cast %0 : vector<1x16x16x4xf32> to vector<16x16x4xf32>
    %c0_3 = arith.constant 0 : index
    %c0_4 = arith.constant 0 : index
    %2 = vector.load %arg3[%c0_3, %c0_4] : memref<1x4xf32, #tpu.memory_space<vmem>>, vector<1x4xf32>
    %3 = vector.shape_cast %2 : vector<1x4xf32> to vector<1x1x4xf32>
    %4 = vector.broadcast %3 : vector<1x1x4xf32> to vector<16x16x4xf32>
    %5 = arith.mulf %1, %4 : vector<16x16x4xf32>
    %c0_5 = arith.constant 0 : index
    %c0_6 = arith.constant 0 : index
    %6 = vector.load %arg4[%c0_5, %c0_6] : memref<1x4xf32, #tpu.memory_space<vmem>>, vector<1x4xf32>
    %7 = vector.shape_cast %6 : vector<1x4xf32> to vector<1x1x4xf32>
    %8 = vector.broadcast %7 : vector<1x1x4xf32> to vector<16x16x4xf32>
    %9 = arith.addf %5, %8 : vector<16x16x4xf32>
    %cst = arith.constant 0.000000e+00 : f32
    %10 = vector.broadcast %cst : f32 to vector<16x16x4xf32>
    %11 = arith.maximumf %9, %10 : vector<16x16x4xf32>
    %cst_7 = arith.constant 0.000000e+00 : bf16
    %12 = vector.broadcast %cst_7 : bf16 to vector<1x18x4xbf16>
    %cst_8 = arith.constant 0.000000e+00 : bf16
    %13 = vector.broadcast %cst_8 : bf16 to vector<18x1x4xbf16>
    %c0_9 = arith.constant 0 : index
    %c0_10 = arith.constant 0 : index
    %c0_11 = arith.constant 0 : index
    %14 = vector.load %arg9[%c0_9, %c0_10, %c0_11] : memref<18x18x4xbf16, #tpu.memory_space<vmem>>, vector<1x18x4xbf16>
    tpu.vector_store %arg9[%c0_9, %c0_10, %c0_11], %12 {strides = array<i32>} : memref<18x18x4xbf16, #tpu.memory_space<vmem>>, vector<1x18x4xbf16>,
    %c17 = arith.constant 17 : index
    %c0_12 = arith.constant 0 : index
    %c0_13 = arith.constant 0 : index
    %15 = vector.load %arg9[%c17, %c0_12, %c0_13] : memref<18x18x4xbf16, #tpu.memory_space<vmem>>, vector<1x18x4xbf16>
    tpu.vector_store %arg9[%c17, %c0_12, %c0_13], %12 {strides = array<i32>} : memref<18x18x4xbf16, #tpu.memory_space<vmem>>, vector<1x18x4xbf16>,
    %c0_14 = arith.constant 0 : index
    %c0_15 = arith.constant 0 : index
    %c0_16 = arith.constant 0 : index
    %16 = vector.load %arg9[%c0_14, %c0_15, %c0_16] : memref<18x18x4xbf16, #tpu.memory_space<vmem>>, vector<18x1x4xbf16>
    tpu.vector_store %arg9[%c0_14, %c0_15, %c0_16], %13 {strides = array<i32>} : memref<18x18x4xbf16, #tpu.memory_space<vmem>>, vector<18x1x4xbf16>,
    %c0_17 = arith.constant 0 : index
    %c17_18 = arith.constant 17 : index
    %c0_19 = arith.constant 0 : index
    %17 = vector.load %arg9[%c0_17, %c17_18, %c0_19] : memref<18x18x4xbf16, #tpu.memory_space<vmem>>, vector<18x1x4xbf16>
    tpu.vector_store %arg9[%c0_17, %c17_18, %c0_19], %13 {strides = array<i32>} : memref<18x18x4xbf16, #tpu.memory_space<vmem>>, vector<18x1x4xbf16>,
    %18 = arith.truncf %11 : vector<16x16x4xf32> to vector<16x16x4xbf16>
    %c1 = arith.constant 1 : index
    %c1_20 = arith.constant 1 : index
    %c0_21 = arith.constant 0 : index
    %19 = vector.load %arg9[%c1, %c1_20, %c0_21] : memref<18x18x4xbf16, #tpu.memory_space<vmem>>, vector<16x16x4xbf16>
    tpu.vector_store %arg9[%c1, %c1_20, %c0_21], %18 {strides = array<i32>} : memref<18x18x4xbf16, #tpu.memory_space<vmem>>, vector<16x16x4xbf16>,
    %c0_22 = arith.constant 0 : index
    %c0_23 = arith.constant 0 : index
    %c0_24 = arith.constant 0 : index
    %20 = vector.load %arg9[%c0_22, %c0_23, %c0_24] : memref<18x18x4xbf16, #tpu.memory_space<vmem>>, vector<16x16x4xbf16>
    %21 = vector.shape_cast %20 : vector<16x16x4xbf16> to vector<256x4xbf16>
    %c0_25 = arith.constant 0 : index
    %c1_26 = arith.constant 1 : index
    %c0_27 = arith.constant 0 : index
    %22 = vector.load %arg9[%c0_25, %c1_26, %c0_27] : memref<18x18x4xbf16, #tpu.memory_space<vmem>>, vector<16x16x4xbf16>
    %23 = vector.shape_cast %22 : vector<16x16x4xbf16> to vector<256x4xbf16>
    %c0_28 = arith.constant 0 : index
    %c2 = arith.constant 2 : index
    %c0_29 = arith.constant 0 : index
    %24 = vector.load %arg9[%c0_28, %c2, %c0_29] : memref<18x18x4xbf16, #tpu.memory_space<vmem>>, vector<16x16x4xbf16>
    %25 = vector.shape_cast %24 : vector<16x16x4xbf16> to vector<256x4xbf16>
    %26 = tpu.concatenate %21, %23, %25 in 1 : vector<256x4xbf16>, vector<256x4xbf16>, vector<256x4xbf16> -> vector<256x12xbf16>
    %c0_30 = arith.constant 0 : index
    %c0_31 = arith.constant 0 : index
    %27 = vector.load %arg5[%c0_30, %c0_31] : memref<36x4xbf16, #tpu.memory_space<vmem>>, vector<12x4xbf16>
    %cst_32 = arith.constant dense<0.000000e+00> : vector<256x4xf32>
    %28 = tpu.matmul %26, %27, %cst_32 {dimension_numbers = #tpu.dot_dimension_numbers<[1], [0], [0], [1], [0, 0, 1, 1], [], []>} : vector<256x12xbf16>, vector<12x4xbf16>, vector<256x4xf32> -> vector<256x4xf32>
    %c1_33 = arith.constant 1 : index
    %c0_34 = arith.constant 0 : index
    %c0_35 = arith.constant 0 : index
    %29 = vector.load %arg9[%c1_33, %c0_34, %c0_35] : memref<18x18x4xbf16, #tpu.memory_space<vmem>>, vector<16x16x4xbf16>
    %30 = vector.shape_cast %29 : vector<16x16x4xbf16> to vector<256x4xbf16>
    %c1_36 = arith.constant 1 : index
    %c1_37 = arith.constant 1 : index
    %c0_38 = arith.constant 0 : index
    %31 = vector.load %arg9[%c1_36, %c1_37, %c0_38] : memref<18x18x4xbf16, #tpu.memory_space<vmem>>, vector<16x16x4xbf16>
    %32 = vector.shape_cast %31 : vector<16x16x4xbf16> to vector<256x4xbf16>
    %c1_39 = arith.constant 1 : index
    %c2_40 = arith.constant 2 : index
    %c0_41 = arith.constant 0 : index
    %33 = vector.load %arg9[%c1_39, %c2_40, %c0_41] : memref<18x18x4xbf16, #tpu.memory_space<vmem>>, vector<16x16x4xbf16>
    %34 = vector.shape_cast %33 : vector<16x16x4xbf16> to vector<256x4xbf16>
    %35 = tpu.concatenate %30, %32, %34 in 1 : vector<256x4xbf16>, vector<256x4xbf16>, vector<256x4xbf16> -> vector<256x12xbf16>
    %c12 = arith.constant 12 : index
    %c0_42 = arith.constant 0 : index
    %36 = vector.load %arg5[%c12, %c0_42] : memref<36x4xbf16, #tpu.memory_space<vmem>>, vector<12x4xbf16>
    %cst_43 = arith.constant dense<0.000000e+00> : vector<256x4xf32>
    %37 = tpu.matmul %35, %36, %cst_43 {dimension_numbers = #tpu.dot_dimension_numbers<[1], [0], [0], [1], [0, 0, 1, 1], [], []>} : vector<256x12xbf16>, vector<12x4xbf16>, vector<256x4xf32> -> vector<256x4xf32>
    %38 = arith.addf %28, %37 : vector<256x4xf32>
    %c2_44 = arith.constant 2 : index
    %c0_45 = arith.constant 0 : index
    %c0_46 = arith.constant 0 : index
    %39 = vector.load %arg9[%c2_44, %c0_45, %c0_46] : memref<18x18x4xbf16, #tpu.memory_space<vmem>>, vector<16x16x4xbf16>
    %40 = vector.shape_cast %39 : vector<16x16x4xbf16> to vector<256x4xbf16>
    %c2_47 = arith.constant 2 : index
    %c1_48 = arith.constant 1 : index
    %c0_49 = arith.constant 0 : index
    %41 = vector.load %arg9[%c2_47, %c1_48, %c0_49] : memref<18x18x4xbf16, #tpu.memory_space<vmem>>, vector<16x16x4xbf16>
    %42 = vector.shape_cast %41 : vector<16x16x4xbf16> to vector<256x4xbf16>
    %c2_50 = arith.constant 2 : index
    %c2_51 = arith.constant 2 : index
    %c0_52 = arith.constant 0 : index
    %43 = vector.load %arg9[%c2_50, %c2_51, %c0_52] : memref<18x18x4xbf16, #tpu.memory_space<vmem>>, vector<16x16x4xbf16>
    %44 = vector.shape_cast %43 : vector<16x16x4xbf16> to vector<256x4xbf16>
    %45 = tpu.concatenate %40, %42, %44 in 1 : vector<256x4xbf16>, vector<256x4xbf16>, vector<256x4xbf16> -> vector<256x12xbf16>
    %c24 = arith.constant 24 : index
    %c0_53 = arith.constant 0 : index
    %46 = vector.load %arg5[%c24, %c0_53] : memref<36x4xbf16, #tpu.memory_space<vmem>>, vector<12x4xbf16>
    %cst_54 = arith.constant dense<0.000000e+00> : vector<256x4xf32>
    %47 = tpu.matmul %45, %46, %cst_54 {dimension_numbers = #tpu.dot_dimension_numbers<[1], [0], [0], [1], [0, 0, 1, 1], [], []>} : vector<256x12xbf16>, vector<12x4xbf16>, vector<256x4xf32> -> vector<256x4xf32>
    %48 = arith.addf %38, %47 : vector<256x4xf32>
    %49 = vector.shape_cast %48 : vector<256x4xf32> to vector<16x16x4xf32>
    %50 = arith.truncf %49 : vector<16x16x4xf32> to vector<16x16x4xbf16>
    %c0_55 = arith.constant 0 : index
    %c0_56 = arith.constant 0 : index
    %c0_57 = arith.constant 0 : index
    %c0_58 = arith.constant 0 : index
    %51 = vector.load %arg6[%c0_55, %c0_56, %c0_57, %c0_58] : memref<1x16x16x4xbf16, #tpu.memory_space<vmem>>, vector<1x16x16x4xbf16>
    %52 = vector.shape_cast %51 : vector<1x16x16x4xbf16> to vector<16x16x4xbf16>
    %53 = vector.shape_cast %50 : vector<16x16x4xbf16> to vector<1x16x16x4xbf16>
    tpu.vector_store %arg6[%c0_55, %c0_56, %c0_57, %c0_58], %53 {strides = array<i32>} : memref<1x16x16x4xbf16, #tpu.memory_space<vmem>>, vector<1x16x16x4xbf16>,
    %cst_59 = arith.constant dense<0.000000e+00> : vector<4xf32>
    %54 = vector.multi_reduction <add>, %48, %cst_59 [0] : vector<256x4xf32> to vector<4xf32>
    %55 = vector.shape_cast %54 : vector<4xf32> to vector<1x1x4xf32>
    %c0_60 = arith.constant 0 : index
    %c0_61 = arith.constant 0 : index
    %c0_62 = arith.constant 0 : index
    %56 = vector.load %arg7[%c0_60, %c0_61, %c0_62] : memref<1x1x4xf32, #tpu.memory_space<vmem>>, vector<1x1x4xf32>
    tpu.vector_store %arg7[%c0_60, %c0_61, %c0_62], %55 {strides = array<i32>} : memref<1x1x4xf32, #tpu.memory_space<vmem>>, vector<1x1x4xf32>,
    %57 = arith.mulf %48, %48 : vector<256x4xf32>
    %cst_63 = arith.constant dense<0.000000e+00> : vector<4xf32>
    %58 = vector.multi_reduction <add>, %57, %cst_63 [0] : vector<256x4xf32> to vector<4xf32>
    %59 = vector.shape_cast %58 : vector<4xf32> to vector<1x1x4xf32>
    %c0_64 = arith.constant 0 : index
    %c0_65 = arith.constant 0 : index
    %c0_66 = arith.constant 0 : index
    %60 = vector.load %arg8[%c0_64, %c0_65, %c0_66] : memref<1x1x4xf32, #tpu.memory_space<vmem>>, vector<1x1x4xf32>
    tpu.vector_store %arg8[%c0_64, %c0_65, %c0_66], %59 {strides = array<i32>} : memref<1x1x4xf32, #tpu.memory_space<vmem>>, vector<1x1x4xf32>,
    return
  }
  func.func @transform_0(%arg0: i32, %arg1: i32) -> (i32, i32, i32, i32) {
    %c0_i32 = arith.constant 0 : i32
    %c0_i32_0 = arith.constant 0 : i32
    %c0_i32_1 = arith.constant 0 : i32
    %c0_i32_2 = arith.constant 0 : i32
    return %arg1, %c0_i32, %c0_i32_0, %c0_i32_1 : i32, i32, i32, i32
  }
  func.func @transform_1(%arg0: i32, %arg1: i32) -> (i32, i32) {
    %c0_i32 = arith.constant 0 : i32
    %c0_i32_0 = arith.constant 0 : i32
    %c0_i32_1 = arith.constant 0 : i32
    return %c0_i32, %c0_i32_0 : i32, i32
  }
  func.func @transform_2(%arg0: i32, %arg1: i32) -> (i32, i32) {
    %c0_i32 = arith.constant 0 : i32
    %c0_i32_0 = arith.constant 0 : i32
    %c0_i32_1 = arith.constant 0 : i32
    return %c0_i32, %c0_i32_0 : i32, i32
  }
  func.func @transform_3(%arg0: i32, %arg1: i32) -> (i32, i32) {
    %c0_i32 = arith.constant 0 : i32
    %c0_i32_0 = arith.constant 0 : i32
    return %c0_i32, %arg0 : i32, i32
  }
  func.func @transform_4(%arg0: i32, %arg1: i32) -> (i32, i32, i32, i32) {
    %c0_i32 = arith.constant 0 : i32
    %c0_i32_0 = arith.constant 0 : i32
    %c0_i32_1 = arith.constant 0 : i32
    return %arg1, %c0_i32, %c0_i32_0, %arg0 : i32, i32, i32, i32
  }
  func.func @transform_5(%arg0: i32, %arg1: i32) -> (i32, i32, i32) {
    %c0_i32 = arith.constant 0 : i32
    %c0_i32_0 = arith.constant 0 : i32
    return %arg1, %c0_i32, %arg0 : i32, i32, i32
  }
  func.func @transform_6(%arg0: i32, %arg1: i32) -> (i32, i32, i32) {
    %c0_i32 = arith.constant 0 : i32
    %c0_i32_0 = arith.constant 0 : i32
    return %arg1, %c0_i32, %arg0 : i32, i32, i32
  }
}

</mosaic_0001>

<bundles_post_ra>
// kernel: tpu_custom_call.1
= control target key start
LH: loop header
LB: loop body
LE: loop exit
PB: predicated region body
PF: predicated region fallthrough
CT: control target
= control target key end

     0   :  { %12 = vsyncpa [#allocation4], 0  ;;  %s8077_s0 = inlined_call_operand.vmem [shape: f32[2,16,16,4], index: 0, kind: input, shape index: {}]   ;;  %s8078_s1 = inlined_call_operand.vmem [shape: f32[1,4], index: 1, kind: input, shape index: {}]   ;;  %s8079_s2 = inlined_call_operand.vmem [shape: f32[1,4], index: 2, kind: input, shape index: {}]   ;;  %s8080_s3 = inlined_call_operand.vmem [shape: bf16[36,4], index: 3, kind: input, shape index: {}]   ;;  %s8081_s4 = inlined_call_operand.vmem [shape: bf16[2,16,16,4], index: 4, kind: output, shape index: {0}]   ;;  %s8082_s5 = inlined_call_operand.hbm [shape: f32[2,1,4], index: 5, kind: output, shape index: {1}]   ;;  %s8083_s6 = inlined_call_operand.hbm [shape: f32[2,1,4], index: 6, kind: output, shape index: {2}]  }
   0x1   :  { %14 = vsyncpa [#allocation4 + $0x1], 0 }
   0x2   :  { %15 = vsyncpa [#allocation6], 0 }
   0x3   :  { %17 = vsyncpa [#allocation6 + $0x1], 0  ;;  %s5948_s21 = smov 0   ;;  %s5950_s22 = smov 0  }
   0x4   :  { %s5952_s23 = smov 0   ;;  %s5954_s24 = smov 0  }
   0x5   :  { %s5956_s25 = smov 0   ;;  %s5958_s26 = smov 0  }
   0x6 LB: > { %s5018_s27 = sadd.s32 4294967295, %s5906_s26   ;;  %s5019_s28 = sadd.s32 4294967294, %s5906_s26   ;;  %s5906_s26 = sphi %s5958_s26, %s23_s26   ;;  %s5902_s25 = sphi %s5956_s25, %s8114_s25   ;;  %s5898_s24 = sphi %s5954_s24, %s8113_s24   ;;  %s5894_s23 = sphi %s5952_s23, %s8112_s23   ;;  %s5890_s22 = sphi %s5950_s22, %s8111_s22   ;;  %s5886_s21 = sphi %s5948_s21, %s8110_s21  }
   0x7   : > { %s32_s29 = sadd.s32 1, %s5902_s25  ;;  %s166_s30 = sadd.s32 1, %s5894_s23 }
   0x8   : > { %p33_p0 = scmp.ge.s32.totalorder %s32_s29, 2  ;;  %p176_p1 = scmp.ne.s32.totalorder %s5894_s23, %s5890_s22 }
   0x9   : > { %p177_p2 = scmp.eq.s32.totalorder %s5018_s27, 1  ;;  %p182_p3 = scmp.ne.s32.totalorder %s5890_s22, %s5886_s21 }
   0xa   : > { %s8116_s29 = smov (%p33_p0, %s32_s29), 0  ;;  %p183_p5 = scmp.eq.s32.totalorder %s5019_s28, 1 }
   0xb   : > { %p5988_p4 = por %p177_p2, %p176_p1  ;;  %s161_s8 = ssub.s32 %s5902_s25, %s8116_s29 }
   0xc   : > { %p5023_p6 = scmp.ge.s32.totalorder %s5906_s26, 1  ;;  %p164_p7 = scmp.eq.s32.totalorder %s161_s8, 0 }
   0xd   : > { %p5995_p8 = por %p183_p5, %p182_p3  ;;  %p250_p9 = scmp.lt.s32.totalorder %s5906_s26, 3 }
   0xe   : > { %s6001_s10 = scalar_select %p164_p7, %s5894_s23, %s166_s30  }
   0xf   : > { %p251_p10 = pnand %p5023_p6, %p250_p9 }
  0x11   : > { %254 = sbr.rel (%p251_p10) target bundleno = 836 (0x344), region = 36 }
  0x18   : > { %vm455_vm0 = vcmask 27648   ;;  %vm458_vm1 = vcmask 24576   ;;  %vm465_vm2 = vsmask.f32 256  ;;  %v5908_v0 = vmov 0   ;;  %p295_p11 = scmp.lt.s32.totalorder %s5898_s24, 1 }
  0x19   : > { %456 = vst.msk [vmem:[#allocation2] sm:$0xf] %vm455_vm0, %v5908_v0  ;;  %457 = vst.msk [vmem:[#allocation2 + $0x4] sm:$0xf] %vm455_vm0, %v5908_v0  ;;  %vm521_vm3 = vsmask.f32 7938 }
  0x1a   : > { %459 = vst.msk [vmem:[#allocation2 + $0x8] sm:$0x1] %vm458_vm1, %v5908_v0  ;;  %463 = vst.msk [vmem:[#allocation2 + $0xd4] sm:$0x1] %vm458_vm1, %v5908_v0  ;;  %vm1609_vm6 = vcmask 1042432   ;;  %s6023_s11 = scalar_select %p295_p11, %s5898_s24, 1 }
  0x1b   : > { %461 = vst.msk [vmem:[#allocation2 + $0xcc] sm:$0xf] %vm455_vm0, %v5908_v0  ;;  %462 = vst.msk [vmem:[#allocation2 + $0xd0] sm:$0xf] %vm455_vm0, %v5908_v0  ;;  %v470_v3 = vld [vmem:[#allocation2 + $0xc] sm:$0x1] }
  0x1c   : > { %vm6011_vm4 = vmand %vm458_vm1, %vm521_vm3  ;;  %v526_v5 = vld [vmem:[#allocation2 + $0x14] sm:$0x1]  ;;  %v473_v6 = vld [vmem:[#allocation2 + $0x18] sm:$0x1]  ;;  %vm1610_vm7 = vcmask 1046532   ;;  %s5341_s12 = sshll.u32 %s6023_s11, 8 }
  0x1d   : > { %vm6018_vm5 = vmand %vm458_vm1, %vm465_vm2  ;;  %v527_v7 = vsel %vm6011_vm4, 0, %v526_v5  ;;  %v529_v9 = vld [vmem:[#allocation2 + $0x20] sm:$0x1]  ;;  %v476_v10 = vld [vmem:[#allocation2 + $0x24] sm:$0x1]  ;;  %s6039_s15 = scalar_lea.vmem %s8077_s0, %s5341_s12  ;;  %s5909_s20 = smov 8  }
  0x1e   : > { %v471_v4 = vsel %vm6018_vm5, 0, %v470_v3  ;;  %v474_v8 = vsel %vm6018_vm5, 0, %v473_v6  ;;  %528 = vst [vmem:[#allocation2 + $0x14] sm:$0x1] %v527_v7  ;;  %v530_v11 = vsel %vm6011_vm4, 0, %v529_v9  ;;  %v477_v12 = vsel %vm6018_vm5, 0, %v476_v10  ;;  %vm6059_vm10 = vmor %vm1609_vm6, %vm1610_vm7 }
  0x1f   : > { %472 = vst [vmem:[#allocation2 + $0xc] sm:$0x1] %v471_v4  ;;  %475 = vst [vmem:[#allocation2 + $0x18] sm:$0x1] %v474_v8  ;;  %v532_v13 = vld [vmem:[#allocation2 + $0x2c] sm:$0x1] }
  0x20   : > { %v6044_v14 = vld [vmem:[%s8078_s1] ss:$0 sm:$0xff]  ;;  %531 = vst [vmem:[#allocation2 + $0x20] sm:$0x1] %v530_v11  ;;  %478 = vst [vmem:[#allocation2 + $0x24] sm:$0x1] %v477_v12 }
  0x21   : > { %v533_v15 = vsel %vm6011_vm4, 0, %v532_v13  ;;  %v479_v16 = vld [vmem:[#allocation2 + $0x30] sm:$0x1]  ;;  %v467_v17 = vld [vmem:[#allocation2] sm:$0x1]  ;;  %v314_v30 = vld [vmem:[%s6039_s15 + $0x8] sm:$0xff] }
  0x22   : > { %v523_v18 = vld [vmem:[#allocation2 + $0x8] sm:$0x1]  ;;  %v1111_v19 = vld [vmem:[#allocation2 + $0x4] sm:$0xf]  ;;  %vm1158_vm8 = vsmask.f32 3328  ;;  %v353_v36 = vmul.f32 %v6044_v14, %v314_v30  ;;  %vm6107_vm13 = vmand %vm455_vm0, %vm521_vm3 }
  0x23   : > { %vm1159_vm9 = vsmask.f32 7440  ;;  %v6051_v20 = vld [vmem:[%s8079_s2] ss:$0 sm:$0xff]  ;;  %534 = vst [vmem:[#allocation2 + $0x2c] sm:$0x1] %v533_v15 }
  0x24   : > { %v468_v21 = vsel %vm6018_vm5, 0, %v467_v17  ;;  %v524_v22 = vsel %vm6011_vm4, 0, %v523_v18  ;;  %v1171_v23 = vshll.u32 %v1111_v19, 16  ;;  %v1175_v24 = vshrl.u32 %v1111_v19, 16  ;;  %v1545_v25 = vld [vmem:[#allocation2] sm:$0xe]  ;;  %vm6099_vm12 = vmor %vm1158_vm8, %vm1159_vm9 }
  0x25   : > { %469 = vst [vmem:[#allocation2] sm:$0x1] %v468_v21  ;;  %525 = vst [vmem:[#allocation2 + $0x8] sm:$0x1] %v524_v22  ;;  %v5062_v27 = vrot.slane %v1545_v25, 9  ;;  %v1614_v28 = vrot.slane %v1111_v19, 5  ;;  %v392_v47 = vadd.f32 %v6051_v20, %v353_v36 }
  0x26   : > { %v313_v29 = vld [vmem:[%s6039_s15] sm:$0xff]  ;;  %v315_v31 = vld [vmem:[%s6039_s15 + $0x10] sm:$0xff]  ;;  %v480_v32 = vsel %vm6018_vm5, 0, %v479_v16  ;;  %v6068_v33 = vrot.slane %v1171_v23, 5  ;;  %v1177_v34 = vrot.slane %v1175_v24, 4  ;;  %v316_v37 = vld [vmem:[%s6039_s15 + $0x18] sm:$0xff] }
  0x27   : > { %v352_v35 = vmul.f32 %v6044_v14, %v313_v29  ;;  %vm673_vm11 = vsmask.f32 4368  ;;  %v317_v38 = vld [vmem:[%s6039_s15 + $0x20] sm:$0xff]  ;;  %v318_v39 = vld [vmem:[%s6039_s15 + $0x28] sm:$0xff]  ;;  %481 = vst [vmem:[#allocation2 + $0x30] sm:$0x1] %v480_v32  ;;  %v1615_v40 = vsel %vm6059_vm10, %v5062_v27, %v1614_v28  ;;  %v354_v42 = vmul.f32 %v6044_v14, %v315_v31 }
  0x28   : > { %v1616_v41 = vrot.slane %v1614_v28, 4  ;;  %v355_v43 = vmul.f32 %v6044_v14, %v316_v37  ;;  %v319_v44 = vld [vmem:[%s6039_s15 + $0x30] sm:$0xff]  ;;  %v1178_v45 = vor.u32 %v1177_v34, %v6068_v33  ;;  %v356_v48 = vmul.f32 %v6044_v14, %v317_v38  ;;  %v320_v49 = vld [vmem:[%s6039_s15 + $0x38] sm:$0xff]  ;;  %vm6116_vm14 = vmor %vm465_vm2, %vm673_vm11  ;;  %s5910_s27 = smov 4   ;;  %s5337_s14 = sshll.u32 %s5898_s24, 4 }
  0x29   : > { %v391_v46 = vadd.f32 %v6051_v20, %v352_v35  ;;  %v393_v50 = vadd.f32 %v6051_v20, %v354_v42  ;;  %v357_v52 = vmul.f32 %v6044_v14, %v318_v39  ;;  %v358_v53 = vmul.f32 %v6044_v14, %v319_v44  ;;  %v998_v30 = vld [vmem:[#allocation2 + $0xc] sm:$0xf]  ;;  %v1002_v31 = vld [vmem:[#allocation2 + $0x14] sm:$0x1]  ;;  %s7996_s30 = scalar_lea.hbm %s8082_s5, %s5337_s14 }
  0x2a   : > { %v394_v51 = vadd.f32 %v6051_v20, %v355_v43  ;;  %v6089_v54 = vrot.slane %v1178_v45, 4  ;;  %v424_v56 = vmax.f32 %v392_v47, 0.0  ;;  %v395_v57 = vadd.f32 %v6051_v20, %v356_v48  ;;  %v1005_v47 = vld [vmem:[#allocation2 + $0x18] sm:$0xf]  ;;  %v1009_v48 = vld [vmem:[#allocation2 + $0x20] sm:$0x1] }
  0x2b   : > { %v423_v55 = vmax.f32 %v391_v46, 0.0  ;;  %v425_v58 = vmax.f32 %v393_v50, 0.0  ;;  %v396_v60 = vadd.f32 %v6051_v20, %v357_v52  ;;  %v359_v61 = vmul.f32 %v6044_v14, %v320_v49 }
  0x2c   : > { %v426_v59 = vmax.f32 %v394_v51, 0.0  ;;  %v1110_v62 = vld [vmem:[#allocation2] sm:$0xf]  ;;  %v1142_v63 = vld [vmem:[#allocation2 + $0x8] sm:$0x1]  ;;  %v5344_v3 = vpack.c.bf16 %v424_v56, %v424_v56  ;;  %v427_v4 = vmax.f32 %v395_v57, 0.0  ;;  %v6095_v5 = vadd.f32 %v6051_v20, %v358_v53 }
  0x2d   : > { %v5343_v0 = vpack.c.bf16 %v423_v55, %v423_v55  ;;  %v1162_v6 = vshrl.u32 %v1110_v62, 16  ;;  %v1165_v7 = vshll.u32 %v1110_v62, 16  ;;  %v1181_v8 = vshll.u32 %v1142_v63, 16  ;;  %v535_v53 = vld [vmem:[#allocation2 + $0x38] sm:$0x1] }
  0x2e   : > { %v1617_v9 = vrot.slane %v1142_v63, 5  ;;  %v684_v13 = vshrl.u32 %v5344_v3, 16  ;;  %v687_v15 = vshll.u32 %v5344_v3, 16  ;;  %v5345_v25 = vpack.c.bf16 %v425_v58, %v425_v58  ;;  %v321_v58 = vld [vmem:[%s6039_s15 + $0x40] sm:$0xff] }
  0x2f   : > { %v676_v11 = vshrl.u32 %v5343_v0, 16  ;;  %v679_v12 = vshll.u32 %v5343_v0, 16  ;;  %v1164_v16 = vrot.slane %v1162_v6, 4  ;;  %v1167_v17 = vrot.slane %v1165_v7, 5  ;;  %v482_v7 = vld [vmem:[#allocation2 + $0x3c] sm:$0x1] }
  0x30   : > { %v1183_v18 = vrot.slane %v1181_v8, 5  ;;  %v1618_v19 = vsel %vm6059_vm10, %v1616_v41, %v1617_v9  ;;  %v686_v24 = vrot.slane %v684_v13, 7  ;;  %v5346_v32 = vpack.c.bf16 %v426_v59, %v426_v59  ;;  %v322_v59 = vld [vmem:[%s6039_s15 + $0x48] sm:$0xff] }
  0x31   : > { %v5110_v22 = vcombine.low %v1615_v40, %v1618_v19  ;;  %v678_v23 = vrot.slane %v676_v11, 7  ;;  %v1168_v27 = vor.u32 %v1167_v17, %v1164_v16  ;;  %v428_v34 = vmax.f32 %v396_v60, 0.0  ;;  %v323_v11 = vld [vmem:[%s6039_s15 + $0x50] sm:$0xff]  ;;  %v1016_v19 = vld [vmem:[#allocation2 + $0x2c] sm:$0x1] }
  0x32   : > { %v1184_v28 = vsel %vm6099_vm12, %v6089_v54, %v1183_v18  ;;  %v689_v37 = vor.u32 %v687_v15, %v686_v24  ;;  %v691_v38 = vrot.slane %v686_v24, 4  ;;  %v693_v40 = vshrl.u32 %v5345_v25, 16  ;;  %v1012_v18 = vld [vmem:[#allocation2 + $0x24] sm:$0xf] }
  0x33   : > { %1916 = vrot.lane.b32.xlu1 %v5110_v22, %s5909_s20  ;;  %v681_v35 = vor.u32 %v679_v12, %v678_v23  ;;  %v682_v36 = vrot.slane %v678_v23, 4  ;;  %v1169_v39 = vrot.slane %v1168_v27, 4  ;;  %v696_v41 = vshll.u32 %v5345_v25, 16  ;;  %v324_v12 = vld [vmem:[%s6039_s15 + $0x58] sm:$0xff] }
  0x34   : > { %v701_v42 = vshrl.u32 %v5346_v32, 16  ;;  %v1003_v45 = vsel %vm6018_vm5, %v691_v38, %v1002_v31  ;;  %v704_v46 = vshll.u32 %v5346_v32, 16  ;;  %v695_v50 = vrot.slane %v693_v40, 7 }
  0x35   : > { %v690_v43 = vsel %vm6116_vm14, %v682_v36, %v689_v37  ;;  %v999_v44 = vsel %vm6107_vm13, %v681_v35, %v998_v30  ;;  %v1174_v49 = vsel %vm6099_vm12, %v1169_v39, %v6068_v33  ;;  %1004 = vst [vmem:[#allocation2 + $0x14] sm:$0x1] %v1003_v45  ;;  %v5347_v52 = vpack.c.bf16 %v427_v4, %v427_v4 }
  0x36   : > { %1000 = vst [vmem:[#allocation2 + $0xc] sm:$0xf] %v999_v44  ;;  %1001 = vst.msk [vmem:[#allocation2 + $0x10] sm:$0xf] %vm455_vm0, %v690_v43  ;;  %v703_v51 = vrot.slane %v701_v42, 7  ;;  %v5094_v54 = vcombine.low %v1174_v49, %v1184_v28  ;;  %v5348_v55 = vpack.c.bf16 %v428_v34, %v428_v34  ;;  %v398_v56 = vadd.f32 %v6051_v20, %v359_v61 }
  0x37   : > { %v429_v57 = vmax.f32 %v6095_v5, 0.0  ;;  %v698_v60 = vor.u32 %v696_v41, %v695_v50  ;;  %v699_v33 = vrot.slane %v695_v50, 4  ;;  %v710_v0 = vshrl.u32 %v5347_v52, 16 }
  0x38   : > { %v706_v62 = vor.u32 %v704_v46, %v703_v51  ;;  %v708_v63 = vrot.slane %v703_v51, 4  ;;  %1836 = vrot.lane.b32.xlu0 %v5094_v54, %s5910_s27  ;;  %v713_v3 = vshll.u32 %v5347_v52, 16  ;;  %v718_v4 = vshrl.u32 %v5348_v55, 16 }
  0x39   : > { %v721_v6 = vshll.u32 %v5348_v55, 16  ;;  %v1006_v5 = vsel %vm6107_vm13, %v698_v60, %v1005_v47  ;;  %v430_v9 = vmax.f32 %v398_v56, 0.0  ;;  %v712_v13 = vrot.slane %v710_v0, 7 }
  0x3a   : > { %v707_v61 = vsel %vm6116_vm14, %v699_v33, %v706_v62  ;;  %v1010_v8 = vsel %vm6018_vm5, %v708_v63, %v1009_v48  ;;  %1007 = vst [vmem:[#allocation2 + $0x18] sm:$0xf] %v1006_v5  ;;  %v720_v15 = vrot.slane %v718_v4, 7  ;;  %v536_v16 = vsel %vm6011_vm4, 0, %v535_v53 }
  0x3b   : > { %1008 = vst.msk [vmem:[#allocation2 + $0x1c] sm:$0xf] %vm455_vm0, %v707_v61  ;;  %1011 = vst [vmem:[#allocation2 + $0x20] sm:$0x1] %v1010_v8  ;;  %v6147_v17 = vpack.c.bf16 %v429_v57, %v429_v57  ;;  %v6149_v22 = vpack.c.bf16 %v430_v9, %v430_v9  ;;  %v360_v23 = vmul.f32 %v6044_v14, %v321_v58  ;;  %v483_v25 = vsel %vm6018_vm5, 0, %v482_v7 }
  0x3c   : > { %537 = vst [vmem:[#allocation2 + $0x38] sm:$0x1] %v536_v16  ;;  %v361_v24 = vmul.f32 %v6044_v14, %v322_v59  ;;  %v6157_v28 = vld [vmem:[#allocation2 + $0x14] sm:$0x1]  ;;  %v715_v31 = vor.u32 %v713_v3, %v712_v13  ;;  %v723_v32 = vor.u32 %v721_v6, %v720_v15  ;;  %484 = vst [vmem:[#allocation2 + $0x3c] sm:$0x1] %v483_v25 }
  0x3d   : > { %v6155_v27 = vld [vmem:[#allocation2 + $0x10] sm:$0xf]  ;;  %v2464_v30 = vld [vmem:[#allocation2 + $0xc] sm:$0xe]  ;;  %v362_v34 = vmul.f32 %v6044_v14, %v323_v11  ;;  %v6161_v35 = vmul.f32 %v6044_v14, %v324_v12  ;;  %v2533_v38 = vrot.slane %v6157_v28, 5  ;;  %v716_v40 = vrot.slane %v712_v13, 4 }
  0x3e   : > { %v5126_v36 = vrot.slane %v2464_v30, 9  ;;  %v2530_v37 = vrot.slane %v6155_v27, 5  ;;  %v6165_v39 = vld [vmem:[#allocation2 + $0x10] sm:$0xf]  ;;  %v6167_v41 = vld [vmem:[#allocation2 + $0x14] sm:$0x1]  ;;  %v1013_v45 = vsel %vm6107_vm13, %v715_v31, %v1012_v18  ;;  %v6173_v46 = vadd.f32 %v6051_v20, %v360_v23 }
  0x3f   : > { %v1546_v42 = vld [vmem:[#allocation2 + $0xc] sm:$0xe]  ;;  %v1621_v43 = vrot.slane %v6165_v39, 5  ;;  %v725_v44 = vrot.slane %v720_v15, 4  ;;  %v1624_v50 = vrot.slane %v6167_v41, 5  ;;  %v724_v53 = vsel %vm6116_vm14, %v716_v40, %v723_v32 }
  0x40   : > { %v2531_v47 = vsel %vm6059_vm10, %v5126_v36, %v2530_v37  ;;  %v2532_v48 = vrot.slane %v2530_v37, 4  ;;  %v5063_v49 = vrot.slane %v1546_v42, 9  ;;  %1014 = vst [vmem:[#allocation2 + $0x24] sm:$0xf] %v1013_v45  ;;  %v2032_v51 = vld [vmem:[#allocation2 + $0xc] sm:$0xf]  ;;  %v6192_v33 = vadd.f32 %v6051_v20, %v361_v24 }
  0x41   : > { %v1623_v52 = vrot.slane %v1621_v43, 4  ;;  %v1017_v54 = vsel %vm6018_vm5, %v725_v44, %v1016_v19  ;;  %v2081_v55 = vshrl.u32 %v2032_v51, 16  ;;  %v2465_v60 = vld [vmem:[#allocation2 + $0x18] sm:$0xe]  ;;  %1015 = vst.msk [vmem:[#allocation2 + $0x28] sm:$0xf] %vm455_vm0, %v724_v53  ;;  %v6195_v62 = vadd.f32 %v6051_v20, %v362_v34 }
  0x42   : > { %v2534_v56 = vsel %vm6059_vm10, %v2532_v48, %v2533_v38  ;;  %v1622_v57 = vsel %vm6059_vm10, %v5063_v49, %v1621_v43  ;;  %v6186_v58 = vld [vmem:[#allocation2 + $0x1c] sm:$0xf]  ;;  %v6188_v59 = vld [vmem:[#allocation2 + $0x20] sm:$0x1]  ;;  %1018 = vst [vmem:[#allocation2 + $0x2c] sm:$0x1] %v1017_v54  ;;  %v6226_v49 = vadd.f32 %v6051_v20, %v6161_v35 }
  0x43   : > { %v5174_v63 = vcombine.low %v2531_v47, %v2534_v56  ;;  %v1625_v0 = vsel %vm6059_vm10, %v1623_v52, %v1624_v50  ;;  %v5127_v3 = vrot.slane %v2465_v60, 9  ;;  %v2537_v4 = vrot.slane %v6186_v58, 5  ;;  %v6200_v6 = vld [vmem:[#allocation2 + $0x1c] sm:$0xf]  ;;  %v6202_v7 = vld [vmem:[#allocation2 + $0x20] sm:$0x1] }
  0x44   : > { %v5111_v61 = vcombine.low %v1622_v57, %v1625_v0  ;;  %v2540_v5 = vrot.slane %v6188_v59, 5  ;;  %v1547_v8 = vld [vmem:[#allocation2 + $0x18] sm:$0xe]  ;;  %v1628_v9 = vrot.slane %v6200_v6, 5  ;;  %v1631_v11 = vrot.slane %v6202_v7, 5 }
  0x45   : > { %2832 = vrot.lane.b32.xlu1 %v5174_v63, %s5909_s20  ;;  %v2538_v12 = vsel %vm6059_vm10, %v5127_v3, %v2537_v4  ;;  %v2539_v13 = vrot.slane %v2537_v4, 4  ;;  %v5064_v15 = vrot.slane %v1547_v8, 9  ;;  %v2083_v16 = vrot.slane %v2081_v55, 4  ;;  %v2034_v18 = vld [vmem:[#allocation2 + $0x18] sm:$0xf] }
  0x46   : > { %1918 = vrot.lane.b32.xlu0 %v5111_v61, %s5909_s20  ;;  %v1630_v19 = vrot.slane %v1628_v9, 4  ;;  %v2084_v23 = vshll.u32 %v2032_v51, 16  ;;  %v2090_v24 = vshll.u32 %v6155_v27, 16  ;;  %v2094_v25 = vshrl.u32 %v6155_v27, 16 }
  0x47   : > { %v2541_v30 = vsel %vm6059_vm10, %v2539_v13, %v2540_v5  ;;  %v1548_v31 = vld [vmem:[#allocation2 + $0x24] sm:$0xe]  ;;  %v1629_v32 = vsel %vm6059_vm10, %v5064_v15, %v1628_v9  ;;  %v2100_v34 = vshll.u32 %v6157_v28, 16  ;;  %v2105_v36 = vshrl.u32 %v2034_v18, 16 }
  0x48   : > { %v5175_v37 = vcombine.low %v2538_v12, %v2541_v30  ;;  %v5065_v38 = vrot.slane %v1548_v31, 9  ;;  %v1632_v40 = vsel %vm6059_vm10, %v1630_v19, %v1631_v11  ;;  %v2086_v42 = vrot.slane %v2084_v23, 5  ;;  %v2466_v43 = vld [vmem:[#allocation2 + $0x24] sm:$0xe]  ;;  %v6220_v44 = vld [vmem:[#allocation2 + $0x28] sm:$0xf] }
  0x49   : > { %v6222_v27 = vld [vmem:[#allocation2 + $0x2c] sm:$0x1]  ;;  %v5112_v45 = vcombine.low %v1629_v32, %v1632_v40  ;;  %v2092_v47 = vrot.slane %v2090_v24, 5  ;;  %v2096_v48 = vrot.slane %v2094_v25, 4  ;;  %v1635_v28 = vrot.slane %v6220_v44, 5 }
  0x4a   : > { %2834 = vrot.lane.b32.xlu1 %v5175_v37, %s5909_s20  ;;  %v1638_v50 = vrot.slane %v6222_v27, 5  ;;  %v2087_v51 = vor.u32 %v2086_v42, %v2083_v16  ;;  %v2102_v52 = vrot.slane %v2100_v34, 5  ;;  %v6231_v53 = vld [vmem:[#allocation2 + $0x28] sm:$0xf]  ;;  %v6233_v55 = vld [vmem:[#allocation2 + $0x2c] sm:$0x1] }
  0x4b   : > { %v2097_v54 = vor.u32 %v2096_v48, %v2092_v47  ;;  %v5128_v56 = vrot.slane %v2466_v43, 9  ;;  %v2544_v57 = vrot.slane %v6231_v53, 5  ;;  %v2107_v60 = vrot.slane %v2105_v36, 4  ;;  %v1114_v23 = vld [vmem:[#allocation2 + $0x18] sm:$0xf] }
  0x4c   : > { %v1636_v35 = vsel %vm6059_vm10, %v5065_v38, %v1635_v28  ;;  %v1637_v63 = vrot.slane %v1635_v28, 4  ;;  %v2088_v0 = vrot.slane %v2087_v51, 4  ;;  %v2547_v3 = vrot.slane %v6233_v55, 5  ;;  %v1019_v51 = vld [vmem:[#allocation2 + $0x30] sm:$0xf] }
  0x4d   : > { %v2098_v4 = vrot.slane %v2097_v54, 4  ;;  %v2545_v61 = vsel %vm6059_vm10, %v5128_v56, %v2544_v57  ;;  %v2546_v5 = vrot.slane %v2544_v57, 4  ;;  %v2108_v8 = vshll.u32 %v2034_v18, 16  ;;  %v1023_v57 = vld [vmem:[#allocation2 + $0x38] sm:$0x1] }
  0x4e   : > { %v1639_v9 = vsel %vm6059_vm10, %v1637_v63, %v1638_v50  ;;  %1920 = vrot.lane.b32.xlu1 %v5112_v45, %s5909_s20  ;;  %v2093_v11 = vsel %vm6099_vm12, %v2088_v0, %v2092_v47  ;;  %v2114_v12 = vshll.u32 %v6186_v58, 16  ;;  %v2118_v13 = vshrl.u32 %v6186_v58, 16 }
  0x4f   : > { %v5113_v15 = vcombine.low %v1636_v35, %v1639_v9  ;;  %v2103_v16 = vsel %vm6099_vm12, %v2098_v4, %v2102_v52  ;;  %v2548_v19 = vsel %vm6059_vm10, %v2546_v5, %v2547_v3  ;;  %v2110_v18 = vrot.slane %v2108_v8, 5 }
  0x50   : > { %v5158_v24 = vcombine.low %v2093_v11, %v2103_v16  ;;  %v5176_v25 = vcombine.low %v2545_v61, %v2548_v19  ;;  %v2116_v30 = vrot.slane %v2114_v12, 5  ;;  %v2120_v31 = vrot.slane %v2118_v13, 4 }
  0x51   : > { %1922 = vrot.lane.b32.xlu0 %v5113_v15, %s5909_s20  ;;  %v2111_v32 = vor.u32 %v2110_v18, %v2107_v60  ;;  %v2124_v34 = vshll.u32 %v6188_v59, 16  ;;  %v727_v58 = vshrl.u32 %v6147_v17, 16  ;;  %v730_v36 = vshll.u32 %v6147_v17, 16  ;;  %v1116_v60 = vld [vmem:[#allocation2 + $0x24] sm:$0xf] }
  0x52   : > { %2836 = vrot.lane.b32.xlu1 %v5176_v25, %s5909_s20  ;;  %v2121_v37 = vor.u32 %v2120_v31, %v2116_v30  ;;  %v735_v38 = vshrl.u32 %v6149_v22, 16  ;;  %v738_v40 = vshll.u32 %v6149_v22, 16  ;;  %v1210_v42 = vshrl.u32 %v1114_v23, 16  ;;  %v538_v18 = vld [vmem:[#allocation2 + $0x44] sm:$0x1] }
  0x53   : > { %v2112_v43 = vrot.slane %v2111_v32, 4  ;;  %v2126_v45 = vrot.slane %v2124_v34, 5  ;;  %v729_v47 = vrot.slane %v727_v58, 7  ;;  %v1213_v48 = vshll.u32 %v1114_v23, 16 }
  0x54   : > { %v2122_v28 = vrot.slane %v2121_v37, 4  ;;  %v737_v50 = vrot.slane %v735_v38, 7  ;;  %v1212_v59 = vrot.slane %v1210_v42, 4  ;;  %v1219_v52 = vshll.u32 %v6200_v6, 16  ;;  %v325_v42 = vld [vmem:[%s6039_s15 + $0x60] sm:$0xff] }
  0x55   : > { %2752 = vrot.lane.b32.xlu0 %v5158_v24, %s5910_s27  ;;  %v2117_v17 = vsel %vm6099_vm12, %v2112_v43, %v2116_v30  ;;  %v732_v54 = vor.u32 %v730_v36, %v729_v47  ;;  %v733_v56 = vrot.slane %v729_v47, 4  ;;  %v1215_v22 = vrot.slane %v1213_v48, 5  ;;  %v6278_v30 = vld [vmem:[#allocation2 + $0xc] sm:$0xf] }
  0x56   : > { %v2127_v35 = vsel %vm6099_vm12, %v2122_v28, %v2126_v45  ;;  %v740_v63 = vor.u32 %v738_v40, %v737_v50  ;;  %v742_v0 = vrot.slane %v737_v50, 4  ;;  %v1221_v3 = vrot.slane %v1219_v52, 5  ;;  %v326_v47 = vld [vmem:[%s6039_s15 + $0x68] sm:$0xff] }
  0x57   : > { %v5159_v4 = vcombine.low %v2117_v17, %v2127_v35  ;;  %v1020_v61 = vsel %vm6107_vm13, %v732_v54, %v1019_v51  ;;  %v1216_v5 = vor.u32 %v1215_v22, %v1212_v59  ;;  %v1223_v8 = vshrl.u32 %v6200_v6, 16 }
  0x58   : > { %v741_v9 = vsel %vm6116_vm14, %v733_v56, %v740_v63  ;;  %1021 = vst [vmem:[#allocation2 + $0x30] sm:$0xf] %v1020_v61  ;;  %v1024_v11 = vsel %vm6018_vm5, %v742_v0, %v1023_v57  ;;  %v1229_v12 = vshll.u32 %v6202_v7, 16  ;;  %v1234_v13 = vshrl.u32 %v1116_v60, 16 }
  0x59   : > { %2754 = vrot.lane.b32.xlu0 %v5159_v4, %s5910_s27  ;;  %1022 = vst.msk [vmem:[#allocation2 + $0x34] sm:$0xf] %vm455_vm0, %v741_v9  ;;  %1025 = vst [vmem:[#allocation2 + $0x38] sm:$0x1] %v1024_v11  ;;  %v1217_v15 = vrot.slane %v1216_v5, 4  ;;  %v1225_v16 = vrot.slane %v1223_v8, 4  ;;  %v364_v54 = vmul.f32 %v6044_v14, %v325_v42  ;;  %v6296_v63 = vmul.f32 %v6044_v14, %v326_v47 }
  0x5a   : > { %v1237_v19 = vshll.u32 %v1116_v60, 16  ;;  %v1243_v6 = vshll.u32 %v6220_v44, 16  ;;  %v1231_v23 = vrot.slane %v1229_v12, 5  ;;  %v1236_v24 = vrot.slane %v1234_v13, 4 }
  0x5b   : > { %v1247_v25 = vshrl.u32 %v6220_v44, 16  ;;  %v1253_v7 = vshll.u32 %v6222_v27, 16  ;;  %v1222_v31 = vsel %vm6099_vm12, %v1217_v15, %v1221_v3  ;;  %v1226_v32 = vor.u32 %v1225_v16, %v1221_v3 }
  0x5c   : > { %v1239_v34 = vrot.slane %v1237_v19, 5  ;;  %v1245_v58 = vrot.slane %v1243_v6, 5  ;;  %v431_v38 = vmax.f32 %v6173_v46, 0.0  ;;  %v432_v40 = vmax.f32 %v6192_v33, 0.0 }
  0x5d   : > { %v1249_v36 = vrot.slane %v1247_v25, 4  ;;  %v1255_v37 = vrot.slane %v1253_v7, 5  ;;  %v1227_v43 = vrot.slane %v1226_v32, 4  ;;  %v539_v27 = vsel %vm6011_vm4, 0, %v538_v18 }
  0x5e   : > { %v1240_v44 = vor.u32 %v1239_v34, %v1236_v24  ;;  %v1186_v45 = vshrl.u32 %v6278_v30, 16  ;;  %540 = vst [vmem:[#allocation2 + $0x44] sm:$0x1] %v539_v27  ;;  %v5351_v28 = vpack.c.bf16 %v431_v38, %v431_v38  ;;  %v5352_v50 = vpack.c.bf16 %v432_v40, %v432_v40 }
  0x5f   : > { %v1250_v48 = vor.u32 %v1249_v36, %v1245_v58  ;;  %v1189_v51 = vshll.u32 %v6278_v30, 16  ;;  %v2467_v59 = vld [vmem:[#allocation2 + $0x30] sm:$0xe]  ;;  %v1232_v46 = vsel %vm6099_vm12, %v1227_v43, %v1231_v23  ;;  %v6303_v8 = vadd.f32 %v6051_v20, %v364_v54 }
  0x60   : > { %v1549_v33 = vld [vmem:[#allocation2 + $0x30] sm:$0xe]  ;;  %v1241_v52 = vrot.slane %v1240_v44, 4  ;;  %v6292_v17 = vrot.slane %v1186_v45, 4  ;;  %v2039_v56 = vld [vmem:[#allocation2 + $0x34] sm:$0xf]  ;;  %v5096_v60 = vcombine.low %v1222_v31, %v1232_v46 }
  0x61   : > { %v2067_v57 = vld [vmem:[#allocation2 + $0x38] sm:$0x1]  ;;  %v5129_v22 = vrot.slane %v2467_v59, 9  ;;  %v5066_v35 = vrot.slane %v1549_v33, 9  ;;  %v2551_v0 = vrot.slane %v2039_v56, 5  ;;  %v1251_v12 = vrot.slane %v1250_v48, 4 }
  0x62   : > { %v2554_v3 = vrot.slane %v2067_v57, 5  ;;  %v1119_v4 = vld [vmem:[#allocation2 + $0x34] sm:$0xf]  ;;  %v6298_v61 = vld [vmem:[#allocation2 + $0x38] sm:$0x1]  ;;  %v1246_v5 = vsel %vm6099_vm12, %v1241_v52, %v1245_v58  ;;  %1840 = vrot.lane.b32.xlu0 %v5096_v60, %s5910_s27  ;;  %v744_v13 = vshrl.u32 %v5351_v28, 16 }
  0x63   : > { %v1642_v9 = vrot.slane %v1119_v4, 5  ;;  %v1645_v11 = vrot.slane %v6298_v61, 5  ;;  %v2552_v14 = vsel %vm6059_vm10, %v5129_v22, %v2551_v0  ;;  %v2553_v15 = vrot.slane %v2551_v0, 4  ;;  %v2038_v25 = vld [vmem:[#allocation2 + $0x30] sm:$0xf] }
  0x64   : > { %v747_v16 = vshll.u32 %v5351_v28, 16  ;;  %v752_v19 = vshrl.u32 %v5352_v50, 16  ;;  %v1256_v23 = vsel %vm6099_vm12, %v1251_v12, %v1255_v37  ;;  %v746_v24 = vrot.slane %v744_v13, 7  ;;  %v1026_v58 = vld [vmem:[#allocation2 + $0x3c] sm:$0xf] }
  0x65   : > { %v1643_v6 = vsel %vm6059_vm10, %v5066_v35, %v1642_v9  ;;  %v1644_v18 = vrot.slane %v1642_v9, 4  ;;  %v2555_v7 = vsel %vm6059_vm10, %v2553_v15, %v2554_v3  ;;  %v5097_v31 = vcombine.low %v1246_v5, %v1256_v23  ;;  %v1030_v43 = vld [vmem:[#allocation2 + $0x44] sm:$0x1]  ;;  %v1118_v47 = vld [vmem:[#allocation2 + $0x30] sm:$0xf] }
  0x66   : > { %v754_v32 = vrot.slane %v752_v19, 7  ;;  %v755_v34 = vshll.u32 %v5352_v50, 16  ;;  %v5177_v36 = vcombine.low %v2552_v14, %v2555_v7  ;;  %v749_v40 = vor.u32 %v747_v16, %v746_v24 }
  0x67   : > { %v1646_v38 = vsel %vm6059_vm10, %v1644_v18, %v1645_v11  ;;  %v750_v42 = vrot.slane %v746_v24, 4  ;;  %1842 = vrot.lane.b32.xlu0 %v5097_v31, %s5910_s27  ;;  %v2153_v45 = vshrl.u32 %v2038_v25, 16  ;;  %v2156_v28 = vshll.u32 %v2038_v25, 16 }
  0x68   : > { %v5114_v44 = vcombine.low %v1643_v6, %v1646_v38  ;;  %v757_v37 = vor.u32 %v755_v34, %v754_v32  ;;  %v759_v27 = vrot.slane %v754_v32, 4  ;;  %2838 = vrot.lane.b32.xlu1 %v5177_v36, %s5909_s20  ;;  %v1027_v48 = vsel %vm6107_vm13, %v749_v40, %v1026_v58 }
  0x69   : > { %v2162_v50 = vshll.u32 %v2039_v56, 16  ;;  %v2166_v59 = vshrl.u32 %v2039_v56, 16  ;;  %1028 = vst [vmem:[#allocation2 + $0x3c] sm:$0xf] %v1027_v48  ;;  %v2155_v52 = vrot.slane %v2153_v45, 4  ;;  %v2172_v54 = vshll.u32 %v2067_v57, 16 }
  0x6a   : > { %v758_v46 = vsel %vm6116_vm14, %v750_v42, %v757_v37  ;;  %v1031_v33 = vsel %vm6018_vm5, %v759_v27, %v1030_v43  ;;  %v2158_v22 = vrot.slane %v2156_v28, 5  ;;  %v1258_v0 = vshrl.u32 %v1118_v47, 16 }
  0x6b   : > { %1029 = vst.msk [vmem:[#allocation2 + $0x40] sm:$0xf] %vm455_vm0, %v758_v46  ;;  %1032 = vst [vmem:[#allocation2 + $0x44] sm:$0x1] %v1031_v33  ;;  %v2164_v60 = vrot.slane %v2162_v50, 5  ;;  %v2168_v35 = vrot.slane %v2166_v59, 4 }
  0x6c   : > { %v2174_v3 = vrot.slane %v2172_v54, 5  ;;  %v1261_v5 = vshll.u32 %v1118_v47, 16  ;;  %v1267_v9 = vshll.u32 %v1119_v4, 16  ;;  %v1271_v56 = vshrl.u32 %v1119_v4, 16  ;;  %1924 = vrot.lane.b32.xlu1 %v5114_v44, %s5909_s20  ;;  %v2036_v33 = vld [vmem:[#allocation2 + $0x24] sm:$0xf] }
  0x6d   : > { %v2159_v11 = vor.u32 %v2158_v22, %v2155_v52  ;;  %v2169_v12 = vor.u32 %v2168_v35, %v2164_v60  ;;  %v1260_v13 = vrot.slane %v1258_v0, 4  ;;  %v1277_v14 = vshll.u32 %v6298_v61, 16 }
  0x6e   : > { %v1263_v15 = vrot.slane %v1261_v5, 5  ;;  %v1269_v57 = vrot.slane %v1267_v9, 5  ;;  %v1273_v16 = vrot.slane %v1271_v56, 4  ;;  %v1191_v19 = vrot.slane %v1189_v51, 5 }
  0x6f   : > { %v2160_v6 = vrot.slane %v2159_v11, 4  ;;  %v2170_v18 = vrot.slane %v2169_v12, 4  ;;  %v1279_v23 = vrot.slane %v1277_v14, 5  ;;  %v1195_v24 = vshll.u32 %v6165_v39, 16 }
  0x70   : > { %v1264_v25 = vor.u32 %v1263_v15, %v1260_v13  ;;  %v1274_v4 = vor.u32 %v1273_v16, %v1269_v57  ;;  %v1192_v7 = vor.u32 %v1191_v19, %v6292_v17  ;;  %v1199_v31 = vshrl.u32 %v6165_v39, 16  ;;  %v2468_v32 = vld [vmem:[#allocation2 + $0x3c] sm:$0xe] }
  0x71   : > { %v2165_v61 = vsel %vm6099_vm12, %v2160_v6, %v2164_v60  ;;  %v2175_v34 = vsel %vm6099_vm12, %v2170_v18, %v2174_v3  ;;  %v1197_v30 = vrot.slane %v1195_v24, 5  ;;  %v1205_v51 = vshll.u32 %v6167_v41, 16  ;;  %v1120_v58 = vld [vmem:[#allocation2 + $0x3c] sm:$0xf] }
  0x72   : > { %v6338_v36 = vld [vmem:[#allocation2 + $0x40] sm:$0xf]  ;;  %v6340_v38 = vld [vmem:[#allocation2 + $0x44] sm:$0x1]  ;;  %v5130_v40 = vrot.slane %v2468_v32, 9  ;;  %v5161_v42 = vcombine.low %v2165_v61, %v2175_v34  ;;  %v1265_v17 = vrot.slane %v1264_v25, 4  ;;  %v6344_v39 = vadd.f32 %v6051_v20, %v6296_v63 }
  0x73   : > { %v2558_v43 = vrot.slane %v6338_v36, 5  ;;  %v2561_v44 = vrot.slane %v6340_v38, 5  ;;  %v1275_v37 = vrot.slane %v1274_v4, 4  ;;  %v1193_v27 = vrot.slane %v1192_v7, 4  ;;  %v6348_v45 = vld [vmem:[#allocation2 + $0x40] sm:$0xf] }
  0x74   : > { %2758 = vrot.lane.b32.xlu0 %v5161_v42, %s5910_s27  ;;  %v1270_v41 = vsel %vm6099_vm12, %v1265_v17, %v1269_v57  ;;  %v1201_v47 = vrot.slane %v1199_v31, 4  ;;  %v1207_v48 = vrot.slane %v1205_v51, 5  ;;  %v6353_v28 = vld [vmem:[#allocation2 + $0x44] sm:$0x1]  ;;  %v1282_v50 = vshrl.u32 %v1120_v58, 16 }
  0x75   : > { %v2559_v20 = vsel %vm6059_vm10, %v5130_v40, %v2558_v43  ;;  %v2560_v63 = vrot.slane %v2558_v43, 4  ;;  %v1280_v59 = vsel %vm6099_vm12, %v1275_v37, %v1279_v23  ;;  %v1198_v46 = vsel %vm6099_vm12, %v1193_v27, %v1197_v30  ;;  %v485_v7 = vld [vmem:[#allocation2 + $0x48] sm:$0x1]  ;;  %v541_v31 = vld [vmem:[#allocation2 + $0x50] sm:$0x1] }
  0x76   : > { %v5098_v52 = vcombine.low %v1270_v41, %v1280_v59  ;;  %v1202_v54 = vor.u32 %v1201_v47, %v1197_v30  ;;  %v1284_v22 = vrot.slane %v1282_v50, 4  ;;  %v1285_v60 = vshll.u32 %v1120_v58, 16  ;;  %v2040_v17 = vld [vmem:[#allocation2 + $0x3c] sm:$0xf] }
  0x77   : > { %v2562_v35 = vsel %vm6059_vm10, %v2560_v63, %v2561_v44  ;;  %v1291_v0 = vshll.u32 %v6348_v45, 16  ;;  %v1295_v3 = vshrl.u32 %v6348_v45, 16  ;;  %v1301_v5 = vshll.u32 %v6353_v28, 16 }
  0x78   : > { %v5178_v9 = vcombine.low %v2559_v20, %v2562_v35  ;;  %1844 = vrot.lane.b32.xlu0 %v5098_v52, %s5910_s27  ;;  %v1203_v56 = vrot.slane %v1202_v54, 4  ;;  %v1287_v11 = vrot.slane %v1285_v60, 5  ;;  %v2129_v12 = vshrl.u32 %v2036_v33, 16 }
  0x79   : > { %v1293_v13 = vrot.slane %v1291_v0, 5  ;;  %v1297_v14 = vrot.slane %v1295_v3, 4  ;;  %v1303_v15 = vrot.slane %v1301_v5, 5  ;;  %v2132_v57 = vshll.u32 %v2036_v33, 16  ;;  %v327_v5 = vld [vmem:[%s6039_s15 + $0x70] sm:$0xff] }
  0x7a   : > { %2840 = vrot.lane.b32.xlu1 %v5178_v9, %s5909_s20  ;;  %v1208_v16 = vsel %vm6099_vm12, %v1203_v56, %v1207_v48  ;;  %v1288_v19 = vor.u32 %v1287_v11, %v1284_v22  ;;  %v2131_v6 = vrot.slane %v2129_v12, 4  ;;  %v2138_v18 = vshll.u32 %v6231_v53, 16 }
  0x7b   : > { %v5095_v23 = vcombine.low %v1198_v46, %v1208_v16  ;;  %v1298_v24 = vor.u32 %v1297_v14, %v1293_v13  ;;  %v2134_v25 = vrot.slane %v2132_v57, 5  ;;  %v2142_v4 = vshrl.u32 %v6231_v53, 16 }
  0x7c   : > { %v1289_v32 = vrot.slane %v1288_v19, 4  ;;  %v2140_v61 = vrot.slane %v2138_v18, 5  ;;  %v2148_v34 = vshll.u32 %v6233_v55, 16  ;;  %v433_v30 = vmax.f32 %v6195_v62, 0.0 }
  0x7d   : > { %v1299_v51 = vrot.slane %v1298_v24, 4  ;;  %v2135_v58 = vor.u32 %v2134_v25, %v2131_v6  ;;  %v2144_v40 = vrot.slane %v2142_v4, 4  ;;  %v434_v42 = vmax.f32 %v6226_v49, 0.0 }
  0x7e   : > { %1838 = vrot.lane.b32.xlu1 %v5095_v23, %s5910_s27  ;;  %v1294_v43 = vsel %vm6099_vm12, %v1289_v32, %v1293_v13  ;;  %v2150_v53 = vrot.slane %v2148_v34, 5  ;;  %v486_v44 = vsel %vm6018_vm5, 0, %v485_v7  ;;  %v542_v55 = vsel %vm6011_vm4, 0, %v541_v31  ;;  %v1550_v13 = vld [vmem:[#allocation2 + $0x3c] sm:$0xe] }
  0x7f   : > { %v1304_v62 = vsel %vm6099_vm12, %v1299_v51, %v1303_v15  ;;  %v2136_v37 = vrot.slane %v2135_v58, 4  ;;  %v2145_v27 = vor.u32 %v2144_v40, %v2140_v61  ;;  %487 = vst [vmem:[#allocation2 + $0x48] sm:$0x1] %v486_v44  ;;  %543 = vst [vmem:[#allocation2 + $0x50] sm:$0x1] %v542_v55  ;;  %v5353_v49 = vpack.c.bf16 %v433_v30, %v433_v30  ;;  %v328_v40 = vld [vmem:[%s6039_s15 + $0x78] sm:$0xff] }
  0x80   : > { %v5099_v41 = vcombine.low %v1294_v43, %v1304_v62  ;;  %v5354_v47 = vpack.c.bf16 %v434_v42, %v434_v42  ;;  %v2177_v48 = vshrl.u32 %v2040_v17, 16  ;;  %v2180_v50 = vshll.u32 %v2040_v17, 16  ;;  %v488_v32 = vld [vmem:[#allocation2 + $0x54] sm:$0x1]  ;;  %v491_v44 = vld [vmem:[#allocation2 + $0x60] sm:$0x1] }
  0x81   : > { %v2141_v20 = vsel %vm6099_vm12, %v2136_v37, %v2140_v61  ;;  %v2146_v63 = vrot.slane %v2145_v27, 4  ;;  %v761_v59 = vshrl.u32 %v5353_v49, 16  ;;  %v764_v46 = vshll.u32 %v5353_v49, 16  ;;  %v544_v61 = vld [vmem:[#allocation2 + $0x5c] sm:$0x1] }
  0x82   : > { %1846 = vrot.lane.b32.xlu0 %v5099_v41, %s5910_s27  ;;  %v769_v33 = vshrl.u32 %v5354_v47, 16  ;;  %v772_v52 = vshll.u32 %v5354_v47, 16  ;;  %v2179_v54 = vrot.slane %v2177_v48, 4  ;;  %v2182_v22 = vrot.slane %v2180_v50, 5  ;;  %v547_v49 = vld [vmem:[#allocation2 + $0x68] sm:$0x1] }
  0x83   : > { %v2151_v60 = vsel %vm6099_vm12, %v2146_v63, %v2150_v53  ;;  %v763_v35 = vrot.slane %v761_v59, 7  ;;  %v2186_v0 = vshll.u32 %v6338_v36, 16  ;;  %v2190_v3 = vshrl.u32 %v6338_v36, 16  ;;  %v6397_v36 = vld [vmem:[%s8078_s1] ss:$0 sm:$0xff]  ;;  %v330_v59 = vld [vmem:[%s6039_s15 + $0x88] sm:$0xff] }
  0x84   : > { %v5160_v9 = vcombine.low %v2141_v20, %v2151_v60  ;;  %v771_v56 = vrot.slane %v769_v33, 7  ;;  %v2183_v11 = vor.u32 %v2182_v22, %v2179_v54  ;;  %v2196_v12 = vshll.u32 %v6340_v38, 16  ;;  %v329_v41 = vld [vmem:[%s6039_s15 + $0x80] sm:$0xff]  ;;  %v332_v33 = vld [vmem:[%s6039_s15 + $0x98] sm:$0xff] }
  0x85   : > { %v766_v14 = vor.u32 %v764_v46, %v763_v35  ;;  %v767_v15 = vrot.slane %v763_v35, 4  ;;  %v2188_v57 = vrot.slane %v2186_v0, 5  ;;  %v2192_v16 = vrot.slane %v2190_v3, 4  ;;  %v6437_v50 = vld [vmem:[%s8079_s2] ss:$0 sm:$0xff]  ;;  %v331_v46 = vld [vmem:[%s6039_s15 + $0x90] sm:$0xff] }
  0x86   : > { %2756 = vrot.lane.b32.xlu1 %v5160_v9, %s5910_s27  ;;  %v774_v19 = vor.u32 %v772_v52, %v771_v56  ;;  %v776_v6 = vrot.slane %v771_v56, 4  ;;  %v1033_v18 = vld [vmem:[#allocation2 + $0x48] sm:$0xf]  ;;  %v1037_v23 = vld [vmem:[#allocation2 + $0x50] sm:$0x1]  ;;  %v2184_v24 = vrot.slane %v2183_v11, 4  ;;  %v366_v38 = vmul.f32 %v6397_v36, %v327_v5 }
  0x87   : > { %v1034_v25 = vsel %vm6107_vm13, %v766_v14, %v1033_v18  ;;  %v2193_v4 = vor.u32 %v2192_v16, %v2188_v57  ;;  %v2198_v7 = vrot.slane %v2196_v12, 5  ;;  %v5067_v31 = vrot.slane %v1550_v13, 9  ;;  %v333_v35 = vld [vmem:[%s6039_s15 + $0xa0] sm:$0xff] }
  0x88   : > { %v775_v34 = vsel %vm6116_vm14, %v767_v15, %v774_v19  ;;  %1035 = vst [vmem:[#allocation2 + $0x48] sm:$0xf] %v1034_v25  ;;  %v1038_v30 = vsel %vm6018_vm5, %v776_v6, %v1037_v23  ;;  %v2189_v51 = vsel %vm6099_vm12, %v2184_v24, %v2188_v57  ;;  %v1649_v58 = vrot.slane %v6348_v45, 5 }
  0x89   : > { %1036 = vst.msk [vmem:[#allocation2 + $0x4c] sm:$0xf] %vm455_vm0, %v775_v34  ;;  %1039 = vst [vmem:[#allocation2 + $0x50] sm:$0x1] %v1038_v30  ;;  %v2194_v42 = vrot.slane %v2193_v4, 4  ;;  %v1652_v17 = vrot.slane %v6353_v28, 5  ;;  %v367_v27 = vmul.f32 %v6397_v36, %v328_v40  ;;  %v405_v20 = vadd.f32 %v6437_v50, %v366_v38 }
  0x8a   : > { %v435_v43 = vmax.f32 %v6303_v8, 0.0  ;;  %v436_v53 = vmax.f32 %v6344_v39, 0.0  ;;  %v6416_v55 = vsel %vm6059_vm10, %v5067_v31, %v1649_v58  ;;  %v1651_v62 = vrot.slane %v1649_v58, 4 }
  0x8b   : > { %v489_v45 = vsel %vm6018_vm5, 0, %v488_v32  ;;  %v545_v37 = vsel %vm6011_vm4, 0, %v544_v61  ;;  %v2199_v8 = vsel %vm6099_vm12, %v2194_v42, %v2198_v7  ;;  %v492_v63 = vsel %vm6018_vm5, 0, %v491_v44 }
  0x8c   : > { %490 = vst [vmem:[#allocation2 + $0x54] sm:$0x1] %v489_v45  ;;  %546 = vst [vmem:[#allocation2 + $0x5c] sm:$0x1] %v545_v37  ;;  %v6424_v39 = vpack.c.bf16 %v435_v43, %v435_v43  ;;  %v6426_v28 = vpack.c.bf16 %v436_v53, %v436_v53  ;;  %v5162_v47 = vcombine.low %v2189_v51, %v2199_v8  ;;  %v437_v5 = vmax.f32 %v405_v20, 0.0 }
  0x8d   : > { %v6432_v48 = vsel %vm6059_vm10, %v1651_v62, %v1652_v17  ;;  %493 = vst [vmem:[#allocation2 + $0x60] sm:$0x1] %v492_v63  ;;  %v6454_v3 = vadd.f32 %v6437_v50, %v367_v27  ;;  %v548_v9 = vsel %vm6011_vm4, 0, %v547_v49  ;;  %v6459_v13 = vmul.f32 %v6397_v36, %v329_v41 }
  0x8e   : > { %v5115_v52 = vcombine.low %v6416_v55, %v6432_v48  ;;  %v778_v54 = vshrl.u32 %v6424_v39, 16  ;;  %v781_v22 = vshll.u32 %v6424_v39, 16  ;;  %v786_v60 = vshrl.u32 %v6426_v28, 16  ;;  %2760 = vrot.lane.b32.xlu1 %v5162_v47, %s5910_s27  ;;  %549 = vst [vmem:[#allocation2 + $0x68] sm:$0x1] %v548_v9 }
  0x8f   : > { %v789_v0 = vshll.u32 %v6426_v28, 16  ;;  %v2042_v56 = vld [vmem:[#allocation2 + $0x48] sm:$0xf]  ;;  %v6462_v14 = vmul.f32 %v6397_v36, %v330_v59  ;;  %v6465_v15 = vmul.f32 %v6397_v36, %v331_v46  ;;  %v6468_v57 = vmul.f32 %v6397_v36, %v332_v33 }
  0x90   : > { %v2469_v11 = vld [vmem:[#allocation2 + $0x48] sm:$0xe]  ;;  %v2043_v16 = vld [vmem:[#allocation2 + $0x4c] sm:$0xf]  ;;  %v2069_v19 = vld [vmem:[#allocation2 + $0x50] sm:$0x1]  ;;  %v6470_v23 = vpack.c.bf16 %v437_v5, %v437_v5  ;;  %v6473_v24 = vmul.f32 %v6397_v36, %v333_v35 }
  0x91   : > { %v1122_v12 = vld [vmem:[#allocation2 + $0x48] sm:$0xf]  ;;  %v2201_v6 = vshrl.u32 %v2042_v56, 16  ;;  %v2204_v18 = vshll.u32 %v2042_v56, 16  ;;  %v2210_v38 = vshll.u32 %v2043_v16, 16  ;;  %v2214_v25 = vshrl.u32 %v2043_v16, 16 }
  0x92   : > { %v2220_v4 = vshll.u32 %v2069_v19, 16  ;;  %v5131_v7 = vrot.slane %v2469_v11, 9  ;;  %v2565_v61 = vrot.slane %v2043_v16, 5  ;;  %v2568_v34 = vrot.slane %v2069_v19, 5  ;;  %v1123_v30 = vld [vmem:[#allocation2 + $0x4c] sm:$0xf] }
  0x93   : > { %v2203_v31 = vrot.slane %v2201_v6, 4  ;;  %v2206_v32 = vrot.slane %v2204_v18, 5  ;;  %v2212_v51 = vrot.slane %v2210_v38, 5  ;;  %v2216_v58 = vrot.slane %v2214_v25, 4  ;;  %v6475_v42 = vld [vmem:[#allocation2 + $0x50] sm:$0x1] }
  0x94   : > { %v2222_v40 = vrot.slane %v2220_v4, 5  ;;  %v1306_v17 = vshrl.u32 %v1122_v12, 16  ;;  %v2566_v53 = vsel %vm6059_vm10, %v5131_v7, %v2565_v61  ;;  %v2567_v44 = vrot.slane %v2565_v61, 4  ;;  %v1551_v63 = vld [vmem:[#allocation2 + $0x48] sm:$0xe] }
  0x95   : > { %v2207_v43 = vor.u32 %v2206_v32, %v2203_v31  ;;  %v1309_v62 = vshll.u32 %v1122_v12, 16  ;;  %v2217_v45 = vor.u32 %v2216_v58, %v2212_v51  ;;  %v1315_v8 = vshll.u32 %v1123_v30, 16  ;;  %v1040_v6 = vld [vmem:[#allocation2 + $0x54] sm:$0xf]  ;;  %v1044_v31 = vld [vmem:[#allocation2 + $0x5c] sm:$0x1] }
  0x96   : > { %v1308_v37 = vrot.slane %v1306_v17, 4  ;;  %v1319_v27 = vshrl.u32 %v1123_v30, 16  ;;  %v2569_v41 = vsel %vm6059_vm10, %v2567_v44, %v2568_v34  ;;  %v1325_v20 = vshll.u32 %v6475_v42, 16 }
  0x97   : > { %v2208_v49 = vrot.slane %v2207_v43, 4  ;;  %v1311_v47 = vrot.slane %v1309_v62, 5  ;;  %v2218_v59 = vrot.slane %v2217_v45, 4  ;;  %v5179_v46 = vcombine.low %v2566_v53, %v2569_v41  ;;  %v550_v53 = vld [vmem:[#allocation2 + $0x74] sm:$0x1] }
  0x98   : > { %v1317_v33 = vrot.slane %v1315_v8, 5  ;;  %v1321_v35 = vrot.slane %v1319_v27, 4  ;;  %v1327_v56 = vrot.slane %v1325_v20, 5  ;;  %v780_v11 = vrot.slane %v778_v54, 7  ;;  %v6517_v8 = vld [vmem:[#allocation2 + $0x18] sm:$0xf] }
  0x99   : > { %v2213_v5 = vsel %vm6099_vm12, %v2208_v49, %v2212_v51  ;;  %v1312_v9 = vor.u32 %v1311_v47, %v1308_v37  ;;  %v2223_v12 = vsel %vm6099_vm12, %v2218_v59, %v2222_v40  ;;  %2842 = vrot.lane.b32.xlu1 %v5179_v46, %s5909_s20  ;;  %v788_v19 = vrot.slane %v786_v60, 7  ;;  %v6527_v41 = vld [vmem:[#allocation2 + $0x1c] sm:$0xf]  ;;  %v1047_v47 = vld [vmem:[#allocation2 + $0x60] sm:$0xf] }
  0x9a   : > { %v1322_v16 = vor.u32 %v1321_v35, %v1317_v33  ;;  %v5068_v18 = vrot.slane %v1551_v63, 9  ;;  %v5163_v38 = vcombine.low %v2213_v5, %v2223_v12  ;;  %v783_v4 = vor.u32 %v781_v22, %v780_v11  ;;  %v494_v22 = vld [vmem:[#allocation2 + $0x6c] sm:$0x1] }
  0x9b   : > { %v1313_v25 = vrot.slane %v1312_v9, 4  ;;  %v784_v7 = vrot.slane %v780_v11, 4  ;;  %v791_v54 = vor.u32 %v789_v0, %v788_v19  ;;  %v793_v61 = vrot.slane %v788_v19, 4 }
  0x9c   : > { %v1323_v32 = vrot.slane %v1322_v16, 4  ;;  %v1656_v34 = vrot.slane %v1123_v30, 5  ;;  %2762 = vrot.lane.b32.xlu0 %v5163_v38, %s5910_s27  ;;  %v1041_v51 = vsel %vm6107_vm13, %v783_v4, %v1040_v6  ;;  %v1659_v58 = vrot.slane %v6475_v42, 5 }
  0x9d   : > { %v1318_v60 = vsel %vm6099_vm12, %v1313_v25, %v1317_v33  ;;  %v438_v39 = vmax.f32 %v6454_v3, 0.0  ;;  %v792_v28 = vsel %vm6116_vm14, %v784_v7, %v791_v54  ;;  %1042 = vst [vmem:[#allocation2 + $0x54] sm:$0xf] %v1041_v51  ;;  %v1045_v0 = vsel %vm6018_vm5, %v793_v61, %v1044_v31  ;;  %v1051_v7 = vld [vmem:[#allocation2 + $0x68] sm:$0x1] }
  0x9e   : > { %v1328_v40 = vsel %vm6099_vm12, %v1323_v32, %v1327_v56  ;;  %v6506_v30 = vsel %vm6059_vm10, %v5068_v18, %v1656_v34  ;;  %1043 = vst.msk [vmem:[#allocation2 + $0x58] sm:$0xf] %vm455_vm0, %v792_v28  ;;  %1046 = vst [vmem:[#allocation2 + $0x5c] sm:$0x1] %v1045_v0  ;;  %v1658_v3 = vrot.slane %v1656_v34, 4  ;;  %v795_v43 = vshrl.u32 %v6470_v23, 16 }
  0x9f   : > { %v5100_v17 = vcombine.low %v1318_v60, %v1328_v40  ;;  %v5358_v42 = vpack.c.bf16 %v438_v39, %v438_v39  ;;  %v798_v44 = vshll.u32 %v6470_v23, 16  ;;  %v407_v62 = vadd.f32 %v6437_v50, %v6459_v13 }
  0xa0   : > { %v408_v45 = vadd.f32 %v6437_v50, %v6462_v14  ;;  %v495_v37 = vsel %vm6018_vm5, 0, %v494_v22  ;;  %1926 = vrot.lane.b32.xlu0 %v5115_v52, %s5909_s20  ;;  %v6525_v27 = vsel %vm6059_vm10, %v1658_v3, %v1659_v58  ;;  %v797_v23 = vrot.slane %v795_v43, 7 }
  0xa1   : > { %v803_v49 = vshrl.u32 %v5358_v42, 16  ;;  %v806_v13 = vshll.u32 %v5358_v42, 16  ;;  %496 = vst [vmem:[#allocation2 + $0x6c] sm:$0x1] %v495_v37  ;;  %v5116_v14 = vcombine.low %v6506_v30, %v6525_v27  ;;  %v439_v20 = vmax.f32 %v407_v62, 0.0 }
  0xa2   : > { %v440_v63 = vmax.f32 %v408_v45, 0.0  ;;  %v551_v55 = vsel %vm6011_vm4, 0, %v550_v53  ;;  %v800_v48 = vor.u32 %v798_v44, %v797_v23  ;;  %v801_v52 = vrot.slane %v797_v23, 4 }
  0xa3   : > { %v805_v59 = vrot.slane %v803_v49, 7  ;;  %552 = vst [vmem:[#allocation2 + $0x74] sm:$0x1] %v551_v55  ;;  %v3401_v46 = vshrl.u32 %v6517_v8, 16  ;;  %v6534_v33 = vpack.c.bf16 %v439_v20, %v439_v20  ;;  %v3404_v5 = vshll.u32 %v6517_v8, 16 }
  0xa4   : > { %v6536_v35 = vpack.c.bf16 %v440_v63, %v440_v63  ;;  %v3410_v9 = vshll.u32 %v6527_v41, 16  ;;  %1848 = vrot.lane.b32.xlu0 %v5100_v17, %s5910_s27  ;;  %v2044_v56 = vld [vmem:[#allocation2 + $0x54] sm:$0xf]  ;;  %v1048_v19 = vsel %vm6107_vm13, %v800_v48, %v1047_v47  ;;  %v6547_v31 = vadd.f32 %v6437_v50, %v6465_v15  ;;  %v497_v8 = vld [vmem:[#allocation2 + $0x78] sm:$0x1] }
  0xa5   : > { %v1124_v11 = vld [vmem:[#allocation2 + $0x54] sm:$0xf]  ;;  %v808_v12 = vor.u32 %v806_v13, %v805_v59  ;;  %v810_v16 = vrot.slane %v805_v59, 4  ;;  %v6543_v6 = vrot.slane %v3401_v46, 4  ;;  %v2045_v18 = vld [vmem:[#allocation2 + $0x58] sm:$0xf]  ;;  %v6551_v32 = vadd.f32 %v6437_v50, %v6468_v57 }
  0xa6   : > { %v2070_v38 = vld [vmem:[#allocation2 + $0x5c] sm:$0x1]  ;;  %v2225_v25 = vshrl.u32 %v2044_v56, 16  ;;  %v2228_v4 = vshll.u32 %v2044_v56, 16  ;;  %1049 = vst [vmem:[#allocation2 + $0x60] sm:$0xf] %v1048_v19 }
  0xa7   : > { %v2234_v54 = vshll.u32 %v2045_v18, 16  ;;  %v2238_v61 = vshrl.u32 %v2045_v18, 16  ;;  %v2244_v34 = vshll.u32 %v2070_v38, 16  ;;  %v1125_v60 = vld [vmem:[#allocation2 + $0x58] sm:$0xf]  ;;  %v1330_v51 = vshrl.u32 %v1124_v11, 16 }
  0xa8   : > { %v2227_v58 = vrot.slane %v2225_v25, 4  ;;  %v2230_v39 = vrot.slane %v2228_v4, 5  ;;  %v6553_v22 = vld [vmem:[#allocation2 + $0x5c] sm:$0x1]  ;;  %v1333_v40 = vshll.u32 %v1124_v11, 16  ;;  %v1339_v28 = vshll.u32 %v1125_v60, 16 }
  0xa9   : > { %v2236_v0 = vrot.slane %v2234_v54, 5  ;;  %v2240_v17 = vrot.slane %v2238_v61, 4  ;;  %v2246_v3 = vrot.slane %v2244_v34, 5  ;;  %v1332_v15 = vrot.slane %v1330_v51, 4  ;;  %v2470_v42 = vld [vmem:[#allocation2 + $0x54] sm:$0xe] }
  0xaa   : > { %v2231_v43 = vor.u32 %v2230_v39, %v2227_v58  ;;  %v1335_v53 = vrot.slane %v1333_v40, 5  ;;  %v1341_v57 = vrot.slane %v1339_v28, 5  ;;  %v1343_v44 = vshrl.u32 %v1125_v60, 16  ;;  %v1552_v19 = vld [vmem:[#allocation2 + $0x54] sm:$0xe] }
  0xab   : > { %v2241_v62 = vor.u32 %v2240_v17, %v2236_v0  ;;  %v1349_v45 = vshll.u32 %v6553_v22, 16  ;;  %v809_v37 = vsel %vm6116_vm14, %v801_v52, %v808_v12  ;;  %v1052_v23 = vsel %vm6018_vm5, %v810_v16, %v1051_v7 }
  0xac   : > { %v2232_v49 = vrot.slane %v2231_v43, 4  ;;  %v1336_v13 = vor.u32 %v1335_v53, %v1332_v15  ;;  %v1345_v47 = vrot.slane %v1343_v44, 4  ;;  %1050 = vst.msk [vmem:[#allocation2 + $0x64] sm:$0xf] %vm455_vm0, %v809_v37  ;;  %1053 = vst [vmem:[#allocation2 + $0x68] sm:$0x1] %v1052_v23 }
  0xad   : > { %v5132_v20 = vrot.slane %v2470_v42, 9  ;;  %v2242_v63 = vrot.slane %v2241_v62, 4  ;;  %v1351_v55 = vrot.slane %v1349_v45, 5  ;;  %v2046_v48 = vld [vmem:[#allocation2 + $0x60] sm:$0xf]  ;;  %v2572_v59 = vrot.slane %v2045_v18, 5 }
  0xae   : > { %v2575_v46 = vrot.slane %v2070_v38, 5  ;;  %v2237_v56 = vsel %vm6099_vm12, %v2232_v49, %v2236_v0  ;;  %v1337_v11 = vrot.slane %v1336_v13, 4  ;;  %v1346_v52 = vor.u32 %v1345_v47, %v1341_v57  ;;  %v2471_v54 = vld [vmem:[#allocation2 + $0x60] sm:$0xe] }
  0xaf   : > { %v2249_v12 = vshrl.u32 %v2046_v48, 16  ;;  %v2247_v16 = vsel %vm6099_vm12, %v2242_v63, %v2246_v3  ;;  %v2252_v25 = vshll.u32 %v2046_v48, 16  ;;  %v2573_v4 = vsel %vm6059_vm10, %v5132_v20, %v2572_v59 }
  0xb0   : > { %v2574_v7 = vrot.slane %v2572_v59, 4  ;;  %v5164_v61 = vcombine.low %v2237_v56, %v2247_v16  ;;  %v1342_v18 = vsel %vm6099_vm12, %v1337_v11, %v1341_v57  ;;  %v1347_v38 = vrot.slane %v1346_v52, 4 }
  0xb1   : > { %v2251_v34 = vrot.slane %v2249_v12, 4  ;;  %v2254_v51 = vrot.slane %v2252_v25, 5  ;;  %v5069_v39 = vrot.slane %v1552_v19, 9  ;;  %v1663_v40 = vrot.slane %v1125_v60, 5  ;;  %v6598_v12 = vld [vmem:[#allocation2 + $0x20] sm:$0x1] }
  0xb2   : > { %v2576_v58 = vsel %vm6059_vm10, %v2574_v7, %v2575_v46  ;;  %2764 = vrot.lane.b32.xlu1 %v5164_v61, %s5910_s27  ;;  %v1352_v28 = vsel %vm6099_vm12, %v1347_v38, %v1351_v55  ;;  %v1666_v17 = vrot.slane %v6553_v22, 5  ;;  %v5133_v3 = vrot.slane %v2471_v54, 9 }
  0xb3   : > { %v5180_v0 = vcombine.low %v2573_v4, %v2576_v58  ;;  %v5101_v15 = vcombine.low %v1342_v18, %v1352_v28  ;;  %v2047_v42 = vld [vmem:[#allocation2 + $0x64] sm:$0xf]  ;;  %v2071_v43 = vld [vmem:[#allocation2 + $0x68] sm:$0x1]  ;;  %v2255_v53 = vor.u32 %v2254_v51, %v2251_v34  ;;  %v6577_v57 = vsel %vm6059_vm10, %v5069_v39, %v1663_v40  ;;  %v1058_v18 = vld [vmem:[#allocation2 + $0x74] sm:$0x1] }
  0xb4   : > { %v1665_v44 = vrot.slane %v1663_v40, 4  ;;  %v2258_v62 = vshll.u32 %v2047_v42, 16  ;;  %v2262_v60 = vshrl.u32 %v2047_v42, 16  ;;  %v2268_v45 = vshll.u32 %v2071_v43, 16  ;;  %v3354_v28 = vld [vmem:[#allocation2 + $0x24] sm:$0xf] }
  0xb5   : > { %v2579_v37 = vrot.slane %v2047_v42, 5  ;;  %1850 = vrot.lane.b32.xlu0 %v5101_v15, %s5910_s27  ;;  %v2256_v23 = vrot.slane %v2255_v53, 4  ;;  %v2582_v49 = vrot.slane %v2071_v43, 5  ;;  %v812_v13 = vshrl.u32 %v6534_v33, 16 }
  0xb6   : > { %v6582_v22 = vsel %vm6059_vm10, %v1665_v44, %v1666_v17  ;;  %1928 = vrot.lane.b32.xlu1 %v5116_v14, %s5909_s20  ;;  %v2260_v47 = vrot.slane %v2258_v62, 5  ;;  %v2264_v20 = vrot.slane %v2262_v60, 4  ;;  %v2270_v63 = vrot.slane %v2268_v45, 5  ;;  %v1054_v14 = vld [vmem:[#allocation2 + $0x6c] sm:$0xf] }
  0xb7   : > { %v5117_v55 = vcombine.low %v6577_v57, %v6582_v22  ;;  %v2580_v48 = vsel %vm6059_vm10, %v5133_v3, %v2579_v37  ;;  %v2581_v59 = vrot.slane %v2579_v37, 4  ;;  %v814_v46 = vrot.slane %v812_v13, 7  ;;  %v334_v13 = vld [vmem:[%s6039_s15 + $0xa8] sm:$0xff] }
  0xb8   : > { %v815_v56 = vshll.u32 %v6534_v33, 16  ;;  %v2261_v11 = vsel %vm6099_vm12, %v2256_v23, %v2260_v47  ;;  %v2265_v52 = vor.u32 %v2264_v20, %v2260_v47  ;;  %v820_v30 = vshrl.u32 %v6536_v35, 16 }
  0xb9   : > { %v823_v27 = vshll.u32 %v6536_v35, 16  ;;  %v2583_v19 = vsel %vm6059_vm10, %v2581_v59, %v2582_v49  ;;  %v818_v25 = vrot.slane %v814_v46, 4  ;;  %v3406_v4 = vrot.slane %v3404_v5, 5 }
  0xba   : > { %v817_v16 = vor.u32 %v815_v56, %v814_v46  ;;  %v2266_v33 = vrot.slane %v2265_v52, 4  ;;  %2844 = vrot.lane.b32.xlu1 %v5180_v0, %s5909_s20  ;;  %v5181_v7 = vcombine.low %v2580_v48, %v2583_v19  ;;  %v822_v54 = vrot.slane %v820_v30, 7 }
  0xbb   : > { %v3412_v61 = vrot.slane %v3410_v9, 5  ;;  %v3407_v38 = vor.u32 %v3406_v4, %v6543_v6  ;;  %v3414_v34 = vshrl.u32 %v6527_v41, 16  ;;  %v3420_v51 = vshll.u32 %v6598_v12, 16  ;;  %v553_v9 = vld [vmem:[#allocation2 + $0x80] sm:$0x1] }
  0xbc   : > { %v1055_v35 = vsel %vm6107_vm13, %v817_v16, %v1054_v14  ;;  %v2271_v5 = vsel %vm6099_vm12, %v2266_v33, %v2270_v63  ;;  %v825_v58 = vor.u32 %v823_v27, %v822_v54  ;;  %v827_v39 = vrot.slane %v822_v54, 4  ;;  %v6615_v6 = vld [vmem:[#allocation2 + $0x28] sm:$0xf] }
  0xbd   : > { %1056 = vst [vmem:[#allocation2 + $0x6c] sm:$0xf] %v1055_v35  ;;  %v441_v40 = vmax.f32 %v6547_v31, 0.0  ;;  %v5165_v0 = vcombine.low %v2261_v11, %v2271_v5  ;;  %v3408_v17 = vrot.slane %v3407_v38, 4  ;;  %v3416_v3 = vrot.slane %v3414_v34, 4 }
  0xbe   : > { %v3422_v15 = vrot.slane %v3420_v51, 5  ;;  %2846 = vrot.lane.b32.xlu1 %v5181_v7, %s5909_s20  ;;  %v826_v42 = vsel %vm6116_vm14, %v818_v25, %v825_v58  ;;  %v1059_v43 = vsel %vm6018_vm5, %v827_v39, %v1058_v18  ;;  %v442_v53 = vmax.f32 %v6551_v32, 0.0 }
  0xbf   : > { %v498_v31 = vsel %vm6018_vm5, 0, %v497_v8  ;;  %2766 = vrot.lane.b32.xlu0 %v5165_v0, %s5910_s27  ;;  %1057 = vst.msk [vmem:[#allocation2 + $0x70] sm:$0xf] %vm455_vm0, %v826_v42  ;;  %1060 = vst [vmem:[#allocation2 + $0x74] sm:$0x1] %v1059_v43  ;;  %v3413_v44 = vsel %vm6099_vm12, %v3408_v17, %v3412_v61  ;;  %v3417_v62 = vor.u32 %v3416_v3, %v3412_v61  ;;  %v554_v60 = vsel %vm6011_vm4, 0, %v553_v9 }
  0xc0   : > { %499 = vst [vmem:[#allocation2 + $0x78] sm:$0x1] %v498_v31  ;;  %v5361_v45 = vpack.c.bf16 %v441_v40, %v441_v40  ;;  %555 = vst [vmem:[#allocation2 + $0x80] sm:$0x1] %v554_v60  ;;  %v5362_v37 = vpack.c.bf16 %v442_v53, %v442_v53  ;;  %v3425_v32 = vshrl.u32 %v3354_v28, 16  ;;  %v3428_v23 = vshll.u32 %v3354_v28, 16 }
  0xc1   : > { %v3434_v49 = vshll.u32 %v6615_v6, 16  ;;  %v3418_v47 = vrot.slane %v3417_v62, 4  ;;  %v3438_v48 = vshrl.u32 %v6615_v6, 16  ;;  %v6643_v16 = vmul.f32 %v6397_v36, %v334_v13  ;;  %v3784_v31 = vld [vmem:[#allocation2 + $0x18] sm:$0xe] }
  0xc2   : > { %v829_v20 = vshrl.u32 %v5361_v45, 16  ;;  %v832_v63 = vshll.u32 %v5361_v45, 16  ;;  %v837_v59 = vshrl.u32 %v5362_v37, 16  ;;  %v840_v46 = vshll.u32 %v5362_v37, 16 }
  0xc3   : > { %v3427_v56 = vrot.slane %v3425_v32, 4  ;;  %v3430_v11 = vrot.slane %v3428_v23, 5  ;;  %1930 = vrot.lane.b32.xlu0 %v5117_v55, %s5909_s20  ;;  %v3423_v30 = vsel %vm6099_vm12, %v3418_v47, %v3422_v15  ;;  %v6640_v19 = vrot.slane %v3434_v49, 5  ;;  %v6654_v15 = vld [vmem:[#allocation2 + $0x2c] sm:$0x1] }
  0xc4   : > { %v2048_v52 = vld [vmem:[#allocation2 + $0x6c] sm:$0xf]  ;;  %v831_v27 = vrot.slane %v829_v20, 7  ;;  %v5256_v33 = vcombine.low %v3413_v44, %v3423_v30  ;;  %v839_v7 = vrot.slane %v837_v59, 7  ;;  %v6648_v51 = vadd.f32 %v6437_v50, %v6473_v24  ;;  %v3785_v59 = vld [vmem:[#allocation2 + $0x24] sm:$0xe] }
  0xc5   : > { %v2472_v14 = vld [vmem:[#allocation2 + $0x6c] sm:$0xe]  ;;  %v2273_v25 = vshrl.u32 %v2048_v52, 16  ;;  %v2276_v4 = vshll.u32 %v2048_v52, 16  ;;  %v3431_v57 = vor.u32 %v3430_v11, %v3427_v56  ;;  %v3440_v23 = vrot.slane %v3438_v48, 4  ;;  %v335_v52 = vld [vmem:[%s6039_s15 + $0xb0] sm:$0xff] }
  0xc6   : > { %v834_v54 = vor.u32 %v832_v63, %v831_v27  ;;  %v835_v61 = vrot.slane %v831_v27, 4  ;;  %v5134_v35 = vrot.slane %v2472_v14, 9  ;;  %v2049_v22 = vld [vmem:[#allocation2 + $0x70] sm:$0xf]  ;;  %v2072_v55 = vld [vmem:[#allocation2 + $0x74] sm:$0x1]  ;;  %4072 = vrot.lane.b32.xlu1 %v5256_v33, %s5910_s27  ;;  %v842_v34 = vor.u32 %v840_v46, %v839_v7 }
  0xc7   : > { %v2275_v18 = vrot.slane %v2273_v25, 4  ;;  %v2278_v38 = vrot.slane %v2276_v4, 5  ;;  %v2282_v8 = vshll.u32 %v2049_v22, 16  ;;  %v2286_v5 = vshrl.u32 %v2049_v22, 16  ;;  %v1061_v40 = vld [vmem:[#allocation2 + $0x78] sm:$0xf] }
  0xc8   : > { %v2292_v58 = vshll.u32 %v2072_v55, 16  ;;  %v844_v39 = vrot.slane %v839_v7, 4  ;;  %v843_v28 = vsel %vm6116_vm14, %v835_v61, %v842_v34  ;;  %v1062_v0 = vsel %vm6107_vm13, %v834_v54, %v1061_v40  ;;  %v1065_v17 = vld [vmem:[#allocation2 + $0x80] sm:$0x1] }
  0xc9   : > { %v2279_v9 = vor.u32 %v2278_v38, %v2275_v18  ;;  %v2586_v3 = vrot.slane %v2049_v22, 5  ;;  %v2284_v42 = vrot.slane %v2282_v8, 5  ;;  %v2288_v43 = vrot.slane %v2286_v5, 4  ;;  %1063 = vst [vmem:[#allocation2 + $0x78] sm:$0xf] %v1062_v0 }
  0xca   : > { %v2294_v24 = vrot.slane %v2292_v58, 5  ;;  %1064 = vst.msk [vmem:[#allocation2 + $0x7c] sm:$0xf] %vm455_vm0, %v843_v28  ;;  %v1066_v53 = vsel %vm6018_vm5, %v844_v39, %v1065_v17  ;;  %v2589_v45 = vrot.slane %v2072_v55, 5  ;;  %v3432_v32 = vrot.slane %v3431_v57, 4 }
  0xcb   : > { %v2280_v44 = vrot.slane %v2279_v9, 4  ;;  %1067 = vst [vmem:[#allocation2 + $0x80] sm:$0x1] %v1066_v53  ;;  %v2587_v62 = vsel %vm6059_vm10, %v5134_v35, %v2586_v3  ;;  %v2588_v60 = vrot.slane %v2586_v3, 4  ;;  %v2289_v37 = vor.u32 %v2288_v43, %v2284_v42  ;;  %v500_v43 = vld [vmem:[#allocation2 + $0x84] sm:$0x1] }
  0xcc   : > { %v3444_v49 = vshll.u32 %v6654_v15, 16  ;;  %v5224_v20 = vrot.slane %v3784_v31, 9  ;;  %v3850_v63 = vrot.slane %v6527_v41, 5  ;;  %v3437_v11 = vsel %vm6099_vm12, %v3432_v32, %v6640_v19 }
  0xcd   : > { %v2285_v13 = vsel %vm6099_vm12, %v2280_v44, %v2284_v42  ;;  %v2590_v47 = vsel %vm6059_vm10, %v2588_v60, %v2589_v45  ;;  %v2290_v46 = vrot.slane %v2289_v37, 4  ;;  %v3441_v48 = vor.u32 %v3440_v23, %v6640_v19 }
  0xce   : > { %v5182_v56 = vcombine.low %v2587_v62, %v2590_v47  ;;  %v3446_v30 = vrot.slane %v3444_v49, 5  ;;  %v3851_v27 = vsel %vm6059_vm10, %v5224_v20, %v3850_v63  ;;  %v3852_v14 = vrot.slane %v3850_v63, 4  ;;  %v556_v62 = vld [vmem:[#allocation2 + $0x8c] sm:$0x1] }
  0xcf   : > { %v3853_v25 = vrot.slane %v6598_v12, 5  ;;  %v2295_v41 = vsel %vm6099_vm12, %v2290_v46, %v2294_v24  ;;  %v3442_v4 = vrot.slane %v3441_v48, 4  ;;  %v5225_v33 = vrot.slane %v3785_v59, 9  ;;  %v3356_v46 = vld [vmem:[#allocation2 + $0x30] sm:$0xf] }
  0xd0   : > { %2848 = vrot.lane.b32.xlu1 %v5182_v56, %s5909_s20  ;;  %v3857_v7 = vrot.slane %v6615_v6, 5  ;;  %v5166_v54 = vcombine.low %v2285_v13, %v2295_v41  ;;  %v2050_v61 = vld [vmem:[#allocation2 + $0x78] sm:$0xf]  ;;  %v412_v22 = vadd.f32 %v6437_v50, %v6643_v16  ;;  %v6684_v12 = vmul.f32 %v6397_v36, %v335_v52 }
  0xd1   : > { %v2051_v19 = vld [vmem:[#allocation2 + $0x7c] sm:$0xf]  ;;  %v3854_v35 = vsel %vm6059_vm10, %v3852_v14, %v3853_v25  ;;  %v2473_v57 = vld [vmem:[#allocation2 + $0x78] sm:$0xe]  ;;  %v2297_v18 = vshrl.u32 %v2050_v61, 16  ;;  %v2300_v38 = vshll.u32 %v2050_v61, 16  ;;  %v3447_v5 = vsel %vm6099_vm12, %v3442_v4, %v3446_v30 }
  0xd2   : > { %v2073_v55 = vld [vmem:[#allocation2 + $0x80] sm:$0x1]  ;;  %v2306_v34 = vshll.u32 %v2051_v19, 16  ;;  %v2310_v8 = vshrl.u32 %v2051_v19, 16  ;;  %2768 = vrot.lane.b32.xlu0 %v5166_v54, %s5910_s27  ;;  %v5272_v58 = vcombine.low %v3851_v27, %v3854_v35  ;;  %v5135_v39 = vrot.slane %v2473_v57, 9 }
  0xd3   : > { %v2316_v6 = vshll.u32 %v2073_v55, 16  ;;  %v2299_v40 = vrot.slane %v2297_v18, 4  ;;  %v2302_v9 = vrot.slane %v2300_v38, 5  ;;  %v5257_v17 = vcombine.low %v3437_v11, %v3447_v5  ;;  %v6716_v30 = vld [vmem:[#allocation2 + $0x38] sm:$0x1] }
  0xd4   : > { %v2308_v28 = vrot.slane %v2306_v34, 5  ;;  %v2312_v16 = vrot.slane %v2310_v8, 4  ;;  %4152 = vrot.lane.b32.xlu1 %v5272_v58, %s5909_s20  ;;  %v2593_v3 = vrot.slane %v2051_v19, 5  ;;  %v2596_v42 = vrot.slane %v2073_v55, 5  ;;  %v503_v8 = vld [vmem:[#allocation2 + $0x90] sm:$0x1] }
  0xd5   : > { %v2318_v0 = vrot.slane %v2316_v6, 5  ;;  %v2303_v24 = vor.u32 %v2302_v9, %v2299_v40  ;;  %v3858_v31 = vsel %vm6059_vm10, %v5225_v33, %v3857_v7  ;;  %v3859_v44 = vrot.slane %v3857_v7, 4 }
  0xd6   : > { %v2313_v53 = vor.u32 %v2312_v16, %v2308_v28  ;;  %v6694_v60 = vsel %vm6059_vm10, %v5135_v39, %v2593_v3  ;;  %v2595_v45 = vrot.slane %v2593_v3, 4  ;;  %v3860_v37 = vrot.slane %v6654_v15, 5  ;;  %v559_v3 = vld [vmem:[#allocation2 + $0x98] sm:$0x1] }
  0xd7   : > { %v443_v32 = vmax.f32 %v6648_v51, 0.0  ;;  %v2304_v23 = vrot.slane %v2303_v24, 4  ;;  %v444_v13 = vmax.f32 %v412_v22, 0.0  ;;  %v501_v47 = vsel %vm6018_vm5, 0, %v500_v43  ;;  %v6708_v51 = vld [vmem:[#allocation2 + $0x34] sm:$0xf] }
  0xd8   : > { %v2314_v49 = vrot.slane %v2313_v53, 4  ;;  %v6702_v20 = vsel %vm6059_vm10, %v2595_v45, %v2596_v42  ;;  %v3861_v63 = vsel %vm6059_vm10, %v3859_v44, %v3860_v37  ;;  %502 = vst [vmem:[#allocation2 + $0x84] sm:$0x1] %v501_v47  ;;  %v557_v59 = vsel %vm6011_vm4, 0, %v556_v62  ;;  %v336_v22 = vld [vmem:[%s6039_s15 + $0xb8] sm:$0xff] }
  0xd9   : > { %v5363_v15 = vpack.c.bf16 %v443_v32, %v443_v32  ;;  %v2309_v56 = vsel %vm6099_vm12, %v2304_v23, %v2308_v28  ;;  %v5183_v48 = vcombine.low %v6694_v60, %v6702_v20  ;;  %v5273_v52 = vcombine.low %v3858_v31, %v3861_v63  ;;  %558 = vst [vmem:[#allocation2 + $0x8c] sm:$0x1] %v557_v59  ;;  %v3358_v42 = vld [vmem:[#allocation2 + $0x3c] sm:$0xf]  ;;  %v6746_v63 = vld [vmem:[#allocation2 + $0x44] sm:$0x1] }
  0xda   : > { %v2319_v11 = vsel %vm6099_vm12, %v2314_v49, %v2318_v0  ;;  %v5364_v14 = vpack.c.bf16 %v444_v13, %v444_v13  ;;  %v3449_v4 = vshrl.u32 %v3356_v46, 16  ;;  %v3452_v33 = vshll.u32 %v3356_v46, 16  ;;  %v6748_v59 = vld [vmem:[#allocation2 + $0x30] sm:$0xe] }
  0xdb   : > { %v5167_v27 = vcombine.low %v2309_v56, %v2319_v11  ;;  %v846_v25 = vshrl.u32 %v5363_v15, 16  ;;  %v849_v41 = vshll.u32 %v5363_v15, 16  ;;  %4154 = vrot.lane.b32.xlu1 %v5273_v52, %s5909_s20  ;;  %v3458_v7 = vshll.u32 %v6708_v51, 16 }
  0xdc   : > { %v3462_v54 = vshrl.u32 %v6708_v51, 16  ;;  %v854_v19 = vshrl.u32 %v5364_v14, 16  ;;  %v857_v35 = vshll.u32 %v5364_v14, 16  ;;  %v3468_v57 = vshll.u32 %v6716_v30, 16 }
  0xdd   : > { %2770 = vrot.lane.b32.xlu0 %v5167_v27, %s5910_s27  ;;  %v848_v61 = vrot.slane %v846_v25, 7  ;;  %v3451_v55 = vrot.slane %v3449_v4, 4  ;;  %v3454_v18 = vrot.slane %v3452_v33, 5  ;;  %v3460_v38 = vrot.slane %v3458_v7, 5  ;;  %v338_v4 = vld [vmem:[%s6039_s15 + $0xc8] sm:$0xff]  ;;  %v339_v33 = vld [vmem:[%s6039_s15 + $0xd0] sm:$0xff] }
  0xde   : > { %v3464_v34 = vrot.slane %v3462_v54, 4  ;;  %v856_v58 = vrot.slane %v854_v19, 7  ;;  %v3470_v39 = vrot.slane %v3468_v57, 5  ;;  %v375_v16 = vmul.f32 %v6397_v36, %v336_v22 }
  0xdf   : > { %v851_v6 = vor.u32 %v849_v41, %v848_v61  ;;  %v852_v5 = vrot.slane %v848_v61, 4  ;;  %v1068_v40 = vld [vmem:[#allocation2 + $0x84] sm:$0xf]  ;;  %v3455_v9 = vor.u32 %v3454_v18, %v3451_v55  ;;  %v413_v0 = vadd.f32 %v6437_v50, %v6684_v12  ;;  %v6733_v12 = vld [vmem:[#allocation2 + $0x40] sm:$0xf] }
  0xe0   : > { %v3465_v28 = vor.u32 %v3464_v34, %v3460_v38  ;;  %v859_v43 = vor.u32 %v857_v35, %v856_v58  ;;  %v861_v24 = vrot.slane %v856_v58, 4  ;;  %v1072_v31 = vld [vmem:[#allocation2 + $0x8c] sm:$0x1]  ;;  %v504_v44 = vsel %vm6018_vm5, 0, %v503_v8  ;;  %v337_v41 = vld [vmem:[%s6039_s15 + $0xc0] sm:$0xff] }
  0xe1   : > { %4074 = vrot.lane.b32.xlu0 %v5257_v17, %s5910_s27  ;;  %v1069_v53 = vsel %vm6107_vm13, %v851_v6, %v1068_v40  ;;  %v3456_v62 = vrot.slane %v3455_v9, 4  ;;  %v414_v36 = vadd.f32 %v6437_v50, %v375_v16  ;;  %v445_v45 = vmax.f32 %v413_v0, 0.0  ;;  %505 = vst [vmem:[#allocation2 + $0x90] sm:$0x1] %v504_v44  ;;  %v6764_v34 = vld [vmem:[%s8078_s1] ss:$0 sm:$0xff] }
  0xe2   : > { %1070 = vst [vmem:[#allocation2 + $0x84] sm:$0xf] %v1069_v53  ;;  %v3466_v60 = vrot.slane %v3465_v28, 4  ;;  %v860_v17 = vsel %vm6116_vm14, %v852_v5, %v859_v43  ;;  %v1073_v37 = vsel %vm6018_vm5, %v861_v24, %v1072_v31  ;;  %v560_v32 = vsel %vm6011_vm4, 0, %v559_v3 }
  0xe3   : > { %v3473_v23 = vshrl.u32 %v3358_v42, 16  ;;  %1071 = vst.msk [vmem:[#allocation2 + $0x88] sm:$0xf] %vm455_vm0, %v860_v17  ;;  %1074 = vst [vmem:[#allocation2 + $0x8c] sm:$0x1] %v1073_v37  ;;  %v3461_v49 = vsel %vm6099_vm12, %v3456_v62, %v3460_v38  ;;  %v446_v47 = vmax.f32 %v414_v36, 0.0  ;;  %v5365_v20 = vpack.c.bf16 %v445_v45, %v445_v45 }
  0xe4   : > { %v3471_v13 = vsel %vm6099_vm12, %v3466_v60, %v3470_v39  ;;  %561 = vst [vmem:[#allocation2 + $0x98] sm:$0x1] %v560_v32  ;;  %v3476_v56 = vshll.u32 %v3358_v42, 16  ;;  %v3482_v11 = vshll.u32 %v6733_v12, 16  ;;  %v3486_v25 = vshrl.u32 %v6733_v12, 16 }
  0xe5   : > { %2850 = vrot.lane.b32.xlu0 %v5183_v48, %s5909_s20  ;;  %v5258_v15 = vcombine.low %v3461_v49, %v3471_v13  ;;  %v3475_v46 = vrot.slane %v3473_v23, 4  ;;  %v5366_v52 = vpack.c.bf16 %v446_v47, %v446_v47  ;;  %v863_v27 = vshrl.u32 %v5365_v20, 16 }
  0xe6   : > { %v866_v14 = vshll.u32 %v5365_v20, 16  ;;  %v3478_v7 = vrot.slane %v3476_v56, 5  ;;  %v6757_v54 = vrot.slane %v3482_v11, 5  ;;  %v3492_v48 = vshll.u32 %v6746_v63, 16 }
  0xe7   : > { %4076 = vrot.lane.b32.xlu1 %v5258_v15, %s5910_s27  ;;  %v5226_v61 = vrot.slane %v6748_v59, 9  ;;  %v865_v19 = vrot.slane %v863_v27, 7  ;;  %v871_v35 = vshrl.u32 %v5366_v52, 16  ;;  %v874_v57 = vshll.u32 %v5366_v52, 16 }
  0xe8   : > { %v3488_v22 = vrot.slane %v3486_v25, 4  ;;  %v3479_v38 = vor.u32 %v3478_v7, %v3475_v46  ;;  %v376_v8 = vmul.f32 %v6764_v34, %v337_v41  ;;  %v377_v6 = vmul.f32 %v6764_v34, %v338_v4  ;;  %v1075_v28 = vld [vmem:[#allocation2 + $0x90] sm:$0xf]  ;;  %v3787_v41 = vld [vmem:[#allocation2 + $0x3c] sm:$0xe] }
  0xe9   : > { %v2052_v55 = vld [vmem:[#allocation2 + $0x84] sm:$0xf]  ;;  %v6769_v5 = vmul.f32 %v6764_v34, %v339_v33  ;;  %v868_v40 = vor.u32 %v866_v14, %v865_v19  ;;  %v869_v9 = vrot.slane %v865_v19, 4  ;;  %v873_v3 = vrot.slane %v871_v35, 7 }
  0xea   : > { %v2474_v18 = vld [vmem:[#allocation2 + $0x84] sm:$0xe]  ;;  %v2321_v58 = vshrl.u32 %v2052_v55, 16  ;;  %v2324_v39 = vshll.u32 %v2052_v55, 16  ;;  %v2053_v16 = vld [vmem:[#allocation2 + $0x88] sm:$0xf]  ;;  %v3489_v43 = vor.u32 %v3488_v22, %v6757_v54  ;;  %v6773_v24 = vadd.f32 %v6437_v50, %v376_v8 }
  0xeb   : > { %v2074_v0 = vld [vmem:[#allocation2 + $0x8c] sm:$0x1]  ;;  %v5136_v42 = vrot.slane %v2474_v18, 9  ;;  %v2330_v44 = vshll.u32 %v2053_v16, 16  ;;  %v2334_v62 = vshrl.u32 %v2053_v16, 16  ;;  %v876_v45 = vor.u32 %v874_v57, %v873_v3 }
  0xec   : > { %v2323_v53 = vrot.slane %v2321_v58, 4  ;;  %v2326_v31 = vrot.slane %v2324_v39, 5  ;;  %v1079_v60 = vld [vmem:[#allocation2 + $0x98] sm:$0x1]  ;;  %v2340_v36 = vshll.u32 %v2074_v0, 16  ;;  %v878_v17 = vrot.slane %v873_v3, 4 }
  0xed   : > { %v1076_v37 = vsel %vm6107_vm13, %v868_v40, %v1075_v28  ;;  %v2332_v23 = vrot.slane %v2330_v44, 5  ;;  %v2336_v49 = vrot.slane %v2334_v62, 4  ;;  %v2600_v13 = vrot.slane %v2053_v16, 5 }
  0xee   : > { %v2327_v32 = vor.u32 %v2326_v31, %v2323_v53  ;;  %1077 = vst [vmem:[#allocation2 + $0x90] sm:$0xf] %v1076_v37  ;;  %v2342_v47 = vrot.slane %v2340_v36, 5  ;;  %v877_v50 = vsel %vm6116_vm14, %v869_v9, %v876_v45  ;;  %v1080_v20 = vsel %vm6018_vm5, %v878_v17, %v1079_v60  ;;  %v506_v60 = vld [vmem:[#allocation2 + $0x9c] sm:$0x1] }
  0xef   : > { %v2603_v59 = vrot.slane %v2074_v0, 5  ;;  %v2337_v46 = vor.u32 %v2336_v49, %v2332_v23  ;;  %1078 = vst.msk [vmem:[#allocation2 + $0x94] sm:$0xf] %vm455_vm0, %v877_v50  ;;  %1081 = vst [vmem:[#allocation2 + $0x98] sm:$0x1] %v1080_v20  ;;  %v2601_v56 = vsel %vm6059_vm10, %v5136_v42, %v2600_v13  ;;  %v2602_v11 = vrot.slane %v2600_v13, 4 }
  0xf0   : > { %v2328_v15 = vrot.slane %v2327_v32, 4  ;;  %v3480_v52 = vrot.slane %v3479_v38, 4  ;;  %v3490_v27 = vrot.slane %v3489_v43, 4  ;;  %v3494_v14 = vrot.slane %v3492_v48, 5  ;;  %v562_v32 = vld [vmem:[#allocation2 + $0xa4] sm:$0x1] }
  0xf1   : > { %v3864_v25 = vrot.slane %v6708_v51, 5  ;;  %v2338_v33 = vrot.slane %v2337_v46, 4  ;;  %v2604_v7 = vsel %vm6059_vm10, %v2602_v11, %v2603_v59  ;;  %v3867_v19 = vrot.slane %v6716_v30, 5  ;;  %v3360_v50 = vld [vmem:[#allocation2 + $0x48] sm:$0xf] }
  0xf2   : > { %v2333_v4 = vsel %vm6099_vm12, %v2328_v15, %v2332_v23  ;;  %v5184_v35 = vcombine.low %v2601_v56, %v2604_v7  ;;  %v3485_v57 = vsel %vm6099_vm12, %v3480_v52, %v6757_v54  ;;  %v3495_v48 = vsel %vm6099_vm12, %v3490_v27, %v3494_v14 }
  0xf3   : > { %v3865_v51 = vsel %vm6059_vm10, %v5226_v61, %v3864_v25  ;;  %v2343_v22 = vsel %vm6099_vm12, %v2338_v33, %v2342_v47  ;;  %v6799_v55 = vcombine.low %v3485_v57, %v3495_v48  ;;  %v3866_v18 = vrot.slane %v3864_v25, 4  ;;  %v6807_v61 = vld [vmem:[%s8079_s2] ss:$0 sm:$0xff]  ;;  %v340_v57 = vld [vmem:[%s6039_s15 + $0xd8] sm:$0xff] }
  0xf4   : > { %v5227_v38 = vrot.slane %v3787_v41, 9  ;;  %v5168_v8 = vcombine.low %v2333_v4, %v2343_v22  ;;  %2852 = vrot.lane.b32.xlu1 %v5184_v35, %s5909_s20  ;;  %v3871_v54 = vrot.slane %v6733_v12, 5  ;;  %v3874_v39 = vrot.slane %v6746_v63, 5  ;;  %v6832_v41 = vld [vmem:[#allocation2 + $0x4c] sm:$0xf] }
  0xf5   : > { %v2054_v30 = vld [vmem:[#allocation2 + $0x90] sm:$0xf]  ;;  %v416_v40 = vadd.f32 %v6807_v61, %v377_v6  ;;  %v3868_v16 = vsel %vm6059_vm10, %v3866_v18, %v3867_v19  ;;  %v447_v53 = vmax.f32 %v6773_v24, 0.0  ;;  %v507_v11 = vsel %vm6018_vm5, 0, %v506_v60 }
  0xf6   : > { %v2475_v58 = vld [vmem:[#allocation2 + $0x90] sm:$0xe]  ;;  %v2345_v9 = vshrl.u32 %v2054_v30, 16  ;;  %v2348_v28 = vshll.u32 %v2054_v30, 16  ;;  %2772 = vrot.lane.b32.xlu0 %v5168_v8, %s5910_s27  ;;  %v2055_v3 = vld [vmem:[#allocation2 + $0x94] sm:$0xf]  ;;  %v5274_v12 = vcombine.low %v3865_v51, %v3868_v16  ;;  %v3872_v63 = vsel %vm6059_vm10, %v5227_v38, %v3871_v54 }
  0xf7   : > { %v5137_v0 = vrot.slane %v2475_v58, 9  ;;  %v2075_v42 = vld [vmem:[#allocation2 + $0x98] sm:$0x1]  ;;  %v3873_v43 = vrot.slane %v3871_v54, 4  ;;  %v2354_v6 = vshll.u32 %v2055_v3, 16  ;;  %v2358_v62 = vshrl.u32 %v2055_v3, 16 }
  0xf8   : > { %v2347_v31 = vrot.slane %v2345_v9, 4  ;;  %v2350_v44 = vrot.slane %v2348_v28, 5  ;;  %v2364_v36 = vshll.u32 %v2075_v42, 16  ;;  %4156 = vrot.lane.b32.xlu1 %v5274_v12, %s5909_s20  ;;  %v2607_v45 = vrot.slane %v2055_v3, 5  ;;  %508 = vst [vmem:[#allocation2 + $0x9c] sm:$0x1] %v507_v11 }
  0xf9   : > { %v2610_v17 = vrot.slane %v2075_v42, 5  ;;  %v3875_v37 = vsel %vm6059_vm10, %v3873_v43, %v3874_v39  ;;  %v2356_v49 = vrot.slane %v2354_v6, 5  ;;  %v2360_v13 = vrot.slane %v2358_v62, 4  ;;  %v6839_v38 = vld [vmem:[#allocation2 + $0x50] sm:$0x1] }
  0xfa   : > { %v2351_v23 = vor.u32 %v2350_v44, %v2347_v31  ;;  %v5275_v47 = vcombine.low %v3872_v63, %v3875_v37  ;;  %v2366_v24 = vrot.slane %v2364_v36, 5  ;;  %v6821_v20 = vsel %vm6059_vm10, %v5137_v0, %v2607_v45  ;;  %v509_v12 = vld [vmem:[#allocation2 + $0xa8] sm:$0x1]  ;;  %v565_v44 = vld [vmem:[#allocation2 + $0xb0] sm:$0x1] }
  0xfb   : > { %v2609_v59 = vrot.slane %v2607_v45, 4  ;;  %v448_v15 = vmax.f32 %v416_v40, 0.0  ;;  %v2361_v56 = vor.u32 %v2360_v13, %v2356_v49  ;;  %v563_v52 = vsel %vm6011_vm4, 0, %v562_v32  ;;  %v3362_v6 = vld [vmem:[#allocation2 + $0x54] sm:$0xf] }
  0xfc   : > { %v2352_v46 = vrot.slane %v2351_v23, 4  ;;  %4158 = vrot.lane.b32.xlu1 %v5275_v47, %s5909_s20  ;;  %564 = vst [vmem:[#allocation2 + $0xa4] sm:$0x1] %v563_v52  ;;  %v5367_v14 = vpack.c.bf16 %v447_v53, %v447_v53  ;;  %v3497_v4 = vshrl.u32 %v3360_v50, 16  ;;  %v3500_v35 = vshll.u32 %v3360_v50, 16 }
  0xfd   : > { %v6829_v27 = vsel %vm6059_vm10, %v2609_v59, %v2610_v17  ;;  %v5368_v25 = vpack.c.bf16 %v448_v15, %v448_v15  ;;  %v2362_v7 = vrot.slane %v2361_v56, 4  ;;  %v3506_v54 = vshll.u32 %v6832_v41, 16  ;;  %v6857_v47 = vld [vmem:[#allocation2 + $0x58] sm:$0xf]  ;;  %v6862_v15 = vld [vmem:[#allocation2 + $0x5c] sm:$0x1] }
  0xfe   : > { %v2357_v33 = vsel %vm6099_vm12, %v2352_v46, %v2356_v49  ;;  %v5185_v19 = vcombine.low %v6821_v20, %v6829_v27  ;;  %v880_v48 = vshrl.u32 %v5367_v14, 16  ;;  %v883_v51 = vshll.u32 %v5367_v14, 16  ;;  %v6870_v14 = vpop.permute.xlu1 %1916  ;;  %v6895_v27 = vld [vmem:[#allocation2 + $0x4] sm:$0xf] }
  0xff   : > { %v888_v22 = vshrl.u32 %v5368_v25, 16  ;;  %v891_v18 = vshll.u32 %v5368_v25, 16  ;;  %v2367_v8 = vsel %vm6099_vm12, %v2362_v7, %v2366_v24  ;;  %v3499_v30 = vrot.slane %v3497_v4, 4  ;;  %v1082_v62 = vld [vmem:[#allocation2 + $0x9c] sm:$0xf] }
 0x100   : > { %v3502_v58 = vrot.slane %v3500_v35, 5  ;;  %v5169_v39 = vcombine.low %v2357_v33, %v2367_v8  ;;  %v882_v40 = vrot.slane %v880_v48, 7  ;;  %v3510_v28 = vshrl.u32 %v6832_v41, 16 }
 0x101   : > { %v890_v9 = vrot.slane %v888_v22, 7  ;;  %v3508_v0 = vrot.slane %v3506_v54, 5  ;;  %v3516_v3 = vshll.u32 %v6839_v38, 16  ;;  %v379_v42 = vmul.f32 %v6764_v34, %v340_v57  ;;  %v343_v54 = vld [vmem:[%s6039_s15 + $0xf0] sm:$0xff] }
 0x102   : > { %v3503_v16 = vor.u32 %v3502_v58, %v3499_v30  ;;  %2774 = vrot.lane.b32.xlu0 %v5169_v39, %s5910_s27  ;;  %v885_v63 = vor.u32 %v883_v51, %v882_v40  ;;  %v886_v43 = vrot.slane %v882_v40, 4  ;;  %v3512_v45 = vrot.slane %v3510_v28, 4  ;;  %v341_v30 = vld [vmem:[%s6039_s15 + $0xe0] sm:$0xff]  ;;  %v342_v58 = vld [vmem:[%s6039_s15 + $0xe8] sm:$0xff] }
 0x103   : > { %v893_v53 = vor.u32 %v891_v18, %v890_v9  ;;  %v895_v31 = vrot.slane %v890_v9, 4  ;;  %v1086_v60 = vld [vmem:[#allocation2 + $0xa4] sm:$0x1]  ;;  %v417_v17 = vadd.f32 %v6807_v61, %v6769_v5  ;;  %v418_v37 = vadd.f32 %v6807_v61, %v379_v42 }
 0x104   : > { %v3504_v36 = vrot.slane %v3503_v16, 4  ;;  %v1083_v23 = vsel %vm6107_vm13, %v885_v63, %v1082_v62  ;;  %v3518_v13 = vrot.slane %v3516_v3, 5  ;;  %v3513_v50 = vor.u32 %v3512_v45, %v3508_v0 }
 0x105   : > { %v894_v32 = vsel %vm6116_vm14, %v886_v43, %v893_v53  ;;  %v1087_v49 = vsel %vm6018_vm5, %v895_v31, %v1086_v60  ;;  %1084 = vst [vmem:[#allocation2 + $0x9c] sm:$0xf] %v1083_v23  ;;  %v449_v24 = vmax.f32 %v417_v17, 0.0  ;;  %v450_v59 = vmax.f32 %v418_v37, 0.0 }
 0x106   : > { %1085 = vst.msk [vmem:[#allocation2 + $0xa0] sm:$0xf] %vm455_vm0, %v894_v32  ;;  %1088 = vst [vmem:[#allocation2 + $0xa4] sm:$0x1] %v1087_v49  ;;  %v3509_v5 = vsel %vm6099_vm12, %v3504_v36, %v3508_v0  ;;  %4078 = vrot.lane.b32.xlu0 %v6799_v55, %s5910_s27  ;;  %v510_v46 = vsel %vm6018_vm5, 0, %v509_v12  ;;  %v566_v56 = vsel %vm6011_vm4, 0, %v565_v44  ;;  %v6890_v53 = vmul.f32 %v6764_v34, %v341_v30 }
 0x107   : > { %v3521_v11 = vshrl.u32 %v3362_v6, 16  ;;  %v3524_v52 = vshll.u32 %v3362_v6, 16  ;;  %v3514_v25 = vrot.slane %v3513_v50, 4  ;;  %511 = vst [vmem:[#allocation2 + $0xa8] sm:$0x1] %v510_v46  ;;  %v5369_v4 = vpack.c.bf16 %v449_v24, %v449_v24  ;;  %v6904_v6 = vpop.permute.xlu1 %2832 }
 0x108   : > { %567 = vst [vmem:[#allocation2 + $0xb0] sm:$0x1] %v566_v56  ;;  %v5370_v33 = vpack.c.bf16 %v450_v59, %v450_v59  ;;  %v3530_v55 = vshll.u32 %v6857_v47, 16  ;;  %v3534_v57 = vshrl.u32 %v6857_v47, 16  ;;  %v3540_v48 = vshll.u32 %v6862_v15, 16  ;;  %v6906_v56 = vpop.permute.xlu0 %1836 }
 0x109   : > { %v3523_v7 = vrot.slane %v3521_v11, 4  ;;  %v3526_v35 = vrot.slane %v3524_v52, 5  ;;  %v3519_v51 = vsel %vm6099_vm12, %v3514_v25, %v3518_v13  ;;  %v897_v22 = vshrl.u32 %v5369_v4, 16 }
 0x10a   : > { %v900_v18 = vshll.u32 %v5369_v4, 16  ;;  %v905_v8 = vshrl.u32 %v5370_v33, 16  ;;  %2854 = vrot.lane.b32.xlu0 %v5185_v19, %s5909_s20  ;;  %v5260_v39 = vcombine.low %v3509_v5, %v3519_v51  ;;  %v908_v40 = vshll.u32 %v5370_v33, 16  ;;  %v6897_v19 = vld [vmem:[#allocation2] sm:$0xf] }
 0x10b   : > { %v3527_v9 = vor.u32 %v3526_v35, %v3523_v7  ;;  %v6884_v28 = vrot.slane %v3530_v55, 5  ;;  %v899_v16 = vrot.slane %v897_v22, 7  ;;  %v3536_v3 = vrot.slane %v3534_v57, 4  ;;  %v3788_v57 = vld [vmem:[#allocation2 + $0x48] sm:$0xe] }
 0x10c   : > { %v907_v0 = vrot.slane %v905_v8, 7  ;;  %v6886_v42 = vrot.slane %v3540_v48, 5  ;;  %v2056_v12 = vld [vmem:[#allocation2 + $0x9c] sm:$0xf]  ;;  %4080 = vrot.lane.b32.xlu1 %v5260_v39, %s5910_s27  ;;  %v6893_v20 = vmul.f32 %v6764_v34, %v342_v58  ;;  %v5078_v31 = vcombine.low %v6897_v19, %v6895_v27  ;;  %v6916_v8 = vpop.permute.xlu1 %2834 }
 0x10d   : > { %v2057_v63 = vld [vmem:[#allocation2 + $0xa0] sm:$0xf]  ;;  %v2076_v43 = vld [vmem:[#allocation2 + $0xa4] sm:$0x1]  ;;  %v6902_v44 = vmul.f32 %v6764_v34, %v343_v54  ;;  %v2369_v62 = vshrl.u32 %v2056_v12, 16  ;;  %v2372_v60 = vshll.u32 %v2056_v12, 16  ;;  %v902_v37 = vor.u32 %v900_v18, %v899_v16 }
 0x10e   : > { %v2378_v36 = vshll.u32 %v2057_v63, 16  ;;  %v2382_v45 = vshrl.u32 %v2057_v63, 16  ;;  %v2388_v17 = vshll.u32 %v2076_v43, 16  ;;  %v903_v32 = vrot.slane %v899_v16, 4  ;;  %v1089_v49 = vld [vmem:[#allocation2 + $0xa8] sm:$0xf] }
 0x10f   : > { %v910_v23 = vor.u32 %v908_v40, %v907_v0  ;;  %v2476_v13 = vld [vmem:[#allocation2 + $0x9c] sm:$0xe]  ;;  %v2371_v5 = vrot.slane %v2369_v62, 4  ;;  %v2374_v50 = vrot.slane %v2372_v60, 5  ;;  %v1093_v46 = vld [vmem:[#allocation2 + $0xb0] sm:$0x1]  ;;  %v1090_v4 = vsel %vm6107_vm13, %v902_v37, %v1089_v49 }
 0x110   : > { %v2380_v24 = vrot.slane %v2378_v36, 5  ;;  %v2384_v59 = vrot.slane %v2382_v45, 4  ;;  %v2390_v11 = vrot.slane %v2388_v17, 5  ;;  %v912_v25 = vrot.slane %v907_v0, 4  ;;  %1091 = vst [vmem:[#allocation2 + $0xa8] sm:$0xf] %v1090_v4  ;;  %v6932_v36 = vpop.permute.xlu0 %1918 }
 0x111   : > { %v911_v52 = vsel %vm6116_vm14, %v903_v32, %v910_v23  ;;  %v2375_v33 = vor.u32 %v2374_v50, %v2371_v5  ;;  %v5138_v7 = vrot.slane %v2476_v13, 9  ;;  %v2614_v35 = vrot.slane %v2057_v63, 5  ;;  %v3789_v12 = vld [vmem:[#allocation2 + $0x54] sm:$0xe]  ;;  %v344_v60 = vld [vmem:[%s6039_s15 + $0xf8] sm:$0xff] }
 0x112   : > { %v2385_v55 = vor.u32 %v2384_v59, %v2380_v24  ;;  %1092 = vst.msk [vmem:[#allocation2 + $0xac] sm:$0xf] %vm455_vm0, %v911_v52  ;;  %v1094_v48 = vsel %vm6018_vm5, %v912_v25, %v1093_v46  ;;  %v2617_v51 = vrot.slane %v2076_v43, 5  ;;  %v3528_v22 = vrot.slane %v3527_v9, 4  ;;  %v6951_v59 = vpop.permute.xlu1 %1920 }
 0x113   : > { %v3537_v18 = vor.u32 %v3536_v3, %v6884_v28  ;;  %v2376_v30 = vrot.slane %v2375_v33, 4  ;;  %1095 = vst [vmem:[#allocation2 + $0xb0] sm:$0x1] %v1094_v48  ;;  %v2615_v54 = vsel %vm6059_vm10, %v5138_v7, %v2614_v35  ;;  %v2616_v39 = vrot.slane %v2614_v35, 4 }
 0x114   : > { %v2386_v58 = vrot.slane %v2385_v55, 4  ;;  %v3533_v40 = vsel %vm6099_vm12, %v3528_v22, %v6884_v28  ;;  %v5228_v0 = vrot.slane %v3788_v57, 9  ;;  %v3878_v9 = vrot.slane %v6832_v41, 5  ;;  %v6957_v57 = vpop.permute.xlu0 %1922 }
 0x115   : > { %v3538_v16 = vrot.slane %v3537_v18, 4  ;;  %v2381_v3 = vsel %vm6099_vm12, %v2376_v30, %v2380_v24  ;;  %v2618_v43 = vsel %vm6059_vm10, %v2616_v39, %v2617_v51  ;;  %v3881_v62 = vrot.slane %v6839_v38, 5  ;;  %v512_v30 = vld [vmem:[#allocation2 + $0xb4] sm:$0x1] }
 0x116   : > { %v2391_v63 = vsel %vm6099_vm12, %v2386_v58, %v2390_v11  ;;  %v5186_v45 = vcombine.low %v2615_v54, %v2618_v43  ;;  %v3879_v17 = vsel %vm6059_vm10, %v5228_v0, %v3878_v9  ;;  %v3880_v32 = vrot.slane %v3878_v9, 4 }
 0x117   : > { %v5170_v28 = vcombine.low %v2381_v3, %v2391_v63  ;;  %v3543_v41 = vsel %vm6099_vm12, %v3538_v16, %v6886_v42  ;;  %v5229_v23 = vrot.slane %v3789_v12, 9  ;;  %v3885_v49 = vrot.slane %v6857_v47, 5  ;;  %v2058_v38 = vld [vmem:[#allocation2 + $0xa8] sm:$0xf]  ;;  %v568_v16 = vld [vmem:[#allocation2 + $0xbc] sm:$0x1]  ;;  %v6965_v63 = vpop.permute.xlu1 %2836 }
 0x118   : > { %v6939_v37 = vcombine.low %v3533_v40, %v3543_v41  ;;  %2856 = vrot.lane.b32.xlu1 %v5186_v45, %s5909_s20  ;;  %v2477_v5 = vld [vmem:[#allocation2 + $0xa8] sm:$0xe]  ;;  %v419_v50 = vadd.f32 %v6807_v61, %v6890_v53  ;;  %v420_v42 = vadd.f32 %v6807_v61, %v6893_v20  ;;  %v6949_v24 = vmul.f32 %v6764_v34, %v344_v60  ;;  %v3364_v45 = vld [vmem:[#allocation2 + $0x60] sm:$0xf] }
 0x119   : > { %2776 = vrot.lane.b32.xlu0 %v5170_v28, %s5910_s27  ;;  %v2059_v13 = vld [vmem:[#allocation2 + $0xac] sm:$0xf]  ;;  %v2393_v46 = vshrl.u32 %v2058_v38, 16  ;;  %v2396_v47 = vshll.u32 %v2058_v38, 16  ;;  %v3882_v4 = vsel %vm6059_vm10, %v3880_v32, %v3881_v62  ;;  %v5139_v33 = vrot.slane %v2477_v5, 9 }
 0x11a   : > { %v2402_v11 = vshll.u32 %v2059_v13, 16  ;;  %v2406_v52 = vshrl.u32 %v2059_v13, 16  ;;  %v2077_v25 = vld [vmem:[#allocation2 + $0xb0] sm:$0x1]  ;;  %v2621_v55 = vrot.slane %v2059_v13, 5  ;;  %v3886_v53 = vsel %vm6059_vm10, %v5229_v23, %v3885_v49 }
 0x11b   : > { %v2395_v7 = vrot.slane %v2393_v46, 4  ;;  %v2398_v20 = vrot.slane %v2396_v47, 5  ;;  %v2412_v48 = vshll.u32 %v2077_v25, 16  ;;  %v5276_v51 = vcombine.low %v3879_v17, %v3882_v4  ;;  %v6979_v23 = vld [vmem:[#allocation2 + $0x64] sm:$0xf] }
 0x11c   : > { %v2404_v35 = vrot.slane %v2402_v11, 5  ;;  %v2408_v34 = vrot.slane %v2406_v52, 4  ;;  %v6961_v22 = vsel %vm6059_vm10, %v5139_v33, %v2621_v55  ;;  %v2623_v18 = vrot.slane %v2621_v55, 4 }
 0x11d   : > { %v2399_v58 = vor.u32 %v2398_v20, %v2395_v7  ;;  %v2624_v39 = vrot.slane %v2077_v25, 5  ;;  %v3887_v40 = vrot.slane %v3885_v49, 4  ;;  %v2414_v0 = vrot.slane %v2412_v48, 5  ;;  %4160 = vrot.lane.b32.xlu1 %v5276_v51, %s5909_s20 }
 0x11e   : > { %v2409_v54 = vor.u32 %v2408_v34, %v2404_v35  ;;  %v3888_v9 = vrot.slane %v6862_v15, 5  ;;  %v451_v12 = vmax.f32 %v419_v50, 0.0  ;;  %v452_v3 = vmax.f32 %v420_v42, 0.0  ;;  %v6985_v50 = vld [vmem:[#allocation2 + $0x68] sm:$0x1]  ;;  %v6987_v42 = vpop.permute.xlu0 %2752  ;;  %v6994_v34 = vpop.permute.xlu1 %2838 }
 0x11f   : > { %v2400_v43 = vrot.slane %v2399_v58, 4  ;;  %v6969_v60 = vsel %vm6059_vm10, %v2623_v18, %v2624_v39  ;;  %v513_v28 = vsel %vm6018_vm5, 0, %v512_v30  ;;  %v569_v17 = vsel %vm6011_vm4, 0, %v568_v16 }
 0x120   : > { %v2410_v62 = vrot.slane %v2409_v54, 4  ;;  %v5187_v41 = vcombine.low %v6961_v22, %v6969_v60  ;;  %v3889_v15 = vsel %vm6059_vm10, %v3887_v40, %v3888_v9  ;;  %514 = vst [vmem:[#allocation2 + $0xb4] sm:$0x1] %v513_v28  ;;  %v5371_v32 = vpack.c.bf16 %v451_v12, %v451_v12  ;;  %570 = vst [vmem:[#allocation2 + $0xbc] sm:$0x1] %v569_v17 }
 0x121   : > { %v2405_v49 = vsel %vm6099_vm12, %v2400_v43, %v2404_v35  ;;  %v5277_v13 = vcombine.low %v3886_v53, %v3889_v15  ;;  %v5372_v5 = vpack.c.bf16 %v452_v3, %v452_v3  ;;  %v3545_v52 = vshrl.u32 %v3364_v45, 16  ;;  %v515_v40 = vld [vmem:[#allocation2 + $0xc0] sm:$0x1]  ;;  %v571_v43 = vld [vmem:[#allocation2 + $0xc8] sm:$0x1] }
 0x122   : > { %v2415_v38 = vsel %vm6099_vm12, %v2410_v62, %v2414_v0  ;;  %v914_v47 = vshrl.u32 %v5371_v32, 16  ;;  %v917_v11 = vshll.u32 %v5371_v32, 16  ;;  %v3548_v33 = vshll.u32 %v3364_v45, 16  ;;  %v7001_v62 = vpop.permute.xlu0 %2754  ;;  %v3366_v17 = vld [vmem:[#allocation2 + $0x6c] sm:$0xf] }
 0x123   : > { %v5171_v46 = vcombine.low %v2405_v49, %v2415_v38  ;;  %4162 = vrot.lane.b32.xlu1 %v5277_v13, %s5909_s20  ;;  %v922_v25 = vshrl.u32 %v5372_v5, 16  ;;  %v925_v4 = vshll.u32 %v5372_v5, 16  ;;  %v3554_v55 = vshll.u32 %v6979_v23, 16  ;;  %v7023_v5 = vpop.permute.xlu1 %1924 }
 0x124   : > { %v916_v53 = vrot.slane %v914_v47, 7  ;;  %v3547_v7 = vrot.slane %v3545_v52, 4  ;;  %v3558_v20 = vshrl.u32 %v6979_v23, 16  ;;  %v3564_v35 = vshll.u32 %v6985_v50, 16  ;;  %v7029_v47 = vld [vmem:[#allocation2 + $0x74] sm:$0x1] }
 0x125   : > { %2778 = vrot.lane.b32.xlu0 %v5171_v46, %s5910_s27  ;;  %v924_v48 = vrot.slane %v922_v25, 7  ;;  %v3550_v51 = vrot.slane %v3548_v33, 5  ;;  %v3556_v18 = vrot.slane %v3554_v55, 5  ;;  %vm1948_vm15 = vcmask 31744  }
 0x126   : > { %v919_v30 = vor.u32 %v917_v11, %v916_v53  ;;  %v920_v58 = vrot.slane %v916_v53, 4  ;;  %v3560_v54 = vrot.slane %v3558_v20, 4  ;;  %v3566_v39 = vrot.slane %v3564_v35, 5  ;;  %v7039_v20 = vpop.permute.xlu0 %1840 }
 0x127   : > { %v927_v16 = vor.u32 %v925_v4, %v924_v48  ;;  %v929_v0 = vrot.slane %v924_v48, 4  ;;  %v1096_v9 = vld [vmem:[#allocation2 + $0xb4] sm:$0xf]  ;;  %v3551_v12 = vor.u32 %v3550_v51, %v3547_v7  ;;  %v1951_v3 = vsel %vm1948_vm15, %v5078_v31, %v6906_v56  ;;  %v1100_v45 = vld [vmem:[#allocation2 + $0xbc] sm:$0x1] }
 0x128   : > { %v1097_v28 = vsel %vm6107_vm13, %v919_v30, %v1096_v9  ;;  %v3561_v15 = vor.u32 %v3560_v54, %v3556_v18  ;;  %vm1997_vm2 = vcmask 64512   ;;  %vm2952_vm3 = vcmask 97280   ;;  %v7013_v56 = vld [vmem:[#allocation2 + $0x70] sm:$0xf]  ;;  %v3790_v4 = vld [vmem:[#allocation2 + $0x60] sm:$0xe] }
 0x129   : > { %4082 = vrot.lane.b32.xlu0 %v6939_v37, %s5910_s27  ;;  %v928_v32 = vsel %vm6116_vm14, %v920_v58, %v927_v16  ;;  %1098 = vst [vmem:[#allocation2 + $0xb4] sm:$0xf] %v1097_v28  ;;  %v1101_v27 = vsel %vm6018_vm5, %v929_v0, %v1100_v45  ;;  %v3552_v19 = vrot.slane %v3551_v12, 4  ;;  %v1999_v31 = vsel %vm1997_vm2, %v1951_v3, %v6870_v14  ;;  %v7046_v0 = vpop.permute.xlu1 %2840 }
 0x12a   : > { %1099 = vst.msk [vmem:[#allocation2 + $0xb8] sm:$0xf] %vm455_vm0, %v928_v32  ;;  %1102 = vst [vmem:[#allocation2 + $0xbc] sm:$0x1] %v1101_v27  ;;  %v3562_v37 = vrot.slane %v3561_v15, 4  ;;  %5494 = vmatprep.mubr.msk.bf16.mxu0 %vm2952_vm3, %v1999_v31  ;;  %v421_v49 = vadd.f32 %v6807_v61, %v6902_v44  ;;  %v422_v38 = vadd.f32 %v6807_v61, %v6949_v24  ;;  %v516_v13 = vsel %vm6018_vm5, 0, %v515_v40 }
 0x12b   : > { %v3557_v14 = vsel %vm6099_vm12, %v3552_v19, %v3556_v18  ;;  %517 = vst [vmem:[#allocation2 + $0xc0] sm:$0x1] %v516_v13  ;;  %v572_v46 = vsel %vm6011_vm4, 0, %v571_v43  ;;  %v3569_v11 = vshrl.u32 %v3366_v17, 16  ;;  %v3572_v52 = vshll.u32 %v3366_v17, 16  ;;  %v7053_v13 = vpop.permute.xlu0 %1842 }
 0x12c   : > { %v3567_v61 = vsel %vm6099_vm12, %v3562_v37, %v3566_v39  ;;  %v453_v44 = vmax.f32 %v421_v49, 0.0  ;;  %v454_v24 = vmax.f32 %v422_v38, 0.0  ;;  %573 = vst [vmem:[#allocation2 + $0xc8] sm:$0x1] %v572_v46  ;;  %v3578_v25 = vshll.u32 %v7013_v56, 16 }
 0x12d   : > { %2858 = vrot.lane.b32.xlu0 %v5187_v41, %s5909_s20  ;;  %v5262_v33 = vcombine.low %v3557_v14, %v3567_v61  ;;  %v3571_v55 = vrot.slane %v3569_v11, 4  ;;  %v3574_v53 = vrot.slane %v3572_v52, 5  ;;  %v3582_v7 = vshrl.u32 %v7013_v56, 16 }
 0x12e   : > { %v5373_v35 = vpack.c.bf16 %v453_v44, %v453_v44  ;;  %v5374_v48 = vpack.c.bf16 %v454_v24, %v454_v24  ;;  %v7041_v22 = vrot.slane %v3578_v25, 5  ;;  %v3588_v60 = vshll.u32 %v7029_v47, 16 }
 0x12f   : > { %4084 = vrot.lane.b32.xlu1 %v5262_v33, %s5910_s27  ;;  %v3575_v41 = vor.u32 %v3574_v53, %v3571_v55  ;;  %v3584_v51 = vrot.slane %v3582_v7, 4  ;;  %v5230_v18 = vrot.slane %v3790_v4, 9  ;;  %v3892_v30 = vrot.slane %v6979_v23, 5 }
 0x130   : > { %v2060_v58 = vld [vmem:[#allocation2 + $0xb4] sm:$0xf]  ;;  %v931_v54 = vshrl.u32 %v5373_v35, 16  ;;  %v934_v39 = vshll.u32 %v5373_v35, 16  ;;  %v939_v40 = vshrl.u32 %v5374_v48, 16  ;;  %v942_v16 = vshll.u32 %v5374_v48, 16  ;;  %v7057_v35 = vpop.permute.xlu1 %1838 }
 0x131   : > { %v2061_v9 = vld [vmem:[#allocation2 + $0xb8] sm:$0xf]  ;;  %v2078_v12 = vld [vmem:[#allocation2 + $0xbc] sm:$0x1]  ;;  %v2417_v3 = vshrl.u32 %v2060_v58, 16  ;;  %v2420_v43 = vshll.u32 %v2060_v58, 16  ;;  %v3585_v28 = vor.u32 %v3584_v51, %v7041_v22  ;;  %v7051_v45 = vsel %vm6059_vm10, %v5230_v18, %v3892_v30 }
 0x132   : > { %v2426_v15 = vshll.u32 %v2061_v9, 16  ;;  %v2430_v17 = vshrl.u32 %v2061_v9, 16  ;;  %v2436_v23 = vshll.u32 %v2078_v12, 16  ;;  %v933_v32 = vrot.slane %v931_v54, 7  ;;  %v1103_v27 = vld [vmem:[#allocation2 + $0xc0] sm:$0xf] }
 0x133   : > { %v2419_v19 = vrot.slane %v2417_v3, 4  ;;  %v2422_v31 = vrot.slane %v2420_v43, 5  ;;  %v941_v37 = vrot.slane %v939_v40, 7  ;;  %v1107_v49 = vld [vmem:[#allocation2 + $0xc8] sm:$0x1]  ;;  %v2628_v38 = vrot.slane %v2061_v9, 5 }
 0x134   : > { %v2428_v14 = vrot.slane %v2426_v15, 5  ;;  %v2432_v46 = vrot.slane %v2430_v17, 4  ;;  %v2438_v11 = vrot.slane %v2436_v23, 5  ;;  %v936_v52 = vor.u32 %v934_v39, %v933_v32  ;;  %v2478_v61 = vld [vmem:[#allocation2 + $0xb4] sm:$0xe]  ;;  %v7070_v15 = vpop.permute.xlu0 %2758 }
 0x135   : > { %v2423_v44 = vor.u32 %v2422_v31, %v2419_v19  ;;  %v937_v24 = vrot.slane %v933_v32, 4  ;;  %v944_v25 = vor.u32 %v942_v16, %v941_v37  ;;  %v946_v4 = vrot.slane %v941_v37, 4  ;;  %v3791_v16 = vld [vmem:[#allocation2 + $0x6c] sm:$0xe]  ;;  %v1126_v23 = vld [vmem:[#allocation2 + $0x60] sm:$0xf] }
 0x136   : > { %v2433_v33 = vor.u32 %v2432_v46, %v2428_v14  ;;  %v1104_v55 = vsel %vm6107_vm13, %v936_v52, %v1103_v27  ;;  %v5140_v53 = vrot.slane %v2478_v61, 9  ;;  %v2630_v7 = vrot.slane %v2628_v38, 4 }
 0x137   : > { %v2424_v48 = vrot.slane %v2423_v44, 4  ;;  %v945_v51 = vsel %vm6116_vm14, %v937_v24, %v944_v25  ;;  %1105 = vst [vmem:[#allocation2 + $0xc0] sm:$0xf] %v1104_v55  ;;  %v1108_v18 = vsel %vm6018_vm5, %v946_v4, %v1107_v49  ;;  %v2631_v58 = vrot.slane %v2078_v12, 5  ;;  %v5721_v49 = vld [vmem:[#allocation2 + $0xc] sm:$0xf] }
 0x138   : > { %v2434_v54 = vrot.slane %v2433_v33, 4  ;;  %1106 = vst.msk [vmem:[#allocation2 + $0xc4] sm:$0xf] %vm455_vm0, %v945_v51  ;;  %1109 = vst [vmem:[#allocation2 + $0xc8] sm:$0x1] %v1108_v18  ;;  %v2629_v21 = vsel %vm6059_vm10, %v5140_v53, %v2628_v38  ;;  %v3576_v39 = vrot.slane %v3575_v41, 4  ;;  %v7108_v18 = vpop.permute.xlu0 %1844 }
 0x139   : > { %v3586_v40 = vrot.slane %v3585_v28, 4  ;;  %v2429_v9 = vsel %vm6099_vm12, %v2424_v48, %v2428_v14  ;;  %v2632_v29 = vsel %vm6059_vm10, %v2630_v7, %v2631_v58  ;;  %v3590_v3 = vrot.slane %v3588_v60, 5  ;;  %v7089_v14 = vpop.permute.xlu1 %2756  ;;  %v7098_v4 = vld [vmem:[#allocation2 + $0x1c] sm:$0xf]  ;;  %v7100_v33 = vld [vmem:[#allocation2 + $0x18] sm:$0xf] }
 0x13a   : > { %v3894_v43 = vrot.slane %v3892_v30, 4  ;;  %v2439_v12 = vsel %vm6099_vm12, %v2434_v54, %v2438_v11  ;;  %v5188_v17 = vcombine.low %v2629_v21, %v2632_v29  ;;  %v3581_v41 = vsel %vm6099_vm12, %v3576_v39, %v7041_v22  ;;  %v7081_v30 = vld [vmem:[#allocation2 + $0x64] sm:$0xf] }
 0x13b   : > { %v3895_v28 = vrot.slane %v6985_v50, 5  ;;  %v5172_v32 = vcombine.low %v2429_v9, %v2439_v12  ;;  %v3591_v27 = vsel %vm6099_vm12, %v3586_v40, %v3590_v3  ;;  %v5231_v19 = vrot.slane %v3791_v16, 9  ;;  %v5720_v50 = vld [vmem:[#allocation2 + $0x10] sm:$0xf]  ;;  %v7112_v3 = vld [vmem:[#allocation2 + $0x68] sm:$0x1] }
 0x13c   : > { %v3899_v60 = vrot.slane %v7013_v56, 5  ;;  %2860 = vrot.lane.b32.xlu1 %v5188_v17, %s5909_s20  ;;  %v7084_v31 = vcombine.low %v3581_v41, %v3591_v27  ;;  %v3902_v22 = vrot.slane %v7029_v47, 5  ;;  %v5142_v38 = vcombine.low %v5721_v49, %v5720_v50  ;;  %v3368_v41 = vld [vmem:[#allocation2 + $0x78] sm:$0xf] }
 0x13d   : > { %v3896_v37 = vsel %vm6059_vm10, %v3894_v43, %v3895_v28  ;;  %2780 = vrot.lane.b32.xlu0 %v5172_v32, %s5910_s27  ;;  %v1354_v52 = vshrl.u32 %v1126_v23, 16  ;;  %v1357_v47 = vshll.u32 %v1126_v23, 16  ;;  %v1363_v25 = vshll.u32 %v7081_v30, 16  ;;  %v7114_v28 = vpop.permute.xlu1 %2760 }
 0x13e   : > { %v5278_v56 = vcombine.low %v7051_v45, %v3896_v37  ;;  %v3900_v46 = vsel %vm6059_vm10, %v5231_v19, %v3899_v60  ;;  %v3901_v11 = vrot.slane %v3899_v60, 4  ;;  %v2062_v61 = vld [vmem:[#allocation2 + $0xc0] sm:$0xf]  ;;  %v2866_v24 = vsel %vm1948_vm15, %v5142_v38, %v6987_v42 }
 0x13f   : > { %v2479_v44 = vld [vmem:[#allocation2 + $0xc0] sm:$0xe]  ;;  %v5143_v45 = vcombine.low %v7100_v33, %v7098_v4  ;;  %v2063_v55 = vld [vmem:[#allocation2 + $0xc4] sm:$0xf]  ;;  %v2079_v53 = vld [vmem:[#allocation2 + $0xc8] sm:$0x1]  ;;  %v2913_v42 = vsel %vm1997_vm2, %v2866_v24, %v6904_v6 }
 0x140   : > { %v2441_v7 = vshrl.u32 %v2062_v61, 16  ;;  %v2444_v48 = vshll.u32 %v2062_v61, 16  ;;  %v3903_v51 = vsel %vm6059_vm10, %v3901_v11, %v3902_v22  ;;  %v2450_v58 = vshll.u32 %v2063_v55, 16  ;;  %4164 = vrot.lane.b32.xlu1 %v5278_v56, %s5909_s20  ;;  %5460 = vmatprep.mubr.msk.bf16.mxu1 %vm2952_vm3, %v2913_v42  ;;  %v7129_v61 = vpop.permute.xlu0 %1846 }
 0x141   : > { %v2454_v54 = vshrl.u32 %v2063_v55, 16  ;;  %v2460_v21 = vshll.u32 %v2079_v53, 16  ;;  %v5141_v39 = vrot.slane %v2479_v44, 9  ;;  %v2635_v9 = vrot.slane %v2063_v55, 5  ;;  %v5693_v55 = vld [vmem:[%s8080_s3 + $0x4] sm:$0xfc]  }
 0x142   : > { %v2443_v40 = vrot.slane %v2441_v7, 4  ;;  %v2446_v16 = vrot.slane %v2444_v48, 5  ;;  %v2638_v29 = vrot.slane %v2079_v53, 5  ;;  %v2452_v43 = vrot.slane %v2450_v58, 5 }
 0x143   : > { %v2456_v12 = vrot.slane %v2454_v54, 4  ;;  %v2462_v17 = vrot.slane %v2460_v21, 5  ;;  %v5279_v6 = vcombine.low %v3900_v46, %v3903_v51  ;;  %v7118_v32 = vsel %vm6059_vm10, %v5141_v39, %v2635_v9  ;;  %v7127_v46 = vld [vmem:[#allocation2 + $0x7c] sm:$0xf]  ;;  %v7146_v39 = vld [vmem:[%s8080_s3] sm:$0x3f]  }
 0x144   : > { %v2447_v23 = vor.u32 %v2446_v16, %v2443_v40  ;;  %v2637_v27 = vrot.slane %v2635_v9, 4  ;;  %v1356_v19 = vrot.slane %v1354_v52, 4  ;;  %v1359_v37 = vrot.slane %v1357_v47, 5  ;;  %v7148_v40 = vpop.permute.xlu1 %2842 }
 0x145   : > { %v2457_v60 = vor.u32 %v2456_v12, %v2452_v43  ;;  %4166 = vrot.lane.b32.xlu1 %v5279_v6, %s5909_s20  ;;  %v1365_v22 = vrot.slane %v1363_v25, 5  ;;  %v1367_v50 = vshrl.u32 %v7081_v30, 16  ;;  %v1373_v56 = vshll.u32 %v7112_v3, 16  ;;  %v7133_v25 = vld [vmem:[#allocation2 + $0x80] sm:$0x1] }
 0x146   : > { %v2448_v49 = vrot.slane %v2447_v23, 4  ;;  %v7124_v38 = vsel %vm6059_vm10, %v2637_v27, %v2638_v29  ;;  %v3593_v11 = vshrl.u32 %v3368_v41, 16  ;;  %v1360_v24 = vor.u32 %v1359_v37, %v1356_v19  ;;  %v1128_v12 = vld [vmem:[#allocation2 + $0x6c] sm:$0xf]  ;;  %v7154_v27 = vld [vmem:[#allocation2 + $0x70] sm:$0xf] }
 0x147   : > { %v2458_v52 = vrot.slane %v2457_v60, 4  ;;  %v5189_v44 = vcombine.low %v7118_v32, %v7124_v38  ;;  %v1369_v47 = vrot.slane %v1367_v50, 4  ;;  %v1375_v7 = vrot.slane %v1373_v56, 5  ;;  %v7157_v50 = vld [vmem:[#allocation2 + $0x74] sm:$0x1] }
 0x148   : > { %v2453_v53 = vsel %vm6099_vm12, %v2448_v49, %v2452_v43  ;;  %v3595_v48 = vrot.slane %v3593_v11, 4  ;;  %v3596_v51 = vshll.u32 %v3368_v41, 16  ;;  %v1361_v58 = vrot.slane %v1360_v24, 4  ;;  %v7159_v49 = vpop.permute.xlu0 %2762  ;;  %v1553_v24 = vld [vmem:[#allocation2 + $0x60] sm:$0xe]  ;;  %v7175_v4 = vpop.permute.xlu1 %2764 }
 0x149   : > { %v2463_v42 = vsel %vm6099_vm12, %v2458_v52, %v2462_v17  ;;  %v1370_v54 = vor.u32 %v1369_v47, %v1365_v22  ;;  %v3602_v21 = vshll.u32 %v7127_v46, 16  ;;  %v3606_v29 = vshrl.u32 %v7127_v46, 16 }
 0x14a   : > { %v5173_v16 = vcombine.low %v2453_v53, %v2463_v42  ;;  %v3598_v9 = vrot.slane %v3596_v51, 5  ;;  %v3612_v43 = vshll.u32 %v7133_v25, 16  ;;  %v1366_v17 = vsel %vm6099_vm12, %v1361_v58, %v1365_v22 }
 0x14b   : > { %v1371_v6 = vrot.slane %v1370_v54, 4  ;;  %v3604_v41 = vrot.slane %v3602_v21, 5  ;;  %v2951_v23 = vrot.slane %v5693_v55, 2  ;;  %v3608_v60 = vrot.slane %v3606_v29, 4 }
 0x14c   : > { %2782 = vrot.lane.b32.xlu0 %v5173_v16, %s5910_s27  ;;  %v3599_v19 = vor.u32 %v3598_v9, %v3595_v48  ;;  %v3614_v37 = vrot.slane %v3612_v43, 5  ;;  %vm2985_vm6 = vcmask 1045504   ;;  %v2869_v11 = vsel %vm1948_vm15, %v5143_v45, %v7001_v62  ;;  %v3370_v43 = vld [vmem:[#allocation2 + $0x84] sm:$0xf]  ;;  %v7207_v38 = vpop.permute.xlu1 %1928 }
 0x14d   : > { %v1376_v56 = vsel %vm6099_vm12, %v1371_v6, %v1375_v7  ;;  %5626 = vmatprep.subr.msk.bf16.mxu1 %vm2985_vm6, %v2951_v23  ;;  %v2987_v22 = vsel %vm2985_vm6, %v2951_v23, 0  ;;  %v1378_v52 = vshrl.u32 %v1128_v12, 16  ;;  %5627 = vmatprep.subr.msk.bf16.mxu0 %vm2985_vm6, %v7146_v39  ;;  %v3609_v53 = vor.u32 %v3608_v60, %v3604_v41  ;;  %v7189_v23 = vld [vmem:[#allocation2 + $0x88] sm:$0xf] }
 0x14e   : > { %v5102_v47 = vcombine.low %v1366_v17, %v1376_v56  ;;  %v3600_v55 = vrot.slane %v3599_v19, 4  ;;  %5459 = vmatpush3.bf16.msra.mxu1 %v2987_v22  ;;  %v1381_v7 = vshll.u32 %v1128_v12, 16  ;;  %v1387_v51 = vshll.u32 %v7154_v27, 16 }
 0x14f   : > { %v1380_v48 = vrot.slane %v1378_v52, 4  ;;  %v1391_v42 = vshrl.u32 %v7154_v27, 16  ;;  %v1397_v58 = vshll.u32 %v7157_v50, 16  ;;  %5628 = vmatprep.subr.msk.bf16.mxu1 %vm2985_vm6, %v7146_v39  ;;  %v3610_v33 = vrot.slane %v3609_v53, 4 }
 0x150   : > { %4086 = vrot.lane.b32.xlu0 %v7084_v31, %s5910_s27  ;;  %v3605_v62 = vsel %vm6099_vm12, %v3600_v55, %v3604_v41  ;;  %v1383_v45 = vrot.slane %v1381_v7, 5  ;;  %v5070_v54 = vrot.slane %v1553_v24, 9  ;;  %v1389_v21 = vrot.slane %v1387_v51, 5  ;;  %v7191_v41 = vpop.permute.xlu0 %1926  ;;  %v3792_v24 = vld [vmem:[#allocation2 + $0x78] sm:$0xe] }
 0x151   : > { %v1393_v16 = vrot.slane %v1391_v42, 4  ;;  %v1399_v9 = vrot.slane %v1397_v58, 5  ;;  %v1670_v29 = vrot.slane %v7081_v30, 5  ;;  %v3615_v12 = vsel %vm6099_vm12, %v3610_v33, %v3614_v37  ;;  %v5724_v37 = vld [vmem:[#allocation2 + $0x1c] sm:$0xf] }
 0x152   : > { %v1384_v17 = vor.u32 %v1383_v45, %v1380_v48  ;;  %v1673_v6 = vrot.slane %v7112_v3, 5  ;;  %v2915_v31 = vsel %vm1997_vm2, %v2869_v11, %v6916_v8  ;;  %v5264_v19 = vcombine.low %v3605_v62, %v3615_v12  ;;  %v5725_v8 = vld [vmem:[#allocation2 + $0x18] sm:$0xf]  ;;  %v7203_v7 = vld [vmem:[#allocation2 + $0x8c] sm:$0x1] }
 0x153   : > { %v1394_v60 = vor.u32 %v1393_v16, %v1389_v21  ;;  %v1671_v56 = vsel %vm6059_vm10, %v5070_v54, %v1670_v29  ;;  %v1672_v30 = vrot.slane %v1670_v29, 4  ;;  %5461 = vmatmul.mubr.msk.bf16.vlgmr.msra.gmra.mrb[0].mxu1 %vm2952_vm3, %v2915_v31  ;;  %v5080_v22 = vcombine.low %v5725_v8, %v5724_v37  ;;  %v1554_v16 = vld [vmem:[#allocation2 + $0x6c] sm:$0xe]  ;;  %v5726_v31 = vld [vmem:[#allocation2 + $0x28] sm:$0xf] }
 0x154   : > { %2862 = vrot.lane.b32.xlu0 %v5189_v44, %s5909_s20  ;;  %v1385_v3 = vrot.slane %v1384_v17, 4  ;;  %v3617_v11 = vshrl.u32 %v3370_v43, 16  ;;  %v3620_v52 = vshll.u32 %v3370_v43, 16  ;;  %4088 = vrot.lane.b32.xlu1 %v5264_v19, %s5910_s27  ;;  %v3626_v48 = vshll.u32 %v7189_v23, 16  ;;  %v7220_v17 = vpop.permute.xlu0 %1848  ;;  %v5727_v19 = vld [vmem:[#allocation2 + $0x24] sm:$0xf] }
 0x155   : > { %v1395_v55 = vrot.slane %v1394_v60, 4  ;;  %v1674_v53 = vsel %vm6059_vm10, %v1672_v30, %v1673_v6  ;;  %v3630_v32 = vshrl.u32 %v7189_v23, 16  ;;  %v7213_v42 = vsel %vm1948_vm15, %v5080_v22, %v7039_v20 }
 0x156   : > { %v1390_v44 = vsel %vm6099_vm12, %v1385_v3, %v1389_v21  ;;  %v5118_v51 = vcombine.low %v1671_v56, %v1674_v53  ;;  %v3619_v58 = vrot.slane %v3617_v11, 4  ;;  %v3622_v33 = vrot.slane %v3620_v52, 5  ;;  %v3793_v56 = vld [vmem:[#allocation2 + $0x84] sm:$0xe]  ;;  %v7231_v52 = vpop.permute.xlu1 %2844 }
 0x157   : > { %v1400_v62 = vsel %vm6099_vm12, %v1395_v55, %v1399_v9  ;;  %v3628_v45 = vrot.slane %v3626_v48, 5  ;;  %v3632_v54 = vrot.slane %v3630_v32, 4  ;;  %v3636_v43 = vshll.u32 %v7203_v7, 16  ;;  %v1130_v48 = vld [vmem:[#allocation2 + $0x78] sm:$0xf] }
 0x158   : > { %1852 = vrot.lane.b32.xlu0 %v5102_v47, %s5910_s27  ;;  %v5103_v29 = vcombine.low %v1390_v44, %v1400_v62  ;;  %v5232_v12 = vrot.slane %v3792_v24, 9  ;;  %v3906_v21 = vrot.slane %v7127_v46, 5  ;;  %1932 = vrot.lane.b32.xlu1 %v5118_v51, %s5909_s20  ;;  %v3623_v20 = vor.u32 %v3622_v33, %v3619_v58  ;;  %v7244_v51 = vld [vmem:[#allocation2 + $0x7c] sm:$0xf]  ;;  %v7246_v58 = vld [vmem:[#allocation2 + $0x80] sm:$0x1] }
 0x159   : > { %v3633_v6 = vor.u32 %v3632_v54, %v3628_v45  ;;  %v3909_v9 = vrot.slane %v7133_v25, 5  ;;  %v5081_v60 = vcombine.low %v5727_v19, %v5726_v31  ;;  %v3638_v30 = vrot.slane %v3636_v43, 5  ;;  %v7250_v54 = vpop.permute.xlu0 %1850 }
 0x15a   : > { %v3907_v47 = vsel %vm6059_vm10, %v5232_v12, %v3906_v21  ;;  %v3908_v3 = vrot.slane %v3906_v21, 4  ;;  %v5071_v37 = vrot.slane %v1554_v16, 9  ;;  %v3624_v8 = vrot.slane %v3623_v20, 4  ;;  %v5728_v16 = vld [vmem:[#allocation2 + $0x34] sm:$0xf] }
 0x15b   : > { %v3634_v46 = vrot.slane %v3633_v6, 4  ;;  %v7228_v22 = vsel %vm1948_vm15, %v5081_v60, %v7053_v13  ;;  %v1677_v11 = vrot.slane %v7154_v27, 5  ;;  %v1680_v24 = vrot.slane %v7157_v50, 5  ;;  %v3372_v20 = vld [vmem:[#allocation2 + $0x90] sm:$0xf] }
 0x15c   : > { %1854 = vrot.lane.b32.xlu0 %v5103_v29, %s5910_s27  ;;  %v3910_v25 = vsel %vm6059_vm10, %v3908_v3, %v3909_v9  ;;  %v5233_v55 = vrot.slane %v3793_v56, 9  ;;  %v3913_v53 = vrot.slane %v7189_v23, 5  ;;  %v3629_v32 = vsel %vm6099_vm12, %v3624_v8, %v3628_v45  ;;  %v5729_v29 = vld [vmem:[#allocation2 + $0x30] sm:$0xf]  ;;  %v7260_v60 = vld [vmem:[#allocation2 + $0x94] sm:$0xf] }
 0x15d   : > { %v3639_v13 = vsel %vm6099_vm12, %v3634_v46, %v3638_v30  ;;  %v5280_v27 = vcombine.low %v3907_v47, %v3910_v25  ;;  %v1678_v44 = vsel %vm6059_vm10, %v5071_v37, %v1677_v11  ;;  %v1679_v50 = vrot.slane %v1677_v11, 4  ;;  %v7268_v3 = vld [vmem:[#allocation2 + $0x98] sm:$0x1]  ;;  %v7270_v37 = vpop.permute.xlu1 %2846 }
 0x15e   : > { %v5265_v62 = vcombine.low %v3629_v32, %v3639_v13  ;;  %v3914_v23 = vsel %vm6059_vm10, %v5233_v55, %v3913_v53  ;;  %v3915_v33 = vrot.slane %v3913_v53, 4  ;;  %v3916_v45 = vrot.slane %v7203_v7, 5  ;;  %v7276_v32 = vld [vmem:[%s8080_s3 + $0xc] sm:$0x3f]  }
 0x15f   : > { %4168 = vrot.lane.b32.xlu1 %v5280_v27, %s5909_s20  ;;  %v5145_v43 = vcombine.low %v5729_v29, %v5728_v16  ;;  %v1402_v12 = vshrl.u32 %v1130_v48, 16  ;;  %v1405_v21 = vshll.u32 %v1130_v48, 16  ;;  %v1681_v6 = vsel %vm6059_vm10, %v1679_v50, %v1680_v24  ;;  %v7282_v50 = vpop.permute.xlu0 %2766 }
 0x160   : > { %4090 = vrot.lane.b32.xlu0 %v5265_v62, %s5910_s27  ;;  %v1411_v9 = vshll.u32 %v7244_v51, 16  ;;  %v1415_v31 = vshrl.u32 %v7244_v51, 16  ;;  %v1421_v19 = vshll.u32 %v7246_v58, 16  ;;  %v5119_v7 = vcombine.low %v1678_v44, %v1681_v6  ;;  %v1132_v62 = vld [vmem:[#allocation2 + $0x84] sm:$0xf] }
 0x161   : > { %v3917_v56 = vsel %vm6059_vm10, %v3915_v33, %v3916_v45  ;;  %v7266_v30 = vsel %vm1948_vm15, %v5145_v43, %v7070_v15  ;;  %v1404_v47 = vrot.slane %v1402_v12, 4  ;;  %v1407_v46 = vrot.slane %v1405_v21, 5  ;;  %v5730_v6 = vld [vmem:[#allocation2 + $0x34] sm:$0xf] }
 0x162   : > { %v5281_v8 = vcombine.low %v3914_v23, %v3917_v56  ;;  %v1413_v11 = vrot.slane %v1411_v9, 5  ;;  %v1417_v25 = vrot.slane %v1415_v31, 4  ;;  %v1423_v24 = vrot.slane %v1421_v19, 5  ;;  %v5731_v9 = vld [vmem:[#allocation2 + $0x30] sm:$0xf] }
 0x163   : > { %v3641_v55 = vshrl.u32 %v3372_v20, 16  ;;  %v3644_v53 = vshll.u32 %v3372_v20, 16  ;;  %v3650_v48 = vshll.u32 %v7260_v60, 16  ;;  %v1408_v15 = vor.u32 %v1407_v46, %v1404_v47  ;;  %v5732_v19 = vld [vmem:[#allocation2 + $0x10] sm:$0xf]  ;;  %v7288_v46 = vpop.permute.xlu1 %4072 }
 0x164   : > { %1934 = vrot.lane.b32.xlu0 %v5119_v7, %s5909_s20  ;;  %4170 = vrot.lane.b32.xlu1 %v5281_v8, %s5909_s20  ;;  %v1418_v13 = vor.u32 %v1417_v25, %v1413_v11  ;;  %v3654_v27 = vshrl.u32 %v7260_v60, 16  ;;  %v3660_v44 = vshll.u32 %v7268_v3, 16  ;;  %v3188_v16 = vsel %vm2985_vm6, %v7146_v39, 0  ;;  %v5733_v7 = vld [vmem:[#allocation2 + $0xc] sm:$0xf] }
 0x165   : > { %v3643_v23 = vrot.slane %v3641_v55, 4  ;;  %v3646_v33 = vrot.slane %v3644_v53, 5  ;;  %v3652_v45 = vrot.slane %v3650_v48, 5  ;;  %v1409_v29 = vrot.slane %v1408_v15, 4  ;;  %5493 = vmatpush3.bf16.msra.mxu0 %v3188_v16  ;;  %5561 = vmatpush3.bf16.msra.mxu1 %v3188_v16  ;;  %v7286_v47 = vld [vmem:[#allocation2 + $0x88] sm:$0xf] }
 0x166   : > { %v1419_v43 = vrot.slane %v1418_v13, 4  ;;  %v3656_v12 = vrot.slane %v3654_v27, 4  ;;  %v3662_v21 = vrot.slane %v3660_v44, 5  ;;  %v5082_v31 = vcombine.low %v5731_v9, %v5730_v6  ;;  %5629 = vmatprep.subr.msk.bf16.mxu0 %vm2985_vm6, %v7276_v32  ;;  %v7296_v53 = vld [vmem:[#allocation2 + $0x8c] sm:$0x1] }
 0x167   : > { %v3647_v20 = vor.u32 %v3646_v33, %v3643_v23  ;;  %v5079_v56 = vcombine.low %v5733_v7, %v5732_v19  ;;  %v1426_v8 = vshrl.u32 %v1132_v62, 16  ;;  %v1414_v39 = vsel %vm6099_vm12, %v1409_v29, %v1413_v11  ;;  %v1555_v15 = vld [vmem:[#allocation2 + $0x78] sm:$0xe] }
 0x168   : > { %v1424_v25 = vsel %vm6099_vm12, %v1419_v43, %v1423_v24  ;;  %v3657_v55 = vor.u32 %v3656_v12, %v3652_v45  ;;  %v1429_v48 = vshll.u32 %v1132_v62, 16  ;;  %v7300_v44 = vsel %vm1948_vm15, %v5082_v31, %v7108_v18  ;;  %v7305_v24 = vpop.permute.xlu0 %1930  ;;  %v7315_v31 = vld [vmem:[#allocation2 + $0x9c] sm:$0xf] }
 0x169   : > { %v5104_v13 = vcombine.low %v1414_v39, %v1424_v25  ;;  %v3648_v27 = vrot.slane %v3647_v20, 4  ;;  %v1954_v23 = vsel %vm1948_vm15, %v5079_v56, %v7057_v35  ;;  %v1428_v16 = vrot.slane %v1426_v8, 4  ;;  %8102 = vst [vmem:[#allocation9_spill] sm:$0xff] %v7315_v31 }
 0x16a   : > { %v3658_v33 = vrot.slane %v3657_v55, 4  ;;  %v1431_v11 = vrot.slane %v1429_v48, 5  ;;  %v1435_v29 = vshll.u32 %v7286_v47, 16  ;;  %v1439_v43 = vshrl.u32 %v7286_v47, 16  ;;  %v5734_v48 = vld [vmem:[#allocation2 + $0x3c] sm:$0xf] }
 0x16b   : > { %1856 = vrot.lane.b32.xlu0 %v5104_v13, %s5910_s27  ;;  %v3653_v62 = vsel %vm6099_vm12, %v3648_v27, %v3652_v45  ;;  %v1445_v18 = vshll.u32 %v7296_v53, 16  ;;  %v5072_v12 = vrot.slane %v1555_v15, 9  ;;  %v1684_v9 = vrot.slane %v7244_v51, 5  ;;  %v7318_v45 = vpop.permute.xlu1 %2848  ;;  %v5735_v15 = vld [vmem:[#allocation2 + $0x40] sm:$0xf] }
 0x16c   : > { %v3663_v35 = vsel %vm6099_vm12, %v3658_v33, %v3662_v21  ;;  %v1432_v20 = vor.u32 %v1431_v11, %v1428_v16  ;;  %v1437_v6 = vrot.slane %v1435_v29, 5  ;;  %v1441_v7 = vrot.slane %v1439_v43, 4  ;;  %v7329_v27 = vld [vmem:[#allocation2 + $0xa0] sm:$0xf]  ;;  %v5737_v11 = vld [vmem:[#allocation2 + $0x24] sm:$0xf] }
 0x16d   : > { %v5266_v19 = vcombine.low %v3653_v62, %v3663_v35  ;;  %v1447_v56 = vrot.slane %v1445_v18, 5  ;;  %v1687_v8 = vrot.slane %v7246_v58, 5  ;;  %v1685_v25 = vsel %vm6059_vm10, %v5072_v12, %v1684_v9  ;;  %8103 = vst [vmem:[#allocation10_spill] sm:$0xff] %v7329_v27  ;;  %v7337_v62 = vld [vmem:[#allocation2 + $0xa4] sm:$0x1] }
 0x16e   : > { %v1433_v39 = vrot.slane %v1432_v20, 4  ;;  %v1686_v55 = vrot.slane %v1684_v9, 4  ;;  %v2001_v21 = vsel %vm1997_vm2, %v1954_v23, %v6932_v36  ;;  %v1442_v51 = vor.u32 %v1441_v7, %v1437_v6  ;;  %v5736_v23 = vld [vmem:[#allocation2 + $0x28] sm:$0xf] }
 0x16f   : > { %4092 = vrot.lane.b32.xlu1 %v5266_v19, %s5910_s27  ;;  %5495 = vmatmul.mubr.msk.bf16.vlgmr.msra.gmra.mrb[0].mxu0 %vm2952_vm3, %v2001_v21  ;;  %v5083_v13 = vcombine.low %v5734_v48, %v5735_v15  ;;  %v2003_v58 = vsel %vm1997_vm2, %v7213_v42, %v6951_v59  ;;  %v3665_v33 = vshrl.u32 %v7315_v31, 16  ;;  %v5144_v29 = vcombine.low %v5737_v11, %v5736_v23  ;;  %v3794_v59 = vld [vmem:[#allocation2 + $0x90] sm:$0xe]  ;;  %v7340_v42 = vpop.permute.xlu0 %2768  ;;  %v1556_v15 = vld [vmem:[#allocation2 + $0x84] sm:$0xe] }
 0x170   : > { %v1438_v16 = vsel %vm6099_vm12, %v1433_v39, %v1437_v6  ;;  %v1688_v36 = vsel %vm6059_vm10, %v1686_v55, %v1687_v8  ;;  %5498 = vmatprep.mubr.msk.bf16.mxu0 %vm2952_vm3, %v2003_v58  ;;  %v3668_v43 = vshll.u32 %v7315_v31, 16  ;;  %v1443_v18 = vrot.slane %v1442_v51, 4  ;;  %v7355_v55 = vpop.permute.xlu1 %4152  ;;  %v5738_v11 = vld [vmem:[#allocation2 + $0x48] sm:$0xf] }
 0x171   : > { %v5120_v12 = vcombine.low %v1685_v25, %v1688_v36  ;;  %v7344_v35 = vsel %vm1948_vm15, %v5083_v13, %v7129_v61  ;;  %v3667_v20 = vrot.slane %v3665_v33, 4  ;;  %v2872_v6 = vsel %vm1948_vm15, %v5144_v29, %v7089_v14 }
 0x172   : > { %v3670_v9 = vrot.slane %v3668_v43, 5  ;;  %v3674_v19 = vshll.u32 %v7329_v27, 16  ;;  %v3678_v7 = vshrl.u32 %v7329_v27, 16  ;;  %v1448_v8 = vsel %vm6099_vm12, %v1443_v18, %v1447_v56  ;;  %v3795_v43 = vld [vmem:[#allocation2 + $0x9c] sm:$0xe] }
 0x173   : > { %1936 = vrot.lane.b32.xlu1 %v5120_v12, %s5909_s20  ;;  %v3684_v39 = vshll.u32 %v7337_v62, 16  ;;  %v5234_v25 = vrot.slane %v3794_v59, 9  ;;  %v3920_v61 = vrot.slane %v7260_v60, 5  ;;  %v5105_v21 = vcombine.low %v1438_v16, %v1448_v8  ;;  %v5739_v16 = vld [vmem:[#allocation2 + $0x4c] sm:$0xf]  ;;  %v7363_v59 = vpop.permute.xlu0 %2770 }
 0x174   : > { %v3671_v51 = vor.u32 %v3670_v9, %v3667_v20  ;;  %v3676_v14 = vrot.slane %v3674_v19, 5  ;;  %v3680_v48 = vrot.slane %v3678_v7, 4  ;;  %v3923_v56 = vrot.slane %v7268_v3, 5  ;;  %v5740_v12 = vld [vmem:[#allocation2 + $0x40] sm:$0xf] }
 0x175   : > { %v3686_v13 = vrot.slane %v3684_v39, 5  ;;  %v3921_v58 = vsel %vm6059_vm10, %v5234_v25, %v3920_v61  ;;  %v3922_v33 = vrot.slane %v3920_v61, 4  ;;  %1858 = vrot.lane.b32.xlu0 %v5105_v21, %s5910_s27  ;;  %v2917_v60 = vsel %vm1997_vm2, %v2872_v6, %v6965_v63  ;;  %v5741_v20 = vld [vmem:[#allocation2 + $0x3c] sm:$0xf]  ;;  %v7380_v61 = vpop.permute.xlu1 %4154 }
 0x176   : > { %v3672_v36 = vrot.slane %v3671_v51, 4  ;;  %v3681_v23 = vor.u32 %v3680_v48, %v3676_v14  ;;  %v5147_v29 = vcombine.low %v5738_v11, %v5739_v16  ;;  %5464 = vmatprep.mubr.msk.bf16.mxu1 %vm2952_vm3, %v2917_v60  ;;  %v2919_v3 = vsel %vm1997_vm2, %v7266_v30, %v6994_v34  ;;  %v7426_v16 = vld [vmem:[#allocation2 + $0xac] sm:$0xf] }
 0x177   : > { %v3924_v18 = vsel %vm6059_vm10, %v3922_v33, %v3923_v56  ;;  %v5146_v9 = vcombine.low %v5741_v20, %v5740_v12  ;;  %v5073_v19 = vrot.slane %v1556_v15, 9  ;;  %5465 = vmatmul.mubr.msk.bf16.gmra.mrb[4].mxu1 %vm2952_vm3, %v2919_v3  ;;  %v1691_v25 = vrot.slane %v7286_v47, 5  ;;  %v7408_v56 = vld [vmem:[#allocation2 + $0x98] sm:$0x1]  ;;  %v7429_v3 = vld [vmem:[#allocation2 + $0xb0] sm:$0x1] }
 0x178   : > { %v3677_v63 = vsel %vm6099_vm12, %v3672_v36, %v3676_v14  ;;  %v3682_v6 = vrot.slane %v3681_v23, 4  ;;  %v5282_v7 = vcombine.low %v3921_v58, %v3924_v18  ;;  %v2881_v8 = vsel %vm1948_vm15, %v5147_v29, %v7159_v49  ;;  %v7410_v36 = vpop.permute.xlu0 %4074  ;;  %v7420_v23 = vld [vmem:[#allocation2 + $0xa8] sm:$0xf] }
 0x179   : > { %v2878_v39 = vsel %vm1948_vm15, %v5146_v9, %v7114_v28  ;;  %v1694_v34 = vrot.slane %v7296_v53, 5  ;;  %v5235_v30 = vrot.slane %v3795_v43, 9  ;;  %v3927_v51 = vrot.slane %v7329_v27, 5  ;;  %v7389_v28 = vld [vmem:[#allocation2 + $0x90] sm:$0xf]  ;;  %v7431_v12 = vpop.permute.xlu1 %4076 }
 0x17a   : > { %v3687_v21 = vsel %vm6099_vm12, %v3682_v6, %v3686_v13  ;;  %4172 = vrot.lane.b32.xlu1 %v5282_v7, %s5909_s20  ;;  %v3930_v49 = vrot.slane %v7337_v62, 5  ;;  %v2921_v14 = vsel %vm1997_vm2, %v2878_v39, %v7046_v0  ;;  %8104 = vst [vmem:[#allocation11_spill] sm:$0xff] %v7389_v28  ;;  %v1692_v53 = vsel %vm6059_vm10, %v5073_v19, %v1691_v25  ;;  %v7397_v13 = vld [vmem:[#allocation2 + $0x94] sm:$0xf] }
 0x17b   : > { %v5267_v47 = vcombine.low %v3677_v63, %v3687_v21  ;;  %v1693_v48 = vrot.slane %v1691_v25, 4  ;;  %5468 = vmatprep.mubr.msk.bf16.mxu1 %vm2952_vm3, %v2921_v14  ;;  %v2005_v15 = vsel %vm1997_vm2, %v7228_v22, %v6957_v57  ;;  %8105 = vst [vmem:[#allocation12_spill] sm:$0xff] %v7397_v13  ;;  %v3928_v62 = vsel %vm6059_vm10, %v5235_v30, %v3927_v51 }
 0x17c   : > { %v3929_v58 = vrot.slane %v3927_v51, 4  ;;  %5499 = vmatmul.mubr.msk.bf16.gmra.mrb[4].mxu0 %vm2952_vm3, %v2005_v15  ;;  %v2009_v0 = vsel %vm1997_vm2, %v7344_v35, %v7191_v41  ;;  %v2007_v33 = vsel %vm1997_vm2, %v7300_v44, %v7023_v5  ;;  %v2923_v22 = vsel %vm1997_vm2, %v2881_v8, %v7148_v40  ;;  %v7441_v51 = vld [vmem:[#allocation2 + $0x9c] sm:$0xf]  ;;  %v5743_v15 = vld [vmem:[#allocation2 + $0x4c] sm:$0xf] }
 0x17d   : > { %4094 = vrot.lane.b32.xlu0 %v5267_v47, %s5910_s27  ;;  %v1695_v57 = vsel %vm6059_vm10, %v1693_v48, %v1694_v34  ;;  %5502 = vmatprep.mubr.msk.bf16.mxu0 %vm2952_vm3, %v2007_v33  ;;  %v1450_v41 = vshrl.u32 %v7389_v28, 16  ;;  %v1453_v35 = vshll.u32 %v7389_v28, 16  ;;  %v1459_v60 = vshll.u32 %v7397_v13, 16  ;;  %v5742_v48 = vld [vmem:[#allocation2 + $0x48] sm:$0xf] }
 0x17e   : > { %v5121_v5 = vcombine.low %v1692_v53, %v1695_v57  ;;  %v3931_v44 = vsel %vm6059_vm10, %v3929_v58, %v3930_v49  ;;  %v1463_v11 = vshrl.u32 %v7397_v13, 16  ;;  %v1469_v40 = vshll.u32 %v7408_v56, 16  ;;  %v7443_v49 = vpop.permute.xlu0 %2850 }
 0x17f   : > { %v5283_v29 = vcombine.low %v3928_v62, %v3931_v44  ;;  %v1452_v43 = vrot.slane %v1450_v41, 4  ;;  %v1455_v18 = vrot.slane %v1453_v35, 5  ;;  %v1461_v20 = vrot.slane %v1459_v60, 5  ;;  %5469 = vmatmul.mubr.msk.bf16.gmra.mrb[8].mxu1 %vm2952_vm3, %v2923_v22  ;;  %v5744_v22 = vld [vmem:[#allocation2 + $0x54] sm:$0xf] }
 0x180   : > { %v1465_v9 = vrot.slane %v1463_v11, 4  ;;  %v3689_v19 = vshrl.u32 %v7420_v23, 16  ;;  %v3692_v63 = vshll.u32 %v7420_v23, 16  ;;  %v1471_v7 = vrot.slane %v1469_v40, 5  ;;  %v5745_v41 = vld [vmem:[#allocation2 + $0x58] sm:$0xf] }
 0x181   : > { %1938 = vrot.lane.b32.xlu0 %v5121_v5, %s5909_s20  ;;  %4174 = vrot.lane.b32.xlu1 %v5283_v29, %s5909_s20  ;;  %v1456_v6 = vor.u32 %v1455_v18, %v1452_v43  ;;  %v3698_v8 = vshll.u32 %v7426_v16, 16  ;;  %v3702_v39 = vshrl.u32 %v7426_v16, 16  ;;  %v3708_v21 = vshll.u32 %v7429_v3, 16  ;;  %v7445_v5 = vld [vmem:[#allocation2 + $0xa0] sm:$0xf]  ;;  %v7455_v18 = vpop.permute.xlu1 %2852 }
 0x182   : > { %v1466_v25 = vor.u32 %v1465_v9, %v1461_v20  ;;  %v3691_v34 = vrot.slane %v3689_v19, 4  ;;  %v3694_v30 = vrot.slane %v3692_v63, 5  ;;  %v5084_v62 = vcombine.low %v5742_v48, %v5743_v15  ;;  %v7452_v29 = vld [vmem:[#allocation2 + $0xa4] sm:$0x1]  ;;  %v1557_v19 = vld [vmem:[#allocation2 + $0x90] sm:$0xe] }
 0x183   : > { %v1457_v14 = vrot.slane %v1456_v6, 4  ;;  %v3700_v47 = vrot.slane %v3698_v8, 5  ;;  %v3704_v53 = vrot.slane %v3702_v39, 4  ;;  %v3710_v57 = vrot.slane %v3708_v21, 5  ;;  %v7475_v48 = vld [vmem:[#allocation2 + $0xb4] sm:$0xf] }
 0x184   : > { %v1467_v58 = vrot.slane %v1466_v25, 4  ;;  %v3695_v33 = vor.u32 %v3694_v30, %v3691_v34  ;;  %v5148_v35 = vcombine.low %v5744_v22, %v5745_v41  ;;  %5503 = vmatmul.mubr.msk.bf16.gmra.mrb[8].mxu0 %vm2952_vm3, %v2009_v0  ;;  %v1969_v11 = vsel %vm1948_vm15, %v5084_v62, %v7220_v17  ;;  %v7469_v30 = vpop.permute.xlu0 %2772 }
 0x185   : > { %v1462_v44 = vsel %vm6099_vm12, %v1457_v14, %v1461_v20  ;;  %v3705_v60 = vor.u32 %v3704_v53, %v3700_v47  ;;  %v1474_v43 = vshrl.u32 %v7441_v51, 16  ;;  %v1477_v20 = vshll.u32 %v7441_v51, 16 }
 0x186   : > { %v1472_v40 = vsel %vm6099_vm12, %v1467_v58, %v1471_v7  ;;  %v3696_v9 = vrot.slane %v3695_v33, 4  ;;  %v7461_v0 = vsel %vm1948_vm15, %v5148_v35, %v7175_v4  ;;  %v1483_v8 = vshll.u32 %v7445_v5, 16  ;;  %v7477_v33 = vld [vmem:[#allocation2 + $0xb8] sm:$0xf] }
 0x187   : > { %v5106_v63 = vcombine.low %v1462_v44, %v1472_v40  ;;  %v3706_v6 = vrot.slane %v3705_v60, 4  ;;  %v1476_v17 = vrot.slane %v1474_v43, 4  ;;  %v1479_v25 = vrot.slane %v1477_v20, 5  ;;  %v5746_v44 = vld [vmem:[#allocation2 + $0x54] sm:$0xf]  ;;  %v7482_v43 = vpop.permute.xlu1 %4156 }
 0x188   : > { %v3701_v39 = vsel %vm6099_vm12, %v3696_v9, %v3700_v47  ;;  %v1487_v34 = vshrl.u32 %v7445_v5, 16  ;;  %v1493_v7 = vshll.u32 %v7452_v29, 16  ;;  %v1485_v21 = vrot.slane %v1483_v8, 5 }
 0x189   : > { %1860 = vrot.lane.b32.xlu0 %v5106_v63, %s5910_s27  ;;  %v3711_v4 = vsel %vm6099_vm12, %v3706_v6, %v3710_v57  ;;  %v5074_v14 = vrot.slane %v1557_v19, 9  ;;  %v1698_v53 = vrot.slane %v7397_v13, 5  ;;  %v1480_v47 = vor.u32 %v1479_v25, %v1476_v17  ;;  %v5747_v57 = vld [vmem:[#allocation2 + $0x58] sm:$0xf]  ;;  %v7487_v19 = vld [vmem:[#allocation2 + $0xbc] sm:$0x1] }
 0x18a   : > { %v5268_v15 = vcombine.low %v3701_v39, %v3711_v4  ;;  %v1489_v62 = vrot.slane %v1487_v34, 4  ;;  %v1495_v58 = vrot.slane %v1493_v7, 5  ;;  %v1701_v35 = vrot.slane %v7408_v56, 5  ;;  %v3796_v39 = vld [vmem:[#allocation2 + $0xa8] sm:$0xe]  ;;  %v7499_v7 = vpop.permute.xlu0 %2774 }
 0x18b   : > { %v1699_v22 = vsel %vm6059_vm10, %v5074_v14, %v1698_v53  ;;  %v1700_v41 = vrot.slane %v1698_v53, 4  ;;  %v5085_v60 = vcombine.low %v5746_v44, %v5747_v57  ;;  %v1481_v40 = vrot.slane %v1480_v47, 4 }
 0x18c   : > { %4096 = vrot.lane.b32.xlu1 %v5268_v15, %s5910_s27  ;;  %v1490_v9 = vor.u32 %v1489_v62, %v1485_v21  ;;  %v2011_v20 = vsel %vm1997_vm2, %v1969_v11, %v7207_v38  ;;  %v3713_v63 = vshrl.u32 %v7475_v48, 16  ;;  %v3716_v17 = vshll.u32 %v7475_v48, 16 }
 0x18d   : > { %v1702_v6 = vsel %vm6059_vm10, %v1700_v41, %v1701_v35  ;;  %v1972_v56 = vsel %vm1948_vm15, %v5085_v60, %v7250_v54  ;;  %v3722_v8 = vshll.u32 %v7477_v33, 16  ;;  %5506 = vmatprep.mubr.msk.bf16.mxu0 %vm2952_vm3, %v2011_v20  ;;  %v1486_v38 = vsel %vm6099_vm12, %v1481_v40, %v1485_v21  ;;  %v3797_v60 = vld [vmem:[#allocation2 + $0xb4] sm:$0xe]  ;;  %v7508_v40 = vpop.permute.xlu1 %4158 }
 0x18e   : > { %v1491_v11 = vrot.slane %v1490_v9, 4  ;;  %v5122_v25 = vcombine.low %v1699_v22, %v1702_v6  ;;  %v3715_v34 = vrot.slane %v3713_v63, 4  ;;  %v3718_v4 = vrot.slane %v3716_v17, 5  ;;  %v1558_v22 = vld [vmem:[#allocation2 + $0x9c] sm:$0xe] }
 0x18f   : > { %v3724_v14 = vrot.slane %v3722_v8, 5  ;;  %v3726_v53 = vshrl.u32 %v7477_v33, 16  ;;  %v3732_v54 = vshll.u32 %v7487_v19, 16  ;;  %v5236_v47 = vrot.slane %v3796_v39, 9  ;;  %v5749_v63 = vld [vmem:[#allocation2 + $0x64] sm:$0xf] }
 0x190   : > { %v1496_v15 = vsel %vm6099_vm12, %v1491_v11, %v1495_v58  ;;  %1940 = vrot.lane.b32.xlu1 %v5122_v25, %s5909_s20  ;;  %v3934_v62 = vrot.slane %v7426_v16, 5  ;;  %v3937_v21 = vrot.slane %v7429_v3, 5  ;;  %v3719_v35 = vor.u32 %v3718_v4, %v3715_v34  ;;  %v5748_v58 = vld [vmem:[#allocation2 + $0x60] sm:$0xf] }
 0x191   : > { %v5107_v41 = vcombine.low %v1486_v38, %v1496_v15  ;;  %v3728_v44 = vrot.slane %v3726_v53, 4  ;;  %v3734_v57 = vrot.slane %v3732_v54, 5  ;;  %v5149_v6 = vcombine.low %v5748_v58, %v5749_v63  ;;  %v7523_v53 = vld [vmem:[#allocation2 + $0xa8] sm:$0xf] }
 0x192   : > { %v3935_v9 = vsel %vm6059_vm10, %v5236_v47, %v3934_v62  ;;  %v3936_v20 = vrot.slane %v3934_v62, 4  ;;  %v2925_v17 = vsel %vm1997_vm2, %v7461_v0, %v7231_v52  ;;  %v3720_v3 = vrot.slane %v3719_v35, 4  ;;  %v7525_v52 = vpop.permute.xlu0 %4078  ;;  %v7542_v35 = vld [vmem:[#allocation2 + $0xb0] sm:$0x1] }
 0x193   : > { %1862 = vrot.lane.b32.xlu0 %v5107_v41, %s5910_s27  ;;  %v3729_v8 = vor.u32 %v3728_v44, %v3724_v14  ;;  %v5075_v39 = vrot.slane %v1558_v22, 9  ;;  %v1705_v38 = vrot.slane %v7445_v5, 5  ;;  %5472 = vmatprep.mubr.msk.bf16.mxu1 %vm2952_vm3, %v2925_v17  ;;  %v2887_v25 = vsel %vm1948_vm15, %v5149_v6, %v7282_v50  ;;  %v7535_v22 = vld [vmem:[#allocation2 + $0xac] sm:$0xf]  ;;  %v7557_v17 = vld [vmem:[#allocation2 + $0xc4] sm:$0xf] }
 0x194   : > { %v3938_v11 = vsel %vm6059_vm10, %v3936_v20, %v3937_v21  ;;  %v1708_v34 = vrot.slane %v7452_v29, 5  ;;  %v5237_v4 = vrot.slane %v3797_v60, 9  ;;  %v3725_v0 = vsel %vm6099_vm12, %v3720_v3, %v3724_v14 }
 0x195   : > { %v3730_v54 = vrot.slane %v3729_v8, 4  ;;  %v5284_v15 = vcombine.low %v3935_v9, %v3938_v11  ;;  %v1706_v47 = vsel %vm6059_vm10, %v5075_v39, %v1705_v38  ;;  %v1707_v62 = vrot.slane %v1705_v38, 4  ;;  %v7564_v38 = vld [vmem:[#allocation2 + $0xc8] sm:$0x1] }
 0x196   : > { %v3941_v21 = vrot.slane %v7477_v33, 5  ;;  %v3944_v50 = vrot.slane %v7487_v19, 5  ;;  %v2013_v29 = vsel %vm1997_vm2, %v1972_v56, %v7305_v24  ;;  %v2927_v14 = vsel %vm1997_vm2, %v2887_v25, %v7270_v37  ;;  %v7546_v19 = vld [vmem:[#allocation2 + $0xc0] sm:$0xf]  ;;  %v7549_v24 = vpop.permute.xlu1 %4080  ;;  %v7567_v25 = vpop.permute.xlu0 %2854 }
 0x197   : > { %v3735_v41 = vsel %vm6099_vm12, %v3730_v54, %v3734_v57  ;;  %4176 = vrot.lane.b32.xlu1 %v5284_v15, %s5909_s20  ;;  %v1498_v44 = vshrl.u32 %v7523_v53, 16  ;;  %v1501_v60 = vshll.u32 %v7523_v53, 16  ;;  %5507 = vmatmul.mubr.msk.bf16.gmra.mrb[12].mxu0 %vm2952_vm3, %v2013_v29  ;;  %v1709_v57 = vsel %vm6059_vm10, %v1707_v62, %v1708_v34 }
 0x198   : > { %v5269_v56 = vcombine.low %v3725_v0, %v3735_v41  ;;  %v3942_v9 = vsel %vm6059_vm10, %v5237_v4, %v3941_v21  ;;  %v3943_v37 = vrot.slane %v3941_v21, 4  ;;  %5473 = vmatmul.mubr.msk.bf16.gmra.mrb[12].mxu1 %vm2952_vm3, %v2927_v14  ;;  %v5123_v20 = vcombine.low %v1706_v47, %v1709_v57  ;;  %v7574_v14 = vld [vmem:[#allocation2 + $0xb4] sm:$0xf] }
 0x199   : > { %v1500_v58 = vrot.slane %v1498_v44, 4  ;;  %v1503_v63 = vrot.slane %v1501_v60, 5  ;;  %v1507_v6 = vshll.u32 %v7535_v22, 16  ;;  %v1511_v8 = vshrl.u32 %v7535_v22, 16 }
 0x19a   : > { %4098 = vrot.lane.b32.xlu0 %v5269_v56, %s5910_s27  ;;  %v3945_v3 = vsel %vm6059_vm10, %v3943_v37, %v3944_v50  ;;  %v1517_v39 = vshll.u32 %v7542_v35, 16  ;;  %v3737_v11 = vshrl.u32 %v7546_v19, 16  ;;  %v3740_v54 = vshll.u32 %v7546_v19, 16  ;;  %v7576_v44 = vpop.permute.xlu1 %2856  ;;  %v5751_v37 = vld [vmem:[#allocation2 + $0x70] sm:$0xf] }
 0x19b   : > { %v5285_v34 = vcombine.low %v3942_v9, %v3945_v3  ;;  %v1504_v4 = vor.u32 %v1503_v63, %v1500_v58  ;;  %v1509_v0 = vrot.slane %v1507_v6, 5  ;;  %v1513_v15 = vrot.slane %v1511_v8, 4  ;;  %v5750_v9 = vld [vmem:[#allocation2 + $0x6c] sm:$0xf]  ;;  %v7579_v63 = vld [vmem:[#allocation2 + $0xb8] sm:$0xf] }
 0x19c   : > { %v3739_v47 = vrot.slane %v3737_v11, 4  ;;  %v3746_v62 = vshll.u32 %v7557_v17, 16  ;;  %v3742_v50 = vrot.slane %v3740_v54, 5  ;;  %v3750_v29 = vshrl.u32 %v7557_v17, 16  ;;  %v5752_v11 = vld [vmem:[#allocation2 + $0x18] sm:$0xf] }
 0x19d   : > { %4178 = vrot.lane.b32.xlu1 %v5285_v34, %s5909_s20  ;;  %v1505_v21 = vrot.slane %v1504_v4, 4  ;;  %v3756_v41 = vshll.u32 %v7564_v38, 16  ;;  %v1514_v60 = vor.u32 %v1513_v15, %v1509_v0  ;;  %v1519_v56 = vrot.slane %v1517_v39, 5  ;;  %v5753_v34 = vld [vmem:[#allocation2 + $0x1c] sm:$0xf] }
 0x19e   : > { %1942 = vrot.lane.b32.xlu0 %v5123_v20, %s5909_s20  ;;  %v3748_v57 = vrot.slane %v3746_v62, 5  ;;  %v5150_v58 = vcombine.low %v5750_v9, %v5751_v37  ;;  %v3743_v3 = vor.u32 %v3742_v50, %v3739_v47  ;;  %v3752_v8 = vrot.slane %v3750_v29, 4  ;;  %v7583_v54 = vld [vmem:[#allocation2 + $0xbc] sm:$0x1]  ;;  %v7588_v62 = vpop.permute.xlu0 %2776 }
 0x19f   : > { %v1510_v6 = vsel %vm6099_vm12, %v1505_v21, %v1509_v0  ;;  %v5240_v4 = vcombine.low %v5752_v11, %v5753_v34  ;;  %v1515_v28 = vrot.slane %v1514_v60, 4  ;;  %v3758_v20 = vrot.slane %v3756_v41, 5  ;;  %v1559_v21 = vld [vmem:[#allocation2 + $0xa8] sm:$0xe] }
 0x1a0   : > { %v2890_v39 = vsel %vm1948_vm15, %v5150_v58, %v7340_v42  ;;  %v1522_v15 = vshrl.u32 %v7574_v14, 16  ;;  %v3744_v9 = vrot.slane %v3743_v3, 4  ;;  %v3753_v37 = vor.u32 %v3752_v8, %v3748_v57  ;;  %v7598_v8 = vpop.permute.xlu1 %4160 }
 0x1a1   : > { %v1525_v0 = vshll.u32 %v7574_v14, 16  ;;  %v1531_v47 = vshll.u32 %v7579_v63, 16  ;;  %v1520_v50 = vsel %vm6099_vm12, %v1515_v28, %v1519_v56  ;;  %v1535_v41 = vshrl.u32 %v7579_v63, 16  ;;  %v518_v28 = vld [vmem:[#allocation2 + $0xcc] sm:$0x1] }
 0x1a2   : > { %v1524_v29 = vrot.slane %v1522_v15, 4  ;;  %v1541_v60 = vshll.u32 %v7583_v54, 16  ;;  %v5108_v42 = vcombine.low %v1510_v6, %v1520_v50  ;;  %v3749_v58 = vsel %vm6099_vm12, %v3744_v9, %v3748_v57  ;;  %v574_v9 = vld [vmem:[#allocation2 + $0xd4] sm:$0x1] }
 0x1a3   : > { %v3754_v11 = vrot.slane %v3753_v37, 4  ;;  %v1527_v3 = vrot.slane %v1525_v0, 5  ;;  %v4186_v34 = vsel %vm1948_vm15, %v5240_v4, %v7288_v46  ;;  %v1533_v13 = vrot.slane %v1531_v47, 5  ;;  %v7607_v37 = vld [vmem:[#allocation2 + $0xd0] sm:$0xf] }
 0x1a4   : > { %v1537_v31 = vrot.slane %v1535_v41, 4  ;;  %v5076_v27 = vrot.slane %v1559_v21, 9  ;;  %1864 = vrot.lane.b32.xlu0 %v5108_v42, %s5910_s27  ;;  %v1712_v15 = vrot.slane %v7535_v22, 5  ;;  %v1715_v57 = vrot.slane %v7542_v35, 5  ;;  %v3798_v47 = vld [vmem:[#allocation2 + $0xc0] sm:$0xe]  ;;  %v7611_v21 = vpop.permute.xlu0 %2778 }
 0x1a5   : > { %v3759_v56 = vsel %vm6099_vm12, %v3754_v11, %v3758_v20  ;;  %v1528_v6 = vor.u32 %v1527_v3, %v1524_v29  ;;  %v1543_v46 = vrot.slane %v1541_v60, 5  ;;  %v2929_v4 = vsel %vm1997_vm2, %v2890_v39, %v7318_v45  ;;  %v5754_v60 = vld [vmem:[#allocation2 + $0x78] sm:$0xf]  ;;  %v5755_v42 = vld [vmem:[#allocation2 + $0x7c] sm:$0xf] }
 0x1a6   : > { %v5270_v0 = vcombine.low %v3749_v58, %v3759_v56  ;;  %v1538_v50 = vor.u32 %v1537_v31, %v1533_v13  ;;  %v1713_v20 = vsel %vm6059_vm10, %v5076_v27, %v1712_v15  ;;  %v1714_v29 = vrot.slane %v1712_v15, 4  ;;  %5476 = vmatprep.mubr.msk.bf16.mxu1 %vm2952_vm3, %v2929_v4 }
 0x1a7   : > { %v1529_v41 = vrot.slane %v1528_v6, 4  ;;  %v519_v35 = vsel %vm6018_vm5, 0, %v518_v28  ;;  %v5151_v58 = vcombine.low %v5754_v60, %v5755_v42  ;;  %v575_v45 = vsel %vm6011_vm4, 0, %v574_v9  ;;  %v7627_v28 = vpop.permute.xlu1 %4162 }
 0x1a8   : > { %4100 = vrot.lane.b32.xlu1 %v5270_v0, %s5910_s27  ;;  %v1539_v31 = vrot.slane %v1538_v50, 4  ;;  %520 = vst [vmem:[#allocation2 + $0xcc] sm:$0x1] %v519_v35  ;;  %v3770_v39 = vshll.u32 %v7607_v37, 16  ;;  %v1716_v2 = vsel %vm6059_vm10, %v1714_v29, %v1715_v57  ;;  %576 = vst [vmem:[#allocation2 + $0xd4] sm:$0x1] %v575_v45  ;;  %v7640_v35 = vpop.permute.xlu0 %4082 }
 0x1a9   : > { %v1534_v27 = vsel %vm6099_vm12, %v1529_v41, %v1533_v13  ;;  %v3774_v11 = vshrl.u32 %v7607_v37, 16  ;;  %v5238_v3 = vrot.slane %v3798_v47, 9  ;;  %v5124_v6 = vcombine.low %v1713_v20, %v1716_v2  ;;  %v5756_v50 = vld [vmem:[#allocation2 + $0x24] sm:$0xf]  ;;  %v5757_v57 = vld [vmem:[#allocation2 + $0x28] sm:$0xf] }
 0x1aa   : > { %v1544_v56 = vsel %vm6099_vm12, %v1539_v31, %v1543_v46  ;;  %v7631_v1 = vrot.slane %v3770_v39, 5  ;;  %v3948_v15 = vrot.slane %v7557_v17, 5  ;;  %v3951_v13 = vrot.slane %v7564_v38, 5  ;;  %v3799_v41 = vld [vmem:[#allocation2 + $0xcc] sm:$0xe] }
 0x1ab   : > { %v5109_v9 = vcombine.low %v1534_v27, %v1544_v56  ;;  %v3776_v0 = vrot.slane %v3774_v11, 4  ;;  %v5241_v4 = vcombine.low %v5756_v50, %v5757_v57  ;;  %v4233_v46 = vsel %vm1997_vm2, %v4186_v34, %v7355_v55  ;;  %v1560_v20 = vld [vmem:[#allocation2 + $0xb4] sm:$0xe]  ;;  %v7658_v11 = vpop.permute.xlu1 %4084 }
 0x1ac   : > { %1944 = vrot.lane.b32.xlu1 %v5124_v6, %s5909_s20  ;;  %v3949_v47 = vsel %vm6059_vm10, %v5238_v3, %v3948_v15  ;;  %v3950_v29 = vrot.slane %v3948_v15, 4  ;;  %v2893_v38 = vsel %vm1948_vm15, %v5151_v58, %v7363_v59  ;;  %v1719_v60 = vrot.slane %v7579_v63, 5  ;;  %5528 = vmatprep.mubr.msk.bf16.mxu0 %vm2952_vm3, %v4233_v46  ;;  %v5758_v46 = vld [vmem:[#allocation2 + $0x84] sm:$0xf] }
 0x1ad   : > { %1866 = vrot.lane.b32.xlu0 %v5109_v9, %s5910_s27  ;;  %v3777_v31 = vor.u32 %v3776_v0, %v7631_v1  ;;  %v5239_v45 = vrot.slane %v3799_v41, 9  ;;  %v3955_v55 = vrot.slane %v7607_v37, 5  ;;  %v4304_v34 = vsel %vm2985_vm6, %v7276_v32, 0  ;;  %v7670_v41 = vpop.permute.xlu0 %2858 }
 0x1ae   : > { %v3952_v42 = vsel %vm6059_vm10, %v3950_v29, %v3951_v13  ;;  %v4189_v59 = vsel %vm1948_vm15, %v5241_v4, %v7410_v36  ;;  %v5077_v58 = vrot.slane %v1560_v20, 9  ;;  %v1722_v2 = vrot.slane %v7583_v54, 5  ;;  %5527 = vmatpush3.bf16.msra.mxu0 %v4304_v34  ;;  %v5759_v20 = vld [vmem:[#allocation2 + $0x88] sm:$0xf]  ;;  %v5762_v34 = vld [vmem:[#allocation2 + $0x90] sm:$0xf] }
 0x1af   : > { %v7653_v39 = vld [vmem:[#allocation2 + $0xcc] sm:$0xf]  ;;  %v5286_v27 = vcombine.low %v3949_v47, %v3952_v42  ;;  %v3399_v3 = vld [vmem:[#allocation2 + $0xd4] sm:$0x1]  ;;  %v3778_v15 = vrot.slane %v3777_v31, 4  ;;  %v3957_v9 = vrot.slane %v3955_v55, 4  ;;  %v3956_v0 = vsel %vm6059_vm10, %v5239_v45, %v3955_v55 }
 0x1b0   : > { %v3761_v56 = vshrl.u32 %v7653_v39, 16  ;;  %v3764_v6 = vshll.u32 %v7653_v39, 16  ;;  %v3780_v32 = vshll.u32 %v3399_v3, 16  ;;  %v3958_v36 = vrot.slane %v3399_v3, 5  ;;  %v5765_v3 = vld [vmem:[#allocation2 + $0x40] sm:$0xf] }
 0x1b1   : > { %4180 = vrot.lane.b32.xlu1 %v5286_v27, %s5909_s20  ;;  %v2931_v54 = vsel %vm1997_vm2, %v2893_v38, %v7443_v49  ;;  %v1721_v57 = vrot.slane %v1719_v60, 4  ;;  %v4235_v4 = vsel %vm1997_vm2, %v4189_v59, %v7380_v61  ;;  %v5152_v31 = vcombine.low %v5758_v46, %v5759_v20  ;;  %v5760_v49 = vld [vmem:[#allocation2 + $0x30] sm:$0xf]  ;;  %v5761_v38 = vld [vmem:[#allocation2 + $0x34] sm:$0xf] }
 0x1b2   : > { %v3763_v13 = vrot.slane %v3761_v56, 4  ;;  %v3766_v50 = vrot.slane %v3764_v6, 5  ;;  %5477 = vmatmul.mubr.msk.bf16.gmra.mrb[16].mxu1 %vm2952_vm3, %v2931_v54  ;;  %v3782_v47 = vrot.slane %v3780_v32, 5  ;;  %v3959_v29 = vsel %vm6059_vm10, %v3957_v9, %v3958_v36  ;;  %5529 = vmatmul.mubr.msk.bf16.vlgmr.msra.gmra.mrb[0].mxu0 %vm2952_vm3, %v4235_v4  ;;  %v5763_v61 = vld [vmem:[#allocation2 + $0x94] sm:$0xf] }
 0x1b3   : > { %v5242_v42 = vcombine.low %v5760_v49, %v5761_v38  ;;  %v5287_v55 = vcombine.low %v3956_v0, %v3959_v29  ;;  %v5153_v27 = vcombine.low %v5762_v34, %v5763_v61  ;;  %v5764_v59 = vld [vmem:[#allocation2 + $0x3c] sm:$0xf]  ;;  %v1720_v9 = vsel %vm6059_vm10, %v5077_v58, %v1719_v60  ;;  %v5767_v54 = vld [vmem:[#allocation2 + $0xa0] sm:$0xf]  ;;  %v5771_v46 = vld [vmem:[#allocation2 + $0xac] sm:$0xf] }
 0x1b4   : > { %v3767_v45 = vor.u32 %v3766_v50, %v3763_v13  ;;  %v5243_v56 = vcombine.low %v5764_v59, %v5765_v3  ;;  %v3783_v6 = vsel %vm6099_vm12, %v3778_v15, %v3782_v47  ;;  %v2896_v32 = vsel %vm1948_vm15, %v5152_v31, %v7469_v30  ;;  %v5766_v36 = vld [vmem:[#allocation2 + $0x9c] sm:$0xf]  ;;  %v2861_v13 = vpop.permute.xlu1 %2860  ;;  %v2781_v47 = vpop.permute.xlu0 %2780  ;;  %v5773_v31 = vld [vmem:[#allocation2 + $0x58] sm:$0xf]  ;;  %v5777_v34 = vld [vmem:[#allocation2 + $0x64] sm:$0xf] }
 0x1b5   : > { %v5154_v4 = vcombine.low %v5766_v36, %v5767_v54  ;;  %4182 = vrot.lane.b32.xlu1 %v5287_v55, %s5909_s20  ;;  %v4192_v50 = vsel %vm1948_vm15, %v5242_v42, %v7431_v12  ;;  %v2899_v29 = vsel %vm1948_vm15, %v5153_v27, %v7499_v7  ;;  %v2933_v15 = vsel %vm1997_vm2, %v2896_v32, %v7455_v18  ;;  %v5775_v38 = vld [vmem:[#allocation2 + $0xb8] sm:$0xf]  ;;  %v5776_v55 = vld [vmem:[#allocation2 + $0x60] sm:$0xf] }
 0x1b6   : > { %v3768_v0 = vrot.slane %v3767_v45, 4  ;;  %v1723_v60 = vsel %vm6059_vm10, %v1721_v57, %v1722_v2  ;;  %5480 = vmatprep.mubr.msk.bf16.mxu1 %vm2952_vm3, %v2933_v15  ;;  %v4195_v30 = vsel %vm1948_vm15, %v5243_v56, %v7525_v52  ;;  %v4237_v58 = vsel %vm1997_vm2, %v4192_v50, %v7482_v43  ;;  %v5768_v2 = vld [vmem:[#allocation2 + $0x48] sm:$0xf]  ;;  %v5769_v52 = vld [vmem:[#allocation2 + $0x4c] sm:$0xf] }
 0x1b7   : > { %v2935_v12 = vsel %vm1997_vm2, %v2899_v29, %v7567_v25  ;;  %5532 = vmatprep.mubr.msk.bf16.mxu0 %vm2952_vm3, %v4237_v58  ;;  %v4239_v26 = vsel %vm1997_vm2, %v4195_v30, %v7508_v40  ;;  %v2902_v18 = vsel %vm1948_vm15, %v5154_v4, %v7588_v62  ;;  %v5244_v57 = vcombine.low %v5768_v2, %v5769_v52  ;;  %v5772_v40 = vld [vmem:[#allocation2 + $0x54] sm:$0xf]  ;;  %v5779_v50 = vld [vmem:[#allocation2 + $0xc4] sm:$0xf]  ;;  %v5781_v30 = vld [vmem:[#allocation2 + $0x70] sm:$0xf] }
 0x1b8   : > { %v3773_v7 = vsel %vm6099_vm12, %v3768_v0, %v7631_v1  ;;  %v2937_v25 = vsel %vm1997_vm2, %v2902_v18, %v7576_v44  ;;  %v5770_v1 = vld [vmem:[#allocation2 + $0xa8] sm:$0xf]  ;;  %v5245_v49 = vcombine.low %v5772_v40, %v5773_v31  ;;  %v5774_v62 = vld [vmem:[#allocation2 + $0xb4] sm:$0xf]  ;;  %v5125_v45 = vcombine.low %v1720_v9, %v1723_v60  ;;  %v4165_v61 = vpop.permute.xlu1 %4164  ;;  %v5778_v0 = vld [vmem:[#allocation2 + $0xc0] sm:$0xf] }
 0x1b9   : > { %v5271_v43 = vcombine.low %v3773_v7, %v3783_v6  ;;  %v4198_v10 = vsel %vm1948_vm15, %v5244_v57, %v7549_v24  ;;  %v5155_v20 = vcombine.low %v5770_v1, %v5771_v46  ;;  %v5156_v42 = vcombine.low %v5774_v62, %v5775_v38  ;;  %v5780_v60 = vld [vmem:[#allocation2 + $0x6c] sm:$0xf]  ;;  %v5782_v2 = vld [vmem:[#allocation2 + $0x60] sm:$0xf]  ;;  %v5783_v52 = vld [vmem:[#allocation2 + $0x64] sm:$0xf] }
 0x1ba   : > { %5481 = vmatmul.mubr.msk.bf16.gmra.mrb[20].mxu1 %vm2952_vm3, %v2935_v12  ;;  %5533 = vmatmul.mubr.msk.bf16.gmra.mrb[4].mxu0 %vm2952_vm3, %v4239_v26  ;;  %v4241_v44 = vsel %vm1997_vm2, %v4198_v10, %v7598_v8  ;;  %v5246_v24 = vcombine.low %v5776_v55, %v5777_v34  ;;  %v4201_v59 = vsel %vm1948_vm15, %v5245_v49, %v7640_v35  ;;  %v5785_v40 = vld [vmem:[#allocation2 + $0x7c] sm:$0xf]  ;;  %v5788_v55 = vld [vmem:[#allocation2 + $0x84] sm:$0xf]  ;;  %v5789_v34 = vld [vmem:[#allocation2 + $0x88] sm:$0xf] }
 0x1bb   : > { %4102 = vrot.lane.b32.xlu0 %v5271_v43, %s5910_s27  ;;  %5484 = vmatprep.mubr.msk.bf16.mxu1 %vm2952_vm3, %v2937_v25  ;;  %v2905_v27 = vsel %vm1948_vm15, %v5155_v20, %v7611_v21  ;;  %v2908_v3 = vsel %vm1948_vm15, %v5156_v42, %v2781_v47  ;;  %v4243_v6 = vsel %vm1997_vm2, %v4201_v59, %v7627_v28  ;;  %v5784_v20 = vld [vmem:[#allocation2 + $0x78] sm:$0xf]  ;;  %v5786_v42 = vld [vmem:[#allocation2 + $0x6c] sm:$0xf] }
 0x1bc   : > { %5536 = vmatprep.mubr.msk.bf16.mxu0 %vm2952_vm3, %v4241_v44  ;;  %v2939_v8 = vsel %vm1997_vm2, %v2905_v27, %v7670_v41  ;;  %v4204_v9 = vsel %vm1948_vm15, %v5246_v24, %v7658_v11  ;;  %v2941_v32 = vsel %vm1997_vm2, %v2908_v3, %v2861_v13  ;;  %v5252_v21 = vcombine.low %v7420_v23, %v7426_v16  ;;  %v4167_v28 = vpop.permute.xlu1 %4166 }
 0x1bd   : > { %v5091_v35 = vcombine.low %v7441_v51, %v7445_v5  ;;  %v5253_v36 = vcombine.low %v7475_v48, %v7477_v33  ;;  %v5092_v41 = vcombine.low %v7523_v53, %v7535_v22  ;;  %v4245_v54 = vsel %vm1997_vm2, %v4204_v9, %v4165_v61 }
 0x1be   : > { %v2783_v56 = vpop.permute.xlu0 %2782  ;;  %v5254_v11 = vcombine.low %v7546_v19, %v7557_v17  ;;  %v5093_v4 = vcombine.low %v7574_v14, %v7579_v63  ;;  %v5255_v13 = vcombine.low %v7653_v39, %v7607_v37  ;;  %v5157_v29 = vcombine.low %v5778_v0, %v5779_v50 }
 0x1bf   : > { %1946 = vrot.lane.b32.xlu0 %v5125_v45, %s5909_s20  ;;  %v5247_v58 = vcombine.low %v5780_v60, %v5781_v30  ;;  %v5086_v57 = vcombine.low %v5782_v2, %v5783_v52  ;;  %v5248_v31 = vcombine.low %v5784_v20, %v5785_v40  ;;  %v5787_v45 = vld [vmem:[#allocation2 + $0x70] sm:$0xf]  ;;  %v5249_v24 = vcombine.low %v5788_v55, %v5789_v34  ;;  %v5794_v52 = vld [vmem:[#allocation2 + $0x84] sm:$0xf]  ;;  %s5342_s20 = sshll.u32 %s6023_s11, 7  ;;  %s7986_s11 = sand.u32 1, %s5890_s22  }
 0x1c0   : > { %v2911_v12 = vsel %vm1948_vm15, %v5157_v29, %v2783_v56  ;;  %v5087_v44 = vcombine.low %v5786_v42, %v5787_v45  ;;  %v5792_v30 = vld [vmem:[#allocation2 + $0x90] sm:$0xf]  ;;  %s7847_s13 = scalar_lea.vmem %s8081_s4, %s5342_s20  ;;  %s288_s16 = scalar_lea.vmem [#allocation3], %s7986_s11 }
 0x1c1   : > { %v8109_v42 = vld [vmem:[#allocation11_spill] sm:$0xff]  ;;  %s4860_s17 = sshll.u32 %s288_s16, 4  ;;  %s294_s15 = scalar_lea.vmem [#allocation5], %s7986_s11  ;;  %s7998_s17 = int_to_ptr.vmem [resolvable:$true] %s4860_s17 }
 0x1c2   : > { %5485 = vmatmul.mubr.msk.bf16.gmra.mrb[24].mxu1 %vm2952_vm3, %v2939_v8  ;;  %v4087_v15 = vpop.permute.xlu0 %4086  ;;  %5537 = vmatmul.mubr.msk.bf16.gmra.mrb[8].mxu0 %vm2952_vm3, %v4243_v6  ;;  %s4874_s18 = sshll.u32 %s294_s15, 4  ;;  %s8004_s20 = scalar_lea.hbm %s8083_s6, %s5337_s14  ;;  %s8006_s18 = int_to_ptr.vmem [resolvable:$true] %s4874_s18 }
 0x1c3   : > { %5488 = vmatprep.mubr.msk.bf16.mxu1 %vm2952_vm3, %v2941_v32  ;;  %5540 = vmatprep.mubr.msk.bf16.mxu0 %vm2952_vm3, %v4245_v54  ;;  %v4207_v26 = vsel %vm1948_vm15, %v5247_v58, %v4087_v15  ;;  %v5790_v32 = vld [vmem:[#allocation2 + $0x78] sm:$0xf]  ;;  %v5791_v54 = vld [vmem:[#allocation2 + $0x7c] sm:$0xf]  ;;  %v5793_v58 = vld [vmem:[#allocation2 + $0x94] sm:$0xf] }
 0x1c4   : > { %v4247_v43 = vsel %vm1997_vm2, %v4207_v26, %v4167_v28  ;;  %v5088_v28 = vcombine.low %v5790_v32, %v5791_v54  ;;  %s4840_s27 = scalar_lea.sflag [#allocation4], %s7986_s11  ;;  %s5796_s12 = scalar_lea.vmem %s7998_s17, 16 }
 0x1c5   : > { %p5797_p12 = scmp.ne.s32.totalorder %s7998_s17, %s5796_s12 }
 0x1c6   : > { %v2863_v7 = vpop.permute.xlu0 %2862  ;;  %v4089_v47 = vpop.permute.xlu1 %4088 }
 0x1c7   : > { %v2943_v18 = vsel %vm1997_vm2, %v2911_v12, %v2863_v7  ;;  %v4210_v62 = vsel %vm1948_vm15, %v5248_v31, %v4089_v47  ;;  %v5250_v12 = vcombine.low %v5792_v30, %v5793_v58  ;;  %p5798_p13 = pnand %p5797_p12, %p5988_p4 }
 0x1c9   : > { %p5799_p0 = pneg %p5798_p13 }
 0x1ca   : > { %5489 = vmatmul.mubr.msk.bf16.gmra.mrb[28].mxu1 %vm2952_vm3, %v2943_v18  ;;  %v1853_v25 = vpop.permute.xlu0 %1852  ;;  %5541 = vmatmul.mubr.msk.bf16.gmra.mrb[12].mxu0 %vm2952_vm3, %v4247_v43  ;;  %v1933_v1 = vpop.permute.xlu1 %1932  ;;  %v8106_v43 = vld [vmem:[#allocation10_spill] sm:$0xff] }
 0x1cb   : > { %v1975_v10 = vsel %vm1948_vm15, %v5086_v57, %v1853_v25  ;;  %v5795_v57 = vld [vmem:[#allocation2 + $0x88] sm:$0xf]  ;;  %v8107_v25 = vld [vmem:[#allocation9_spill] sm:$0xff] }
 0x1cc   : > { %v2015_v46 = vsel %vm1997_vm2, %v1975_v10, %v1933_v1  ;;  %v5089_v47 = vcombine.low %v5794_v52, %v5795_v57  ;;  %v5251_v10 = vcombine.low %v8107_v25, %v8106_v43 }
 0x1cd   : > { %5510 = vmatprep.mubr.msk.bf16.mxu1 %vm2952_vm3, %v2015_v46 }
 0x1ce   : > { %v1855_v49 = vpop.permute.xlu0 %1854 }
 0x1cf   : > { %v1978_v59 = vsel %vm1948_vm15, %v5087_v44, %v1855_v49 }
 0x1d1   : > { %v4169_v38 = vpop.permute.xlu1 %4168 }
 0x1d2   : > { %v4091_v61 = vpop.permute.xlu0 %4090  ;;  %v4249_v27 = vsel %vm1997_vm2, %v4210_v62, %v4169_v38  ;;  %v8108_v38 = vld [vmem:[#allocation12_spill] sm:$0xff] }
 0x1d3   : > { %5544 = vmatprep.mubr.msk.bf16.mxu0 %vm2952_vm3, %v4249_v27  ;;  %v4213_v3 = vsel %vm1948_vm15, %v5249_v24, %v4091_v61  ;;  %v5090_v45 = vcombine.low %v8109_v42, %v8108_v38 }
 0x1d6   : > { %v1935_v56 = vpop.permute.xlu0 %1934  ;;  %v4171_v8 = vpop.permute.xlu1 %4170 }
 0x1d7   : > { %v2017_v6 = vsel %vm1997_vm2, %v1978_v59, %v1935_v56  ;;  %v4251_v9 = vsel %vm1997_vm2, %v4213_v3, %v4171_v8 }
 0x1d8   : > { %5511 = vmatmul.mubr.msk.bf16.vlgmr.msra.gmra.mrb[16].mxu1 %vm2952_vm3, %v2017_v6  ;;  %5545 = vmatmul.mubr.msk.bf16.gmra.mrb[16].mxu0 %vm2952_vm3, %v4251_v9 }
 0x1dd   : > { %v1857_v50 = vpop.permute.xlu0 %1856 }
 0x1de   : > { %v1981_v29 = vsel %vm1948_vm15, %v5088_v28, %v1857_v50 }
 0x1e1   : > { %v4093_v0 = vpop.permute.xlu1 %4092 }
 0x1e2   : > { %v4216_v26 = vsel %vm1948_vm15, %v5250_v12, %v4093_v0 }
 0x1e5   : > { %v1937_v15 = vpop.permute.xlu1 %1936 }
 0x1e6   : > { %v2019_v60 = vsel %vm1997_vm2, %v1981_v29, %v1937_v15 }
 0x1e7   : > { %5514 = vmatprep.mubr.msk.bf16.mxu1 %vm2952_vm3, %v2019_v60  ;;  %v1859_v7 = vpop.permute.xlu0 %1858 }
 0x1e8   : > { %v1984_v46 = vsel %vm1948_vm15, %v5089_v47, %v1859_v7 }
 0x1ec   : > { %v4173_v18 = vpop.permute.xlu1 %4172 }
 0x1ed   : > { %v4253_v2 = vsel %vm1997_vm2, %v4216_v26, %v4173_v18 }
 0x1ee   : > { %5548 = vmatprep.mubr.msk.bf16.mxu0 %vm2952_vm3, %v4253_v2 }
 0x1ef   : > { %v4095_v1 = vpop.permute.xlu0 %4094 }
 0x1f0   : > { %v4219_v20 = vsel %vm1948_vm15, %v5251_v10, %v4095_v1 }
 0x1f3   : > { %v1939_v40 = vpop.permute.xlu0 %1938  ;;  %v4175_v31 = vpop.permute.xlu1 %4174 }
 0x1f4   : > { %v2021_v49 = vsel %vm1997_vm2, %v1984_v46, %v1939_v40  ;;  %v4255_v62 = vsel %vm1997_vm2, %v4219_v20, %v4175_v31 }
 0x1f5   : > { %5515 = vmatmul.mubr.msk.bf16.gmra.mrb[20].mxu1 %vm2952_vm3, %v2021_v49  ;;  %5549 = vmatmul.mubr.msk.bf16.gmra.mrb[20].mxu0 %vm2952_vm3, %v4255_v62 }
 0x1fb   : > { %v1861_v55 = vpop.permute.xlu0 %1860 }
 0x1fc   : > { %v1987_v34 = vsel %vm1948_vm15, %v5090_v45, %v1861_v55 }
 0x1fe   : > { %v4097_v44 = vpop.permute.xlu1 %4096 }
 0x1ff   : > { %v4222_v59 = vsel %vm1948_vm15, %v5252_v21, %v4097_v44 }
 0x202   : > { %v1941_v24 = vpop.permute.xlu1 %1940 }
 0x203   : > { %v2023_v61 = vsel %vm1997_vm2, %v1987_v34, %v1941_v24 }
 0x204   : > { %5518 = vmatprep.mubr.msk.bf16.mxu1 %vm2952_vm3, %v2023_v61 }
 0x205   : > { %v1863_v27 = vpop.permute.xlu0 %1862 }
 0x206   : > { %v1990_v32 = vsel %vm1948_vm15, %v5091_v35, %v1863_v27 }
 0x209   : > { %v4177_v3 = vpop.permute.xlu1 %4176 }
 0x20a   : > { %v4257_v56 = vsel %vm1997_vm2, %v4222_v59, %v4177_v3 }
 0x20b   : > { %5552 = vmatprep.mubr.msk.bf16.mxu0 %vm2952_vm3, %v4257_v56 }
 0x20c   : > { %v4099_v8 = vpop.permute.xlu0 %4098 }
 0x20d   : > { %v4225_v6 = vsel %vm1948_vm15, %v5253_v36, %v4099_v8 }
 0x20f   : > { %v4179_v9 = vpop.permute.xlu1 %4178 }
 0x210   : > { %v1943_v23 = vpop.permute.xlu0 %1942  ;;  %v4259_v16 = vsel %vm1997_vm2, %v4225_v6, %v4179_v9 }
 0x211   : > { %v2025_v21 = vsel %vm1997_vm2, %v1990_v32, %v1943_v23  ;;  %5553 = vmatmul.mubr.msk.bf16.gmra.mrb[24].mxu0 %vm2952_vm3, %v4259_v16 }
 0x212   : > { %5519 = vmatmul.mubr.msk.bf16.gmra.mrb[24].mxu1 %vm2952_vm3, %v2025_v21 }
 0x216   : > { %v1865_v28 = vpop.permute.xlu0 %1864 }
 0x217   : > { %v1993_v48 = vsel %vm1948_vm15, %v5092_v41, %v1865_v28 }
 0x21a   : > { %v4101_v54 = vpop.permute.xlu1 %4100 }
 0x21b   : > { %v4228_v5 = vsel %vm1948_vm15, %v5254_v11, %v4101_v54 }
 0x21e   : > { %v1945_v33 = vpop.permute.xlu1 %1944 }
 0x21f   : > { %v2027_v51 = vsel %vm1997_vm2, %v1993_v48, %v1945_v33  ;;  %v1867_v50 = vpop.permute.xlu0 %1866 }
 0x220   : > { %5522 = vmatprep.mubr.msk.bf16.mxu1 %vm2952_vm3, %v2027_v51  ;;  %v1996_v17 = vsel %vm1948_vm15, %v5093_v4, %v1867_v50 }
 0x223   : > { %v4181_v35 = vpop.permute.xlu1 %4180 }
 0x224   : > { %v4261_v36 = vsel %vm1997_vm2, %v4228_v5, %v4181_v35 }
 0x225   : > { %5556 = vmatprep.mubr.msk.bf16.mxu0 %vm2952_vm3, %v4261_v36 }
 0x226   : > { %v5462_v0 = vpop.f32.mrb[0].mxu1 }
 0x227   : > { %v3023_v53 = vpop.f32.mrb[1].mxu1  ;;  %v4183_v29 = vpop.permute.xlu1 %4182 }
 0x228   : > { %v5463_v22 = vpop.f32.mrb[2].mxu1 }
 0x229   : > { %v3026_v41 = vpop.f32.mrb[3].mxu1 }
 0x22d   : > { %v4103_v15 = vpop.permute.xlu0 %4102 }
 0x22e   : > { %v4231_v60 = vsel %vm1948_vm15, %v5255_v13, %v4103_v15 }
 0x22f   : > { %v4263_v19 = vsel %vm1997_vm2, %v4231_v60, %v4183_v29 }
 0x230   : > { %5557 = vmatmul.mubr.msk.bf16.gmra.mrb[28].mxu0 %vm2952_vm3, %v4263_v19 }
 0x231   : > { %v1947_v11 = vpop.permute.xlu0 %1946 }
 0x232   : > { %v2029_v30 = vsel %vm1997_vm2, %v1996_v17, %v1947_v11 }
 0x233   : > { %5523 = vmatmul.mubr.msk.bf16.gmra.mrb[28].mxu1 %vm2952_vm3, %v2029_v30 }
 0x24a   : > { %v5466_v58 = vpop.f32.mrb[4].mxu1 }
 0x24b   : > { %v3039_v12 = vpop.f32.mrb[5].mxu1 }
 0x24c   : > { %v5467_v37 = vpop.f32.mrb[6].mxu1 }
 0x24d   : > { %v3042_v39 = vpop.f32.mrb[7].mxu1 }
 0x252   : > { %v7827_v13 = vpop.f32.mrb[8].mxu1 }
 0x253   : > { %v7829_v7 = vpop.f32.mrb[9].mxu1 }
 0x254   : > { %v7831_v26 = vpop.f32.mrb[10].mxu1 }
 0x255   : > { %v7833_v18 = vpop.f32.mrb[11].mxu1 }
 0x26b   : > { %v7835_v14 = vpop.f32.mrb[12].mxu1 }
 0x26c   : > { %v7837_v63 = vpop.f32.mrb[13].mxu1 }
 0x26d   : > { %v7839_v4 = vpop.f32.mrb[14].mxu1 }
 0x26e   : > { %v7841_v2 = vpop.f32.mrb[15].mxu1 }
 0x285   : > { %v5530_v52 = vpop.f32.mrb[0].mxu0 }
 0x286   : > { %v5562_v57 = vadd.f32 %v5530_v52, %v5462_v0  ;;  %v4340_v47 = vpop.f32.mrb[1].mxu0 }
 0x287   : > { %v5563_v43 = vadd.f32 %v4340_v47, %v3023_v53  ;;  %v5531_v25 = vpop.f32.mrb[2].mxu0 }
 0x288   : > { %v5377_v10 = vpack.c.bf16 %v5562_v57, %v5562_v57  ;;  %v5564_v1 = vadd.f32 %v5531_v25, %v5463_v22  ;;  %v4343_v46 = vpop.f32.mrb[3].mxu0  ;;  %v4731_v49 = vmul.f32 %v5562_v57, %v5562_v57  ;;  %v4662_v24 = vsel %vm1948_vm15, %v5562_v57, 0.0 }
 0x289   : > { %v5375_v20 = vpack.c.bf16 %v5563_v43, %v5563_v43  ;;  %v4729_v40 = vmul.f32 %v5563_v43, %v5563_v43  ;;  %v5565_v31 = vadd.f32 %v4343_v46, %v3026_v41  ;;  %v4659_v38 = vsel %vm1948_vm15, %v5563_v43, 0.0 }
 0x28a   : > { %4629 = vst.msk [vmem:[%s7847_s13 + $0x8] sm:$0xf] %vm455_vm0, %v5377_v10  ;;  %v5378_v62 = vpack.c.bf16 %v5564_v1, %v5564_v1  ;;  %v4732_v55 = vmul.f32 %v5564_v1, %v5564_v1  ;;  %v4764_v9 = vsel %vm1948_vm15, %v4731_v49, 0.0  ;;  %v4664_v16 = vsel %vm1948_vm15, %v5564_v1, 0.0 }
 0x28b   : > { %4627 = vst.msk [vmem:[%s7847_s13] sm:$0xf] %vm455_vm0, %v5375_v20  ;;  %v5376_v42 = vpack.c.bf16 %v5565_v31, %v5565_v31  ;;  %v4660_v45 = vsel %vm1948_vm15, %v5565_v31, 0.0  ;;  %v4730_v44 = vmul.f32 %v5565_v31, %v5565_v31  ;;  %v4761_v61 = vsel %vm1948_vm15, %v4729_v40, 0.0 }
 0x28c   : > { %4630 = vst.msk [vmem:[%s7847_s13 + $0xc] sm:$0xf] %vm455_vm0, %v5378_v62  ;;  %v4661_v34 = vadd.f32 %v4660_v45, %v4659_v38  ;;  %v4766_v21 = vsel %vm1948_vm15, %v4732_v55, 0.0 }
 0x28d   : > { %4628 = vst.msk [vmem:[%s7847_s13 + $0x4] sm:$0xf] %vm455_vm0, %v5376_v42  ;;  %v4762_v27 = vsel %vm1948_vm15, %v4730_v44, 0.0  ;;  %v5534_v59 = vpop.f32.mrb[4].mxu0 }
 0x28e   : > { %v4663_v3 = vadd.f32 %v4662_v24, %v4661_v34  ;;  %v4763_v56 = vadd.f32 %v4762_v27, %v4761_v61  ;;  %v5566_v8 = vadd.f32 %v5534_v59, %v5466_v58  ;;  %v4356_v6 = vpop.f32.mrb[5].mxu0 }
 0x28f   : > { %v5567_v32 = vadd.f32 %v4356_v6, %v3039_v12  ;;  %v5535_v23 = vpop.f32.mrb[6].mxu0 }
 0x290   : > { %v4765_v54 = vadd.f32 %v4764_v9, %v4763_v56  ;;  %v5381_v28 = vpack.c.bf16 %v5566_v8, %v5566_v8  ;;  %v4359_v48 = vpop.f32.mrb[7].mxu0  ;;  %v4665_v51 = vadd.f32 %v4664_v16, %v4663_v3  ;;  %v5568_v0 = vadd.f32 %v5535_v23, %v5467_v37 }
 0x291   : > { %v5379_v33 = vpack.c.bf16 %v5567_v32, %v5567_v32  ;;  %v4666_v5 = vsel %vm1948_vm15, %v5567_v32, 0.0  ;;  %v4733_v35 = vmul.f32 %v5567_v32, %v5567_v32  ;;  %v5569_v50 = vadd.f32 %v4359_v48, %v3042_v39 }
 0x292   : > { %4633 = vst.msk [vmem:[%s7847_s13 + $0x18] sm:$0xf] %vm455_vm0, %v5381_v28  ;;  %v4767_v36 = vadd.f32 %v4766_v21, %v4765_v54  ;;  %v4667_v53 = vadd.f32 %v4666_v5, %v4665_v51  ;;  %v4735_v41 = vmul.f32 %v5566_v8, %v5566_v8  ;;  %v5382_v15 = vpack.c.bf16 %v5568_v0, %v5568_v0 }
 0x293   : > { %4631 = vst.msk [vmem:[%s7847_s13 + $0x10] sm:$0xf] %vm455_vm0, %v5379_v33  ;;  %v4768_v22 = vsel %vm1948_vm15, %v4733_v35, 0.0  ;;  %v5380_v60 = vpack.c.bf16 %v5569_v50, %v5569_v50  ;;  %v4668_v19 = vsel %vm1948_vm15, %v5569_v50, 0.0  ;;  %v4734_v17 = vmul.f32 %v5569_v50, %v5569_v50 }
 0x294   : > { %v4769_v29 = vadd.f32 %v4768_v22, %v4767_v36  ;;  %4634 = vst.msk [vmem:[%s7847_s13 + $0x1c] sm:$0xf] %vm455_vm0, %v5382_v15  ;;  %v4669_v30 = vadd.f32 %v4668_v19, %v4667_v53  ;;  %v4670_v37 = vsel %vm1948_vm15, %v5566_v8, 0.0  ;;  %v4736_v39 = vmul.f32 %v5568_v0, %v5568_v0 }
 0x295   : > { %v5538_v11 = vpop.f32.mrb[8].mxu0  ;;  %4632 = vst.msk [vmem:[%s7847_s13 + $0x14] sm:$0xf] %vm455_vm0, %v5380_v60  ;;  %v4770_v52 = vsel %vm1948_vm15, %v4734_v17, 0.0  ;;  %v4772_v43 = vsel %vm1948_vm15, %v4735_v41, 0.0 }
 0x296   : > { %v5570_v58 = vadd.f32 %v5538_v11, %v7827_v13  ;;  %v4372_v12 = vpop.f32.mrb[9].mxu0  ;;  %v4671_v25 = vadd.f32 %v4670_v37, %v4669_v30  ;;  %v4771_v10 = vadd.f32 %v4770_v52, %v4769_v29  ;;  %v4672_v13 = vsel %vm1948_vm15, %v5568_v0, 0.0 }
 0x297   : > { %v5571_v57 = vadd.f32 %v4372_v12, %v7829_v7  ;;  %v5539_v47 = vpop.f32.mrb[10].mxu0  ;;  %v4774_v42 = vsel %vm1948_vm15, %v4736_v39, 0.0 }
 0x298   : > { %v5385_v1 = vpack.c.bf16 %v5570_v58, %v5570_v58  ;;  %v4375_v46 = vpop.f32.mrb[11].mxu0  ;;  %v4773_v49 = vadd.f32 %v4772_v43, %v4771_v10  ;;  %v4673_v62 = vadd.f32 %v4672_v13, %v4671_v25  ;;  %v5572_v7 = vadd.f32 %v5539_v47, %v7831_v26 }
 0x299   : > { %v5383_v20 = vpack.c.bf16 %v5571_v57, %v5571_v57  ;;  %v4674_v40 = vsel %vm1948_vm15, %v5571_v57, 0.0  ;;  %v4737_v31 = vmul.f32 %v5571_v57, %v5571_v57  ;;  %v5573_v38 = vadd.f32 %v4375_v46, %v7833_v18 }
 0x29a   : > { %4637 = vst.msk [vmem:[%s7847_s13 + $0x28] sm:$0xf] %vm455_vm0, %v5385_v1  ;;  %v4739_v44 = vmul.f32 %v5570_v58, %v5570_v58  ;;  %v4675_v55 = vadd.f32 %v4674_v40, %v4673_v62  ;;  %v4775_v34 = vadd.f32 %v4774_v42, %v4773_v49  ;;  %v5386_v24 = vpack.c.bf16 %v5572_v7, %v5572_v7 }
 0x29b   : > { %4635 = vst.msk [vmem:[%s7847_s13 + $0x20] sm:$0xf] %vm455_vm0, %v5383_v20  ;;  %v4776_v45 = vsel %vm1948_vm15, %v4737_v31, 0.0  ;;  %v5384_v61 = vpack.c.bf16 %v5573_v38, %v5573_v38  ;;  %v4676_v27 = vsel %vm1948_vm15, %v5573_v38, 0.0  ;;  %v4738_v59 = vmul.f32 %v5573_v38, %v5573_v38 }
 0x29c   : > { %v4777_v56 = vadd.f32 %v4776_v45, %v4775_v34  ;;  %4638 = vst.msk [vmem:[%s7847_s13 + $0x2c] sm:$0xf] %vm455_vm0, %v5386_v24  ;;  %v4677_v26 = vadd.f32 %v4676_v27, %v4675_v55  ;;  %v4678_v6 = vsel %vm1948_vm15, %v5570_v58, 0.0  ;;  %v4740_v9 = vmul.f32 %v5572_v7, %v5572_v7 }
 0x29d   : > { %v5542_v3 = vpop.f32.mrb[12].mxu0  ;;  %4636 = vst.msk [vmem:[%s7847_s13 + $0x24] sm:$0xf] %vm455_vm0, %v5384_v61  ;;  %v4778_v32 = vsel %vm1948_vm15, %v4738_v59, 0.0  ;;  %v4780_v21 = vsel %vm1948_vm15, %v4739_v44, 0.0 }
 0x29e   : > { %v5574_v18 = vadd.f32 %v5542_v3, %v7835_v14  ;;  %v4388_v8 = vpop.f32.mrb[13].mxu0  ;;  %v4679_v54 = vadd.f32 %v4678_v6, %v4677_v26  ;;  %v4779_v28 = vadd.f32 %v4778_v32, %v4777_v56  ;;  %v4680_v14 = vsel %vm1948_vm15, %v5572_v7, 0.0 }
 0x29f   : > { %v5575_v23 = vadd.f32 %v4388_v8, %v7837_v63  ;;  %v5543_v16 = vpop.f32.mrb[14].mxu0  ;;  %v4782_v53 = vsel %vm1948_vm15, %v4740_v9, 0.0 }
 0x2a0   : > { %v5389_v48 = vpack.c.bf16 %v5574_v18, %v5574_v18  ;;  %v4391_v33 = vpop.f32.mrb[15].mxu0  ;;  %v4781_v36 = vadd.f32 %v4780_v21, %v4779_v28  ;;  %v4681_v0 = vadd.f32 %v4680_v14, %v4679_v54  ;;  %v5576_v63 = vadd.f32 %v5543_v16, %v7839_v4 }
 0x2a1   : > { %v5387_v51 = vpack.c.bf16 %v5575_v23, %v5575_v23  ;;  %v4682_v5 = vsel %vm1948_vm15, %v5575_v23, 0.0  ;;  %v4741_v35 = vmul.f32 %v5575_v23, %v5575_v23  ;;  %v5577_v50 = vadd.f32 %v4391_v33, %v7841_v2 }
 0x2a2   : > { %4641 = vst.msk [vmem:[%s7847_s13 + $0x38] sm:$0xf] %vm455_vm0, %v5389_v48  ;;  %v4683_v41 = vadd.f32 %v4682_v5, %v4681_v0  ;;  %v4783_v29 = vadd.f32 %v4782_v53, %v4781_v36  ;;  %v5390_v15 = vpack.c.bf16 %v5576_v63, %v5576_v63  ;;  %v4743_v60 = vmul.f32 %v5574_v18, %v5574_v18 }
 0x2a3   : > { %4639 = vst.msk [vmem:[%s7847_s13 + $0x30] sm:$0xf] %vm455_vm0, %v5387_v51  ;;  %v4784_v22 = vsel %vm1948_vm15, %v4741_v35, 0.0  ;;  %v5388_v19 = vpack.c.bf16 %v5577_v50, %v5577_v50  ;;  %v4684_v17 = vsel %vm1948_vm15, %v5577_v50, 0.0  ;;  %v4742_v11 = vmul.f32 %v5577_v50, %v5577_v50 }
 0x2a4   : > { %v4785_v30 = vadd.f32 %v4784_v22, %v4783_v29  ;;  %4642 = vst.msk [vmem:[%s7847_s13 + $0x3c] sm:$0xf] %vm455_vm0, %v5390_v15  ;;  %v4685_v4 = vadd.f32 %v4684_v17, %v4683_v41  ;;  %v4686_v2 = vsel %vm1948_vm15, %v5574_v18, 0.0  ;;  %v4744_v58 = vmul.f32 %v5576_v63, %v5576_v63 }
 0x2a5   : > { %4640 = vst.msk [vmem:[%s7847_s13 + $0x34] sm:$0xf] %vm455_vm0, %v5388_v19  ;;  %v4786_v12 = vsel %vm1948_vm15, %v4742_v11, 0.0  ;;  %v4788_v52 = vsel %vm1948_vm15, %v4743_v60, 0.0  ;;  %v4688_v57 = vsel %vm1948_vm15, %v5576_v63, 0.0 }
 0x2a6   : > { %v4687_v37 = vadd.f32 %v4686_v2, %v4685_v4  ;;  %v4787_v39 = vadd.f32 %v4786_v12, %v4785_v30  ;;  %v4790_v1 = vsel %vm1948_vm15, %v4744_v58, 0.0 }
 0x2a8   : > { %v4789_v47 = vadd.f32 %v4788_v52, %v4787_v39  ;;  %v4689_v10 = vadd.f32 %v4688_v57, %v4687_v37 }
 0x2aa   : > { %v4791_v31 = vadd.f32 %v4790_v1, %v4789_v47 }
 0x2ab   : > { %v5512_v43 = vpop.f32.mrb[16].mxu1  ;;  %v5546_v25 = vpop.f32.mrb[16].mxu0 }
 0x2ac   : > { %v5578_v46 = vadd.f32 %v5546_v25, %v5512_v43  ;;  %v3288_v13 = vpop.f32.mrb[17].mxu1  ;;  %v4404_v20 = vpop.f32.mrb[17].mxu0 }
 0x2ad   : > { %v5579_v40 = vadd.f32 %v4404_v20, %v3288_v13  ;;  %v5513_v49 = vpop.f32.mrb[18].mxu1  ;;  %v5547_v62 = vpop.f32.mrb[18].mxu0 }
 0x2ae   : > { %v5393_v7 = vpack.c.bf16 %v5578_v46, %v5578_v46  ;;  %v5580_v38 = vadd.f32 %v5547_v62, %v5513_v49  ;;  %v3291_v42 = vpop.f32.mrb[19].mxu1  ;;  %v4407_v45 = vpop.f32.mrb[19].mxu0  ;;  %v4747_v26 = vmul.f32 %v5578_v46, %v5578_v46  ;;  %v4694_v9 = vsel %vm1948_vm15, %v5578_v46, 0.0 }
 0x2af   : > { %v5391_v44 = vpack.c.bf16 %v5579_v40, %v5579_v40  ;;  %v4690_v55 = vsel %vm1948_vm15, %v5579_v40, 0.0  ;;  %v4745_v34 = vmul.f32 %v5579_v40, %v5579_v40  ;;  %v5581_v24 = vadd.f32 %v4407_v45, %v3291_v42 }
 0x2b0   : > { %4645 = vst.msk [vmem:[%s7847_s13 + $0x48] sm:$0xf] %vm455_vm0, %v5393_v7  ;;  %v4691_v61 = vadd.f32 %v4690_v55, %v4689_v10  ;;  %v5394_v27 = vpack.c.bf16 %v5580_v38, %v5580_v38  ;;  %v4748_v32 = vmul.f32 %v5580_v38, %v5580_v38  ;;  %v4696_v21 = vsel %vm1948_vm15, %v5580_v38, 0.0 }
 0x2b1   : > { %4643 = vst.msk [vmem:[%s7847_s13 + $0x40] sm:$0xf] %vm455_vm0, %v5391_v44  ;;  %v4792_v59 = vsel %vm1948_vm15, %v4745_v34, 0.0  ;;  %v5392_v3 = vpack.c.bf16 %v5581_v24, %v5581_v24  ;;  %v4692_v56 = vsel %vm1948_vm15, %v5581_v24, 0.0  ;;  %v4746_v6 = vmul.f32 %v5581_v24, %v5581_v24 }
 0x2b2   : > { %v4793_v18 = vadd.f32 %v4792_v59, %v4791_v31  ;;  %4646 = vst.msk [vmem:[%s7847_s13 + $0x4c] sm:$0xf] %vm455_vm0, %v5394_v27  ;;  %v4693_v8 = vadd.f32 %v4692_v56, %v4691_v61  ;;  %v4796_v28 = vsel %vm1948_vm15, %v4747_v26, 0.0  ;;  %v4798_v14 = vsel %vm1948_vm15, %v4748_v32, 0.0 }
 0x2b3   : > { %4644 = vst.msk [vmem:[%s7847_s13 + $0x44] sm:$0xf] %vm455_vm0, %v5392_v3  ;;  %v4794_v16 = vsel %vm1948_vm15, %v4746_v6, 0.0 }
 0x2b4   : > { %v4695_v23 = vadd.f32 %v4694_v9, %v4693_v8  ;;  %v4795_v54 = vadd.f32 %v4794_v16, %v4793_v18 }
 0x2b6   : > { %v4697_v48 = vadd.f32 %v4696_v21, %v4695_v23  ;;  %v4797_v33 = vadd.f32 %v4796_v28, %v4795_v54 }
 0x2b8   : > { %v4799_v51 = vadd.f32 %v4798_v14, %v4797_v33 }
 0x2c8   : > { %v5516_v5 = vpop.f32.mrb[20].mxu1  ;;  %v5550_v35 = vpop.f32.mrb[20].mxu0 }
 0x2c9   : > { %v5582_v36 = vadd.f32 %v5550_v35, %v5516_v5  ;;  %v3304_v0 = vpop.f32.mrb[21].mxu1  ;;  %v4420_v63 = vpop.f32.mrb[21].mxu0 }
 0x2ca   : > { %v5583_v50 = vadd.f32 %v4420_v63, %v3304_v0  ;;  %v5517_v53 = vpop.f32.mrb[22].mxu1  ;;  %v5551_v22 = vpop.f32.mrb[22].mxu0 }
 0x2cb   : > { %v5397_v41 = vpack.c.bf16 %v5582_v36, %v5582_v36  ;;  %v5584_v29 = vadd.f32 %v5551_v22, %v5517_v53  ;;  %v3307_v15 = vpop.f32.mrb[23].mxu1  ;;  %v4423_v60 = vpop.f32.mrb[23].mxu0  ;;  %v4751_v39 = vmul.f32 %v5582_v36, %v5582_v36  ;;  %v4702_v43 = vsel %vm1948_vm15, %v5582_v36, 0.0 }
 0x2cc   : > { %v5395_v19 = vpack.c.bf16 %v5583_v50, %v5583_v50  ;;  %v4698_v17 = vsel %vm1948_vm15, %v5583_v50, 0.0  ;;  %v4749_v11 = vmul.f32 %v5583_v50, %v5583_v50  ;;  %v5585_v30 = vadd.f32 %v4423_v60, %v3307_v15 }
 0x2cd   : > { %4649 = vst.msk [vmem:[%s7847_s13 + $0x58] sm:$0xf] %vm455_vm0, %v5397_v41  ;;  %v4699_v4 = vadd.f32 %v4698_v17, %v4697_v48  ;;  %v5398_v2 = vpack.c.bf16 %v5584_v29, %v5584_v29  ;;  %v4752_v25 = vmul.f32 %v5584_v29, %v5584_v29  ;;  %v4704_v46 = vsel %vm1948_vm15, %v5584_v29, 0.0 }
 0x2ce   : > { %4647 = vst.msk [vmem:[%s7847_s13 + $0x50] sm:$0xf] %vm455_vm0, %v5395_v19  ;;  %v4800_v58 = vsel %vm1948_vm15, %v4749_v11, 0.0  ;;  %v5396_v12 = vpack.c.bf16 %v5585_v30, %v5585_v30  ;;  %v4700_v37 = vsel %vm1948_vm15, %v5585_v30, 0.0  ;;  %v4750_v47 = vmul.f32 %v5585_v30, %v5585_v30 }
 0x2cf   : > { %v4801_v52 = vadd.f32 %v4800_v58, %v4799_v51  ;;  %4650 = vst.msk [vmem:[%s7847_s13 + $0x5c] sm:$0xf] %vm455_vm0, %v5398_v2  ;;  %v4701_v57 = vadd.f32 %v4700_v37, %v4699_v4  ;;  %v4804_v20 = vsel %vm1948_vm15, %v4751_v39, 0.0  ;;  %v4806_v49 = vsel %vm1948_vm15, %v4752_v25, 0.0 }
 0x2d0   : > { %4648 = vst.msk [vmem:[%s7847_s13 + $0x54] sm:$0xf] %vm455_vm0, %v5396_v12  ;;  %v4802_v1 = vsel %vm1948_vm15, %v4750_v47, 0.0 }
 0x2d1   : > { %v4703_v10 = vadd.f32 %v4702_v43, %v4701_v57  ;;  %v4803_v13 = vadd.f32 %v4802_v1, %v4801_v52 }
 0x2d3   : > { %v4705_v40 = vadd.f32 %v4704_v46, %v4703_v10  ;;  %v4805_v31 = vadd.f32 %v4804_v20, %v4803_v13 }
 0x2d5   : > { %v4807_v62 = vadd.f32 %v4806_v49, %v4805_v31 }
 0x2e4   : > { %v5554_v7 = vpop.f32.mrb[24].mxu0 }
 0x2e5   : > { %v5520_v38 = vpop.f32.mrb[24].mxu1  ;;  %v4436_v42 = vpop.f32.mrb[25].mxu0 }
 0x2e6   : > { %v5586_v45 = vadd.f32 %v5554_v7, %v5520_v38  ;;  %v3320_v44 = vpop.f32.mrb[25].mxu1  ;;  %v5555_v55 = vpop.f32.mrb[26].mxu0 }
 0x2e7   : > { %v5587_v34 = vadd.f32 %v4436_v42, %v3320_v44  ;;  %v5521_v24 = vpop.f32.mrb[26].mxu1  ;;  %v4439_v61 = vpop.f32.mrb[27].mxu0 }
 0x2e8   : > { %v5401_v27 = vpack.c.bf16 %v5586_v45, %v5586_v45  ;;  %v5588_v59 = vadd.f32 %v5555_v55, %v5521_v24  ;;  %v3323_v3 = vpop.f32.mrb[27].mxu1  ;;  %v4755_v21 = vmul.f32 %v5586_v45, %v5586_v45  ;;  %v4710_v33 = vsel %vm1948_vm15, %v5586_v45, 0.0 }
 0x2e9   : > { %v5399_v56 = vpack.c.bf16 %v5587_v34, %v5587_v34  ;;  %v4706_v26 = vsel %vm1948_vm15, %v5587_v34, 0.0  ;;  %v4753_v18 = vmul.f32 %v5587_v34, %v5587_v34  ;;  %v5589_v8 = vadd.f32 %v4439_v61, %v3323_v3 }
 0x2ea   : > { %4653 = vst.msk [vmem:[%s7847_s13 + $0x68] sm:$0xf] %vm455_vm0, %v5401_v27  ;;  %v4707_v6 = vadd.f32 %v4706_v26, %v4705_v40  ;;  %v5402_v9 = vpack.c.bf16 %v5588_v59, %v5588_v59  ;;  %v4756_v14 = vmul.f32 %v5588_v59, %v5588_v59  ;;  %v4712_v35 = vsel %vm1948_vm15, %v5588_v59, 0.0 }
 0x2eb   : > { %4651 = vst.msk [vmem:[%s7847_s13 + $0x60] sm:$0xf] %vm455_vm0, %v5399_v56  ;;  %v4808_v32 = vsel %vm1948_vm15, %v4753_v18, 0.0  ;;  %v5400_v23 = vpack.c.bf16 %v5589_v8, %v5589_v8  ;;  %v4708_v16 = vsel %vm1948_vm15, %v5589_v8, 0.0  ;;  %v4754_v48 = vmul.f32 %v5589_v8, %v5589_v8 }
 0x2ec   : > { %v4809_v54 = vadd.f32 %v4808_v32, %v4807_v62  ;;  %4654 = vst.msk [vmem:[%s7847_s13 + $0x6c] sm:$0xf] %vm455_vm0, %v5402_v9  ;;  %v4709_v28 = vadd.f32 %v4708_v16, %v4707_v6  ;;  %v4812_v0 = vsel %vm1948_vm15, %v4755_v21, 0.0  ;;  %v4814_v53 = vsel %vm1948_vm15, %v4756_v14, 0.0 }
 0x2ed   : > { %4652 = vst.msk [vmem:[%s7847_s13 + $0x64] sm:$0xf] %vm455_vm0, %v5400_v23  ;;  %v4810_v5 = vsel %vm1948_vm15, %v4754_v48, 0.0 }
 0x2ee   : > { %v4711_v51 = vadd.f32 %v4710_v33, %v4709_v28  ;;  %v4811_v36 = vadd.f32 %v4810_v5, %v4809_v54 }
 0x2f0   : > { %v4713_v63 = vadd.f32 %v4712_v35, %v4711_v51  ;;  %v4813_v50 = vadd.f32 %v4812_v0, %v4811_v36 }
 0x2f2   : > { %v4815_v22 = vadd.f32 %v4814_v53, %v4813_v50 }
 0x303   : > { %v5558_v41 = vpop.f32.mrb[28].mxu0 }
 0x304   : > { %v4452_v29 = vpop.f32.mrb[29].mxu0 }
 0x305   : > { %v5559_v15 = vpop.f32.mrb[30].mxu0 }
 0x306   : > { %v5524_v60 = vpop.f32.mrb[28].mxu1  ;;  %v4455_v19 = vpop.f32.mrb[31].mxu0 }
 0x307   : > { %v5590_v17 = vadd.f32 %v5558_v41, %v5524_v60  ;;  %v3336_v11 = vpop.f32.mrb[29].mxu1 }
 0x308   : > { %v5591_v30 = vadd.f32 %v4452_v29, %v3336_v11  ;;  %v5525_v4 = vpop.f32.mrb[30].mxu1 }
 0x309   : > { %v5405_v2 = vpack.c.bf16 %v5590_v17, %v5590_v17  ;;  %v5592_v58 = vadd.f32 %v5559_v15, %v5525_v4  ;;  %v3339_v12 = vpop.f32.mrb[31].mxu1  ;;  %v4759_v46 = vmul.f32 %v5590_v17, %v5590_v17  ;;  %v4718_v31 = vsel %vm1948_vm15, %v5590_v17, 0.0 }
 0x30a   : > { %v5403_v37 = vpack.c.bf16 %v5591_v30, %v5591_v30  ;;  %v4714_v39 = vsel %vm1948_vm15, %v5591_v30, 0.0  ;;  %v4757_v52 = vmul.f32 %v5591_v30, %v5591_v30  ;;  %v5593_v57 = vadd.f32 %v4455_v19, %v3339_v12 }
 0x30b   : > { %4657 = vst.msk [vmem:[%s7847_s13 + $0x78] sm:$0xf] %vm455_vm0, %v5405_v2  ;;  %v4715_v47 = vadd.f32 %v4714_v39, %v4713_v63  ;;  %v5406_v43 = vpack.c.bf16 %v5592_v58, %v5592_v58  ;;  %v4760_v49 = vmul.f32 %v5592_v58, %v5592_v58  ;;  %v4720_v38 = vsel %vm1948_vm15, %v5592_v58, 0.0 }
 0x30c   : > { %4655 = vst.msk [vmem:[%s7847_s13 + $0x70] sm:$0xf] %vm455_vm0, %v5403_v37  ;;  %v4816_v25 = vsel %vm1948_vm15, %v4757_v52, 0.0  ;;  %v5404_v10 = vpack.c.bf16 %v5593_v57, %v5593_v57  ;;  %v4716_v1 = vsel %vm1948_vm15, %v5593_v57, 0.0  ;;  %v4758_v40 = vmul.f32 %v5593_v57, %v5593_v57 }
 0x30d   : > { %v4817_v13 = vadd.f32 %v4816_v25, %v4815_v22  ;;  %4658 = vst.msk [vmem:[%s7847_s13 + $0x7c] sm:$0xf] %vm455_vm0, %v5406_v43  ;;  %v4717_v20 = vadd.f32 %v4716_v1, %v4715_v47  ;;  %v4820_v45 = vsel %vm1948_vm15, %v4759_v46, 0.0  ;;  %v4822_v34 = vsel %vm1948_vm15, %v4760_v49, 0.0 }
 0x30e   : > { %4656 = vst.msk [vmem:[%s7847_s13 + $0x74] sm:$0xf] %vm455_vm0, %v5404_v10  ;;  %v4818_v7 = vsel %vm1948_vm15, %v4758_v40, 0.0  ;;  %s5911_s13 = smov [#allocation3]  }
 0x30f   : > { %v4719_v62 = vadd.f32 %v4718_v31, %v4717_v20  ;;  %v4819_v42 = vadd.f32 %v4818_v7, %v4817_v13  ;;  %s5800_s19 = sshll.u32 %s5911_s13, 4  ;;  %s5801_s19 = int_to_ptr.vmem [resolvable:$false] %s5800_s19 }
 0x310   : > { %s5802_s28 = scalar_lea.vmem %s5801_s19, 32  ;;  %p5803_p1 = scmp.lt.s32.totalorder %s7998_s17, %s5801_s19 }
 0x311   : > { %v4721_v44 = vadd.f32 %v4720_v38, %v4719_v62  ;;  %v4821_v55 = vadd.f32 %v4820_v45, %v4819_v42  ;;  %p5804_p2 = scmp.lt.s32.totalorder %s5802_s28, %s5796_s12 }
 0x313   : > { %v4722_v24 = vrot.slane %v4721_v44, 4  ;;  %v4823_v61 = vadd.f32 %v4822_v34, %v4821_v55  ;;  %p5805_p3 = por %p5804_p2, %p5803_p1 }
 0x315   : > { %v4723_v27 = vadd.f32 %v4722_v24, %v4721_v44  ;;  %v4824_v59 = vrot.slane %v4823_v61, 4  ;;  %p5806_p5 = pnand %p5805_p3, %p5799_p0 }
 0x317   : > { %v4724_v3 = vrot.slane %v4723_v27, 2  ;;  %v4825_v56 = vadd.f32 %v4824_v59, %v4823_v61 }
 0x319   : > { %v4725_v26 = vadd.f32 %v4724_v3, %v4723_v27  ;;  %v4826_v18 = vrot.slane %v4825_v56, 2 }
 0x31b   : > { %v4726_v8 = vrot.slane %v4725_v26, 1  ;;  %v4827_v6 = vadd.f32 %v4826_v18, %v4825_v56 }
 0x31d   : > { %v4727_v9 = vadd.f32 %v4726_v8, %v4725_v26  ;;  %v4828_v32 = vrot.slane %v4827_v6, 1 }
 0x31f   : > { %4728 = vst.msk [vmem:[%s288_s16] sm:$0x1] %vm458_vm1, %v4727_v9 }
 0x320   : > { %5809 = shalt.err (!%p5806_p5)
}
 0x321   : > { %s5810_s14 = scalar_lea.hbm %s7996_s30, 16  ;;  %s5814_s8 = scalar_lea.hbm %s8082_s5, 32 }
 0x322   : > { %p5811_p6 = scmp.ne.s32.totalorder %s7996_s30, %s5810_s14  ;;  %p5815_p10 = scmp.lt.u32.totalorder %s7996_s30, %s8082_s5 }
 0x323   : > { %p5816_p11 = scmp.lt.u32.totalorder %s5814_s8, %s5810_s14  ;;  %p5818_p13 = scmp.lt.u32.totalorder %s5810_s14, %s7996_s30 }
 0x324   : > { %p5812_p7 = pnand %p5811_p6, %p5988_p4 }
 0x325   : > { %p5817_p12 = por %p5816_p11, %p5815_p10 }
 0x326   : > { %p5813_p9 = pneg %p5812_p7 }
 0x327   : > { %p5819_p0 = por %p5818_p13, %p5817_p12 }
 0x329   : > { %p5820_p1 = pnand %p5819_p0, %p5813_p9 }
 0x32b   : > { %5823 = shalt.err (!%p5820_p1)
}
 0x32c   : > { %5630 = dma.vmem_to_hbm [thread:$0]  (%p5988_p4), %s7998_s17, 16, %s7996_s30, %s4840_s27   ;;  %v4829_v23 = vadd.f32 %v4828_v32, %v4827_v6 }
 0x32d   : > { %s4844_s12 = scalar_lea.sflag [#allocation6], %s7986_s11  ;;  %s5824_s28 = scalar_lea.vmem %s8006_s18, 16 }
 0x32e   : > { %4830 = vst.msk [vmem:[%s294_s15] sm:$0x1] %vm458_vm1, %v4829_v23  ;;  %p5825_p2 = scmp.ne.s32.totalorder %s8006_s18, %s5824_s28  ;;  %s5912_s14 = smov [#allocation5]  }
 0x32f   : > { %s5828_s16 = sshll.u32 %s5912_s14, 4  ;;  %s5829_s16 = int_to_ptr.vmem [resolvable:$false] %s5828_s16 }
 0x330   : > { %p5826_p3 = pnand %p5825_p2, %p5988_p4  ;;  %s5830_s24 = scalar_lea.vmem %s5829_s16, 32 }
 0x331   : > { %p5831_p6 = scmp.lt.s32.totalorder %s8006_s18, %s5829_s16  ;;  %p5832_p7 = scmp.lt.s32.totalorder %s5830_s24, %s5824_s28 }
 0x332   : > { %p5827_p5 = pneg %p5826_p3 }
 0x333   : > { %p5833_p9 = por %p5832_p7, %p5831_p6 }
 0x335   : > { %p5834_p10 = pnand %p5833_p9, %p5827_p5 }
 0x337   : > { %5837 = shalt.err (!%p5834_p10)
}
 0x338   : > { %s5838_s11 = scalar_lea.hbm %s8004_s20, 16  ;;  %s5842_s30 = scalar_lea.hbm %s8083_s6, 32 }
 0x339   : > { %p5839_p11 = scmp.ne.s32.totalorder %s8004_s20, %s5838_s11  ;;  %p5843_p0 = scmp.lt.u32.totalorder %s8004_s20, %s8083_s6 }
 0x33a   : > { %p5844_p1 = scmp.lt.u32.totalorder %s5842_s30, %s5838_s11  ;;  %p5846_p3 = scmp.lt.u32.totalorder %s5838_s11, %s8004_s20 }
 0x33b   : > { %p5840_p12 = pnand %p5839_p11, %p5988_p4 }
 0x33c   : > { %p5845_p2 = por %p5844_p1, %p5843_p0 }
 0x33d   : > { %p5841_p13 = pneg %p5840_p12 }
 0x33e   : > { %p5847_p5 = por %p5846_p3, %p5845_p2 }
 0x340   : > { %p5848_p6 = pnand %p5847_p5, %p5841_p13 }
 0x342   : > { %5851 = shalt.err (!%p5848_p6)
}
 0x343   : > { %5631 = dma.vmem_to_hbm [thread:$0]  (%p5988_p4), %s8006_s18, 16, %s8004_s20, %s4844_s12  }
 0x344 PF: > { %p5641_p7 = scmp.ge.s32.totalorder %s5906_s26, 2  ;;  %s4897_s13 = sand.u32 1, %s5886_s21  }
 0x345   : > { %s4898_s19 = scalar_lea.sflag [#allocation4], %s4897_s13 }
 0x346   : > { %p5635_p9 = pnand %p5641_p7, %p5995_p8 }
 0x348   : > { %5877 = dma.done.wait (!%p5635_p9), %s4898_s19, 16  }
 0x349   : > { %5879 = vsyncadd (!%p5635_p9), %s4898_s19, 4294967280  ;;  %s4906_s28 = scalar_lea.sflag [#allocation6], %s4897_s13 }
 0x34a   : > { %5881 = dma.done.wait (!%p5635_p9), %s4906_s28, 16  }
 0x34b   : > { %5883 = vsyncadd (!%p5635_p9), %s4906_s28, 4294967280  ;;  %s23_s26 = sadd.s32 1, %s5906_s26   ;;  %s8110_s21 = smov %s5890_s22 }
 0x34c   : > { %p20_p10 = scmp.ge.s32.totalorder %s23_s26, 4   ;;  %s8111_s22 = smov %s5894_s23 }
 0x34d   : > { %s8112_s23 = smov %s6001_s10  ;;  %s8113_s24 = smov %s5902_s25 }
 0x34e   : > { %s8114_s25 = smov %s8116_s29  ;;  %22 = sbr.rel (!%p20_p10) target bundleno = 6 (0x6), region = 106 }
 0x355   :  { %4910 = vsyncpa [#allocation4], 1 }
 0x356   :  { %4912 = vsyncpa [#allocation4 + $0x1], 1 }
 0x357   :  { %4913 = vsyncpa [#allocation6], 1 }
 0x358   :  { %4915 = vsyncpa [#allocation6 + $0x1], 1 }

</bundles_post_ra>
